<compile_context>
chip_gen: v7x
topology: tpu7x:2x2x1
jax: 0.10.0
libtpu: 0.0.40
codegen_flags: <defaults>
</compile_context>

<pallas_src>
import functools

import jax
import jax.numpy as jnp
from jax import lax
from jax.experimental import pallas as pl
from jax.experimental.pallas import tpu as pltpu


# --------------------------- fused LSTM + heads kernel ---------------------------
def _fused_lm_kernel(x_ref, wih_ref, whh_ref, b_ref, wh_ref, bh_ref,
                     out_ref, *, batch, seq_len, hidden):
    """All refs are full arrays resident in VMEM (no grid).

    x_ref   : (T*B, H)    time-major flattened embeddings
    wih_ref : (L, H, 4H)  transposed input->gate weights
    whh_ref : (L, H, 4H)  transposed hidden->gate weights
    b_ref   : (L, 1, 4H)  combined bias (b_ih + b_hh)
    wh_ref  : (H, Cpad)   concatenated + lane-padded head weights [lin1.T | lin2.T | 0]
    bh_ref  : (1, Cpad)   concatenated + lane-padded head biases
    out_ref : (T*B, Cpad) concatenated head outputs (time-major, lane-dense)
    """
    num_layers = wih_ref.shape[0]
    B, T, H = batch, seq_len, hidden

    # Activations live entirely in vregs; no scratch round-trips between layers.
    inp = x_ref[...]                                           # (T*B, H)

    for layer in range(num_layers):                            # static unroll over layers
        # Batched input projection for all timesteps at once (off the serial path),
        # with the combined bias folded in.
        xproj = (
            jnp.dot(inp, wih_ref[layer], preferred_element_type=jnp.float32)
            + b_ref[layer]
        )                                                      # (T*B, 4H)

        w_hh = whh_ref[layer]                                  # (H, 4H), loaded once/layer
        h = jnp.zeros((B, H), jnp.float32)
        c = jnp.zeros((B, H), jnp.float32)
        hs = []

        for t in range(T):                                     # static unroll over time
            gates = xproj[t * B:(t + 1) * B, :] + jnp.dot(
                h, w_hh, preferred_element_type=jnp.float32)   # (B, 4H)

            # Full-width nonlinearities: one sigmoid + one tanh over all 4H lanes
            # (EUP work), then lane slices for the gate combine.
            sg = jax.nn.sigmoid(gates)                         # [sig(i)|sig(f)|sig(g)|sig(o)]
            tg = jnp.tanh(gates)                               # [  .   |  .   |tanh(g)|  .  ]
            i_g = sg[:, 0 * H:1 * H]
            f_g = sg[:, 1 * H:2 * H]
            o_g = sg[:, 3 * H:4 * H]
            g_g = tg[:, 2 * H:3 * H]

            c = f_g * c + i_g * g_g
            h = o_g * jnp.tanh(c)
            hs.append(h)                                       # stays in vregs

        # One concatenate per layer -> next layer's input / head input.
        inp = jnp.concatenate(hs, axis=0)                      # (T*B, H)

    # Fused heads: one (T*B, H) @ (H, Cpad) matmul on vreg-resident activations,
    # lane-dense (padded) full-width output store.
    out_ref[...] = (
        jnp.dot(inp, wh_ref[...], preferred_element_type=jnp.float32)
        + bh_ref[...]
    )


def fused_lm(x_tm, wih, whh, bias, w_head, b_head, *, batch):
    """x_tm: (T*B, H) time-major; returns (T*B, Cpad)."""
    TB, H = x_tm.shape
    seq_len = TB // batch
    num_layers = wih.shape[0]
    c_pad = w_head.shape[1]

    kernel = functools.partial(
        _fused_lm_kernel, batch=batch, seq_len=seq_len, hidden=H)

    # VMEM scaling guard: size the scoped limit from the actual buffers
    # (inputs + output + per-layer xproj temporaries), with generous headroom.
    nbytes = sum(int(a.size) * a.dtype.itemsize
                 for a in (x_tm, wih, whh, bias, w_head, b_head))
    nbytes += TB * c_pad * 4                 # output
    nbytes += num_layers * TB * 4 * H * 4    # xproj temporaries (f32)
    vmem_limit = int(min(64 << 20, max(16 << 20, 8 * nbytes)))

    return pl.pallas_call(
        kernel,
        out_shape=jax.ShapeDtypeStruct((TB, c_pad), jnp.float32),
        in_specs=[pl.BlockSpec(memory_space=pltpu.MemorySpace.VMEM)] * 6,
        out_specs=pl.BlockSpec(memory_space=pltpu.MemorySpace.VMEM),
        compiler_params=pltpu.CompilerParams(vmem_limit_bytes=vmem_limit),
    )(x_tm, wih, whh, bias, w_head, b_head)


# ----------------------------- parameters -----------------------------
def init_params(key, num_classes, num_hidden, num_layers=4):
    H = num_hidden
    k = 1.0 / jnp.sqrt(jnp.float32(H))
    keys = jax.random.split(key, 6 + 4 * num_layers)
    params = {
        "emb1": jax.random.normal(keys[0], (num_classes, H // 2), jnp.float32),
        "emb2": jax.random.normal(keys[1], (num_classes, H // 2), jnp.float32),
        "lin1_w": jax.random.uniform(keys[2], (num_classes, H), jnp.float32, -k, k),
        "lin1_b": jax.random.uniform(keys[3], (num_classes,), jnp.float32, -k, k),
        "lin2_w": jax.random.uniform(keys[4], (num_classes, H), jnp.float32, -k, k),
        "lin2_b": jax.random.uniform(keys[5], (num_classes,), jnp.float32, -k, k),
        "lstm": [],
    }
    for l in range(num_layers):
        base = 6 + 4 * l
        w_ih = jax.random.uniform(keys[base + 0], (4 * H, H), jnp.float32, -k, k)
        w_hh = jax.random.uniform(keys[base + 1], (4 * H, H), jnp.float32, -k, k)
        b_ih = jax.random.uniform(keys[base + 2], (4 * H,), jnp.float32, -k, k)
        b_hh = jax.random.uniform(keys[base + 3], (4 * H,), jnp.float32, -k, k)
        params["lstm"].append((w_ih, w_hh, b_ih, b_hh))
    return params


def prepare_params(params):
    """One-time prep: transpose/stack LSTM weights, fuse biases, merge + lane-pad heads."""
    wih = jnp.stack([jnp.transpose(w_ih) for (w_ih, _, _, _) in params["lstm"]])   # (L,H,4H)
    whh = jnp.stack([jnp.transpose(w_hh) for (_, w_hh, _, _) in params["lstm"]])   # (L,H,4H)
    bias = jnp.stack(
        [(b_ih + b_hh).reshape(1, -1) for (_, _, b_ih, b_hh) in params["lstm"]])   # (L,1,4H)

    w_head = jnp.concatenate(
        [jnp.transpose(params["lin1_w"]), jnp.transpose(params["lin2_w"])], axis=1)  # (H,2C)
    b_head = jnp.concatenate([params["lin1_b"], params["lin2_b"]]).reshape(1, -1)    # (1,2C)

    # Lane-dense head output: zero-pad 2C up to a multiple of 128 lanes (one-time cost).
    two_c = w_head.shape[1]
    c_pad = max(128, ((two_c + 127) // 128) * 128)
    if c_pad != two_c:
        w_head = jnp.pad(w_head, ((0, 0), (0, c_pad - two_c)))
        b_head = jnp.pad(b_head, ((0, 0), (0, c_pad - two_c)))

    return {
        "emb1": params["emb1"], "emb2": params["emb2"],
        "wih": wih, "whh": whh, "bias": bias,
        "w_head": w_head, "b_head": b_head,
    }


# ----------------------------- forward -----------------------------
@functools.partial(jax.jit, static_argnames=("num_classes",))
def model_lm_forward(prep, input1, input2, *, num_classes):
    B, T = input1.shape
    # Embedding lookup + concat (glue, plain JAX gather), produced time-major directly.
    ids1 = jnp.transpose(input1)                             # (T, B)
    ids2 = jnp.transpose(input2)
    e1 = jnp.take(prep["emb1"], ids1, axis=0)                # (T, B, H/2)
    e2 = jnp.take(prep["emb2"], ids2, axis=0)                # (T, B, H/2)
    x = jnp.concatenate([e1, e2], axis=2)                    # (T, B, H)
    H = x.shape[2]
    x_tm = x.reshape(T * B, H)                               # time-major flattened

    # TODO(synk): nn.LSTM dropout=0.2 between layers is a no-op in eval/inference; not applied.
    out = fused_lm(x_tm, prep["wih"], prep["whh"], prep["bias"],
                   prep["w_head"], prep["b_head"], batch=B)  # (T*B, Cpad)

    c_pad = out.shape[1]
    out = jnp.transpose(out.reshape(T, B, c_pad), (1, 0, 2))  # (B, T, Cpad)
    C = num_classes
    return out[..., 0:C], out[..., C:2 * C]


# ----------------------------- Pure-JAX reference -----------------------------
def _reference_forward(params, input1, input2):
    e1 = jnp.take(params["emb1"], input1, axis=0)
    e2 = jnp.take(params["emb2"], input2, axis=0)
    x = jnp.concatenate([e1, e2], axis=2)                    # (B, T, H)
    B, T, H = x.shape

    def layer(x_btH, w_ih, w_hh, b_ih, b_hh):
        def step(carry, x_t):
            h, c = carry
            g = x_t @ w_ih.T + h @ w_hh.T + b_ih + b_hh
            i = jax.nn.sigmoid(g[:, 0 * H:1 * H])
            f = jax.nn.sigmoid(g[:, 1 * H:2 * H])
            gg = jnp.tanh(g[:, 2 * H:3 * H])
            o = jax.nn.sigmoid(g[:, 3 * H:4 * H])
            c = f * c + i * gg
            h = o * jnp.tanh(c)
            return (h, c), h
        init = (jnp.zeros((B, H)), jnp.zeros((B, H)))
        _, ys = lax.scan(step, init, jnp.transpose(x_btH, (1, 0, 2)))
        return jnp.transpose(ys, (1, 0, 2))

    for (w_ih, w_hh, b_ih, b_hh) in params["lstm"]:
        x = layer(x, w_ih, w_hh, b_ih, b_hh)
    p1 = x @ params["lin1_w"].T + params["lin1_b"]
    p2 = x @ params["lin2_w"].T + params["lin2_b"]
    return p1, p2


if __name__ == "__main__":
    NUM_CLASSES = 16
    NUM_HIDDEN = 32
    B, T = 2, 8

    key = jax.random.PRNGKey(0)
    kp, k1, k2 = jax.random.split(key, 3)
    params = init_params(kp, NUM_CLASSES, NUM_HIDDEN)
    prep = prepare_params(params)

    input1 = jax.random.randint(k1, (B, T), 0, NUM_CLASSES, dtype=jnp.int32)
    input2 = jax.random.randint(k2, (B, T), 0, NUM_CLASSES, dtype=jnp.int32)

    pred1, pred2 = model_lm_forward(prep, input1, input2, num_classes=NUM_CLASSES)
    jax.block_until_ready((pred1, pred2))

    ref1, ref2 = _reference_forward(params, input1, input2)
    assert pred1.shape == (B, T, NUM_CLASSES) and pred2.shape == (B, T, NUM_CLASSES)
    assert jnp.allclose(pred1, ref1, atol=1e-4, rtol=1e-4)
    assert jnp.allclose(pred2, ref2, atol=1e-4, rtol=1e-4)

    print("KERNEL_OK")
</pallas_src>

<mosaic_0001>
module attributes {stable_mosaic.version = 11 : i64} {
  func.func @_fused_lm_kernel(%arg0: memref<16x32xf32, #tpu.memory_space<vmem>>, %arg1: memref<4x32x128xf32, #tpu.memory_space<vmem>>, %arg2: memref<4x32x128xf32, #tpu.memory_space<vmem>>, %arg3: memref<4x1x128xf32, #tpu.memory_space<vmem>>, %arg4: memref<32x128xf32, #tpu.memory_space<vmem>>, %arg5: memref<1x128xf32, #tpu.memory_space<vmem>>, %arg6: memref<16x128xf32, #tpu.memory_space<vmem>>) attributes {dimension_semantics = [], scalar_prefetch = 0 : i64, scratch_operands = 0 : i64, tpu.core_type = #tpu.core_type<tc>} {
    %c0 = arith.constant 0 : index
    %c0_0 = arith.constant 0 : index
    %0 = vector.load %arg0[%c0, %c0_0] : memref<16x32xf32, #tpu.memory_space<vmem>>, vector<16x32xf32>
    %c0_1 = arith.constant 0 : index
    %c0_2 = arith.constant 0 : index
    %c0_3 = arith.constant 0 : index
    %1 = vector.load %arg1[%c0_1, %c0_2, %c0_3] : memref<4x32x128xf32, #tpu.memory_space<vmem>>, vector<1x32x128xf32>
    %2 = vector.shape_cast %1 : vector<1x32x128xf32> to vector<32x128xf32>
    %cst = arith.constant dense<0.000000e+00> : vector<16x128xf32>
    %3 = tpu.matmul %0, %2, %cst {dimension_numbers = #tpu.dot_dimension_numbers<[1], [0], [0], [1], [0, 0, 1, 1], [], []>} : vector<16x32xf32>, vector<32x128xf32>, vector<16x128xf32> -> vector<16x128xf32>
    %c0_4 = arith.constant 0 : index
    %c0_5 = arith.constant 0 : index
    %c0_6 = arith.constant 0 : index
    %4 = vector.load %arg3[%c0_4, %c0_5, %c0_6] : memref<4x1x128xf32, #tpu.memory_space<vmem>>, vector<1x1x128xf32>
    %5 = vector.shape_cast %4 : vector<1x1x128xf32> to vector<1x128xf32>
    %6 = vector.broadcast %5 : vector<1x128xf32> to vector<16x128xf32>
    %7 = arith.addf %3, %6 : vector<16x128xf32>
    %c0_7 = arith.constant 0 : index
    %c0_8 = arith.constant 0 : index
    %c0_9 = arith.constant 0 : index
    %8 = vector.load %arg2[%c0_7, %c0_8, %c0_9] : memref<4x32x128xf32, #tpu.memory_space<vmem>>, vector<1x32x128xf32>
    %9 = vector.shape_cast %8 : vector<1x32x128xf32> to vector<32x128xf32>
    %cst_10 = arith.constant 0.000000e+00 : f32
    %10 = vector.broadcast %cst_10 : f32 to vector<2x32xf32>
    %cst_11 = arith.constant 0.000000e+00 : f32
    %11 = vector.broadcast %cst_11 : f32 to vector<2x32xf32>
    %12 = vector.extract_strided_slice %7 {offsets = [0, 0], sizes = [2, 128], strides = [1, 1]} : vector<16x128xf32> to vector<2x128xf32>
    %cst_12 = arith.constant dense<0.000000e+00> : vector<2x128xf32>
    %13 = tpu.matmul %10, %9, %cst_12 {dimension_numbers = #tpu.dot_dimension_numbers<[1], [0], [0], [1], [0, 0, 1, 1], [], []>} : vector<2x32xf32>, vector<32x128xf32>, vector<2x128xf32> -> vector<2x128xf32>
    %14 = arith.addf %12, %13 : vector<2x128xf32>
    %15 = arith.negf %14 : vector<2x128xf32>
    %16 = math.exp %15 : vector<2x128xf32>
    %cst_13 = arith.constant 1.000000e+00 : f32
    %17 = vector.broadcast %cst_13 : f32 to vector<2x128xf32>
    %18 = arith.addf %17, %16 : vector<2x128xf32>
    %19 = arith.divf %17, %18 : vector<2x128xf32>
    %20 = math.tanh %14 : vector<2x128xf32>
    %21 = vector.extract_strided_slice %19 {offsets = [0, 0], sizes = [2, 32], strides = [1, 1]} : vector<2x128xf32> to vector<2x32xf32>
    %22 = vector.extract_strided_slice %19 {offsets = [0, 32], sizes = [2, 32], strides = [1, 1]} : vector<2x128xf32> to vector<2x32xf32>
    %23 = vector.extract_strided_slice %19 {offsets = [0, 96], sizes = [2, 32], strides = [1, 1]} : vector<2x128xf32> to vector<2x32xf32>
    %24 = vector.extract_strided_slice %20 {offsets = [0, 64], sizes = [2, 32], strides = [1, 1]} : vector<2x128xf32> to vector<2x32xf32>
    %25 = arith.mulf %22, %11 : vector<2x32xf32>
    %26 = arith.mulf %21, %24 : vector<2x32xf32>
    %27 = arith.addf %25, %26 : vector<2x32xf32>
    %28 = math.tanh %27 : vector<2x32xf32>
    %29 = arith.mulf %23, %28 : vector<2x32xf32>
    %30 = vector.extract_strided_slice %7 {offsets = [2, 0], sizes = [2, 128], strides = [1, 1]} : vector<16x128xf32> to vector<2x128xf32>
    %cst_14 = arith.constant dense<0.000000e+00> : vector<2x128xf32>
    %31 = tpu.matmul %29, %9, %cst_14 {dimension_numbers = #tpu.dot_dimension_numbers<[1], [0], [0], [1], [0, 0, 1, 1], [], []>} : vector<2x32xf32>, vector<32x128xf32>, vector<2x128xf32> -> vector<2x128xf32>
    %32 = arith.addf %30, %31 : vector<2x128xf32>
    %33 = arith.negf %32 : vector<2x128xf32>
    %34 = math.exp %33 : vector<2x128xf32>
    %cst_15 = arith.constant 1.000000e+00 : f32
    %35 = vector.broadcast %cst_15 : f32 to vector<2x128xf32>
    %36 = arith.addf %35, %34 : vector<2x128xf32>
    %37 = arith.divf %35, %36 : vector<2x128xf32>
    %38 = math.tanh %32 : vector<2x128xf32>
    %39 = vector.extract_strided_slice %37 {offsets = [0, 0], sizes = [2, 32], strides = [1, 1]} : vector<2x128xf32> to vector<2x32xf32>
    %40 = vector.extract_strided_slice %37 {offsets = [0, 32], sizes = [2, 32], strides = [1, 1]} : vector<2x128xf32> to vector<2x32xf32>
    %41 = vector.extract_strided_slice %37 {offsets = [0, 96], sizes = [2, 32], strides = [1, 1]} : vector<2x128xf32> to vector<2x32xf32>
    %42 = vector.extract_strided_slice %38 {offsets = [0, 64], sizes = [2, 32], strides = [1, 1]} : vector<2x128xf32> to vector<2x32xf32>
    %43 = arith.mulf %40, %27 : vector<2x32xf32>
    %44 = arith.mulf %39, %42 : vector<2x32xf32>
    %45 = arith.addf %43, %44 : vector<2x32xf32>
    %46 = math.tanh %45 : vector<2x32xf32>
    %47 = arith.mulf %41, %46 : vector<2x32xf32>
    %48 = vector.extract_strided_slice %7 {offsets = [4, 0], sizes = [2, 128], strides = [1, 1]} : vector<16x128xf32> to vector<2x128xf32>
    %cst_16 = arith.constant dense<0.000000e+00> : vector<2x128xf32>
    %49 = tpu.matmul %47, %9, %cst_16 {dimension_numbers = #tpu.dot_dimension_numbers<[1], [0], [0], [1], [0, 0, 1, 1], [], []>} : vector<2x32xf32>, vector<32x128xf32>, vector<2x128xf32> -> vector<2x128xf32>
    %50 = arith.addf %48, %49 : vector<2x128xf32>
    %51 = arith.negf %50 : vector<2x128xf32>
    %52 = math.exp %51 : vector<2x128xf32>
    %cst_17 = arith.constant 1.000000e+00 : f32
    %53 = vector.broadcast %cst_17 : f32 to vector<2x128xf32>
    %54 = arith.addf %53, %52 : vector<2x128xf32>
    %55 = arith.divf %53, %54 : vector<2x128xf32>
    %56 = math.tanh %50 : vector<2x128xf32>
    %57 = vector.extract_strided_slice %55 {offsets = [0, 0], sizes = [2, 32], strides = [1, 1]} : vector<2x128xf32> to vector<2x32xf32>
    %58 = vector.extract_strided_slice %55 {offsets = [0, 32], sizes = [2, 32], strides = [1, 1]} : vector<2x128xf32> to vector<2x32xf32>
    %59 = vector.extract_strided_slice %55 {offsets = [0, 96], sizes = [2, 32], strides = [1, 1]} : vector<2x128xf32> to vector<2x32xf32>
    %60 = vector.extract_strided_slice %56 {offsets = [0, 64], sizes = [2, 32], strides = [1, 1]} : vector<2x128xf32> to vector<2x32xf32>
    %61 = arith.mulf %58, %45 : vector<2x32xf32>
    %62 = arith.mulf %57, %60 : vector<2x32xf32>
    %63 = arith.addf %61, %62 : vector<2x32xf32>
    %64 = math.tanh %63 : vector<2x32xf32>
    %65 = arith.mulf %59, %64 : vector<2x32xf32>
    %66 = vector.extract_strided_slice %7 {offsets = [6, 0], sizes = [2, 128], strides = [1, 1]} : vector<16x128xf32> to vector<2x128xf32>
    %cst_18 = arith.constant dense<0.000000e+00> : vector<2x128xf32>
    %67 = tpu.matmul %65, %9, %cst_18 {dimension_numbers = #tpu.dot_dimension_numbers<[1], [0], [0], [1], [0, 0, 1, 1], [], []>} : vector<2x32xf32>, vector<32x128xf32>, vector<2x128xf32> -> vector<2x128xf32>
    %68 = arith.addf %66, %67 : vector<2x128xf32>
    %69 = arith.negf %68 : vector<2x128xf32>
    %70 = math.exp %69 : vector<2x128xf32>
    %cst_19 = arith.constant 1.000000e+00 : f32
    %71 = vector.broadcast %cst_19 : f32 to vector<2x128xf32>
    %72 = arith.addf %71, %70 : vector<2x128xf32>
    %73 = arith.divf %71, %72 : vector<2x128xf32>
    %74 = math.tanh %68 : vector<2x128xf32>
    %75 = vector.extract_strided_slice %73 {offsets = [0, 0], sizes = [2, 32], strides = [1, 1]} : vector<2x128xf32> to vector<2x32xf32>
    %76 = vector.extract_strided_slice %73 {offsets = [0, 32], sizes = [2, 32], strides = [1, 1]} : vector<2x128xf32> to vector<2x32xf32>
    %77 = vector.extract_strided_slice %73 {offsets = [0, 96], sizes = [2, 32], strides = [1, 1]} : vector<2x128xf32> to vector<2x32xf32>
    %78 = vector.extract_strided_slice %74 {offsets = [0, 64], sizes = [2, 32], strides = [1, 1]} : vector<2x128xf32> to vector<2x32xf32>
    %79 = arith.mulf %76, %63 : vector<2x32xf32>
    %80 = arith.mulf %75, %78 : vector<2x32xf32>
    %81 = arith.addf %79, %80 : vector<2x32xf32>
    %82 = math.tanh %81 : vector<2x32xf32>
    %83 = arith.mulf %77, %82 : vector<2x32xf32>
    %84 = vector.extract_strided_slice %7 {offsets = [8, 0], sizes = [2, 128], strides = [1, 1]} : vector<16x128xf32> to vector<2x128xf32>
    %cst_20 = arith.constant dense<0.000000e+00> : vector<2x128xf32>
    %85 = tpu.matmul %83, %9, %cst_20 {dimension_numbers = #tpu.dot_dimension_numbers<[1], [0], [0], [1], [0, 0, 1, 1], [], []>} : vector<2x32xf32>, vector<32x128xf32>, vector<2x128xf32> -> vector<2x128xf32>
    %86 = arith.addf %84, %85 : vector<2x128xf32>
    %87 = arith.negf %86 : vector<2x128xf32>
    %88 = math.exp %87 : vector<2x128xf32>
    %cst_21 = arith.constant 1.000000e+00 : f32
    %89 = vector.broadcast %cst_21 : f32 to vector<2x128xf32>
    %90 = arith.addf %89, %88 : vector<2x128xf32>
    %91 = arith.divf %89, %90 : vector<2x128xf32>
    %92 = math.tanh %86 : vector<2x128xf32>
    %93 = vector.extract_strided_slice %91 {offsets = [0, 0], sizes = [2, 32], strides = [1, 1]} : vector<2x128xf32> to vector<2x32xf32>
    %94 = vector.extract_strided_slice %91 {offsets = [0, 32], sizes = [2, 32], strides = [1, 1]} : vector<2x128xf32> to vector<2x32xf32>
    %95 = vector.extract_strided_slice %91 {offsets = [0, 96], sizes = [2, 32], strides = [1, 1]} : vector<2x128xf32> to vector<2x32xf32>
    %96 = vector.extract_strided_slice %92 {offsets = [0, 64], sizes = [2, 32], strides = [1, 1]} : vector<2x128xf32> to vector<2x32xf32>
    %97 = arith.mulf %94, %81 : vector<2x32xf32>
    %98 = arith.mulf %93, %96 : vector<2x32xf32>
    %99 = arith.addf %97, %98 : vector<2x32xf32>
    %100 = math.tanh %99 : vector<2x32xf32>
    %101 = arith.mulf %95, %100 : vector<2x32xf32>
    %102 = vector.extract_strided_slice %7 {offsets = [10, 0], sizes = [2, 128], strides = [1, 1]} : vector<16x128xf32> to vector<2x128xf32>
    %cst_22 = arith.constant dense<0.000000e+00> : vector<2x128xf32>
    %103 = tpu.matmul %101, %9, %cst_22 {dimension_numbers = #tpu.dot_dimension_numbers<[1], [0], [0], [1], [0, 0, 1, 1], [], []>} : vector<2x32xf32>, vector<32x128xf32>, vector<2x128xf32> -> vector<2x128xf32>
    %104 = arith.addf %102, %103 : vector<2x128xf32>
    %105 = arith.negf %104 : vector<2x128xf32>
    %106 = math.exp %105 : vector<2x128xf32>
    %cst_23 = arith.constant 1.000000e+00 : f32
    %107 = vector.broadcast %cst_23 : f32 to vector<2x128xf32>
    %108 = arith.addf %107, %106 : vector<2x128xf32>
    %109 = arith.divf %107, %108 : vector<2x128xf32>
    %110 = math.tanh %104 : vector<2x128xf32>
    %111 = vector.extract_strided_slice %109 {offsets = [0, 0], sizes = [2, 32], strides = [1, 1]} : vector<2x128xf32> to vector<2x32xf32>
    %112 = vector.extract_strided_slice %109 {offsets = [0, 32], sizes = [2, 32], strides = [1, 1]} : vector<2x128xf32> to vector<2x32xf32>
    %113 = vector.extract_strided_slice %109 {offsets = [0, 96], sizes = [2, 32], strides = [1, 1]} : vector<2x128xf32> to vector<2x32xf32>
    %114 = vector.extract_strided_slice %110 {offsets = [0, 64], sizes = [2, 32], strides = [1, 1]} : vector<2x128xf32> to vector<2x32xf32>
    %115 = arith.mulf %112, %99 : vector<2x32xf32>
    %116 = arith.mulf %111, %114 : vector<2x32xf32>
    %117 = arith.addf %115, %116 : vector<2x32xf32>
    %118 = math.tanh %117 : vector<2x32xf32>
    %119 = arith.mulf %113, %118 : vector<2x32xf32>
    %120 = vector.extract_strided_slice %7 {offsets = [12, 0], sizes = [2, 128], strides = [1, 1]} : vector<16x128xf32> to vector<2x128xf32>
    %cst_24 = arith.constant dense<0.000000e+00> : vector<2x128xf32>
    %121 = tpu.matmul %119, %9, %cst_24 {dimension_numbers = #tpu.dot_dimension_numbers<[1], [0], [0], [1], [0, 0, 1, 1], [], []>} : vector<2x32xf32>, vector<32x128xf32>, vector<2x128xf32> -> vector<2x128xf32>
    %122 = arith.addf %120, %121 : vector<2x128xf32>
    %123 = arith.negf %122 : vector<2x128xf32>
    %124 = math.exp %123 : vector<2x128xf32>
    %cst_25 = arith.constant 1.000000e+00 : f32
    %125 = vector.broadcast %cst_25 : f32 to vector<2x128xf32>
    %126 = arith.addf %125, %124 : vector<2x128xf32>
    %127 = arith.divf %125, %126 : vector<2x128xf32>
    %128 = math.tanh %122 : vector<2x128xf32>
    %129 = vector.extract_strided_slice %127 {offsets = [0, 0], sizes = [2, 32], strides = [1, 1]} : vector<2x128xf32> to vector<2x32xf32>
    %130 = vector.extract_strided_slice %127 {offsets = [0, 32], sizes = [2, 32], strides = [1, 1]} : vector<2x128xf32> to vector<2x32xf32>
    %131 = vector.extract_strided_slice %127 {offsets = [0, 96], sizes = [2, 32], strides = [1, 1]} : vector<2x128xf32> to vector<2x32xf32>
    %132 = vector.extract_strided_slice %128 {offsets = [0, 64], sizes = [2, 32], strides = [1, 1]} : vector<2x128xf32> to vector<2x32xf32>
    %133 = arith.mulf %130, %117 : vector<2x32xf32>
    %134 = arith.mulf %129, %132 : vector<2x32xf32>
    %135 = arith.addf %133, %134 : vector<2x32xf32>
    %136 = math.tanh %135 : vector<2x32xf32>
    %137 = arith.mulf %131, %136 : vector<2x32xf32>
    %138 = vector.extract_strided_slice %7 {offsets = [14, 0], sizes = [2, 128], strides = [1, 1]} : vector<16x128xf32> to vector<2x128xf32>
    %cst_26 = arith.constant dense<0.000000e+00> : vector<2x128xf32>
    %139 = tpu.matmul %137, %9, %cst_26 {dimension_numbers = #tpu.dot_dimension_numbers<[1], [0], [0], [1], [0, 0, 1, 1], [], []>} : vector<2x32xf32>, vector<32x128xf32>, vector<2x128xf32> -> vector<2x128xf32>
    %140 = arith.addf %138, %139 : vector<2x128xf32>
    %141 = arith.negf %140 : vector<2x128xf32>
    %142 = math.exp %141 : vector<2x128xf32>
    %cst_27 = arith.constant 1.000000e+00 : f32
    %143 = vector.broadcast %cst_27 : f32 to vector<2x128xf32>
    %144 = arith.addf %143, %142 : vector<2x128xf32>
    %145 = arith.divf %143, %144 : vector<2x128xf32>
    %146 = math.tanh %140 : vector<2x128xf32>
    %147 = vector.extract_strided_slice %145 {offsets = [0, 0], sizes = [2, 32], strides = [1, 1]} : vector<2x128xf32> to vector<2x32xf32>
    %148 = vector.extract_strided_slice %145 {offsets = [0, 32], sizes = [2, 32], strides = [1, 1]} : vector<2x128xf32> to vector<2x32xf32>
    %149 = vector.extract_strided_slice %145 {offsets = [0, 96], sizes = [2, 32], strides = [1, 1]} : vector<2x128xf32> to vector<2x32xf32>
    %150 = vector.extract_strided_slice %146 {offsets = [0, 64], sizes = [2, 32], strides = [1, 1]} : vector<2x128xf32> to vector<2x32xf32>
    %151 = arith.mulf %148, %135 : vector<2x32xf32>
    %152 = arith.mulf %147, %150 : vector<2x32xf32>
    %153 = arith.addf %151, %152 : vector<2x32xf32>
    %154 = math.tanh %153 : vector<2x32xf32>
    %155 = arith.mulf %149, %154 : vector<2x32xf32>
    %156 = tpu.concatenate %29, %47, %65, %83, %101, %119, %137, %155 in 0 : vector<2x32xf32>, vector<2x32xf32>, vector<2x32xf32>, vector<2x32xf32>, vector<2x32xf32>, vector<2x32xf32>, vector<2x32xf32>, vector<2x32xf32> -> vector<16x32xf32>
    %c1 = arith.constant 1 : index
    %c0_28 = arith.constant 0 : index
    %c0_29 = arith.constant 0 : index
    %157 = vector.load %arg1[%c1, %c0_28, %c0_29] : memref<4x32x128xf32, #tpu.memory_space<vmem>>, vector<1x32x128xf32>
    %158 = vector.shape_cast %157 : vector<1x32x128xf32> to vector<32x128xf32>
    %cst_30 = arith.constant dense<0.000000e+00> : vector<16x128xf32>
    %159 = tpu.matmul %156, %158, %cst_30 {dimension_numbers = #tpu.dot_dimension_numbers<[1], [0], [0], [1], [0, 0, 1, 1], [], []>} : vector<16x32xf32>, vector<32x128xf32>, vector<16x128xf32> -> vector<16x128xf32>
    %c1_31 = arith.constant 1 : index
    %c0_32 = arith.constant 0 : index
    %c0_33 = arith.constant 0 : index
    %160 = vector.load %arg3[%c1_31, %c0_32, %c0_33] : memref<4x1x128xf32, #tpu.memory_space<vmem>>, vector<1x1x128xf32>
    %161 = vector.shape_cast %160 : vector<1x1x128xf32> to vector<1x128xf32>
    %162 = vector.broadcast %161 : vector<1x128xf32> to vector<16x128xf32>
    %163 = arith.addf %159, %162 : vector<16x128xf32>
    %c1_34 = arith.constant 1 : index
    %c0_35 = arith.constant 0 : index
    %c0_36 = arith.constant 0 : index
    %164 = vector.load %arg2[%c1_34, %c0_35, %c0_36] : memref<4x32x128xf32, #tpu.memory_space<vmem>>, vector<1x32x128xf32>
    %165 = vector.shape_cast %164 : vector<1x32x128xf32> to vector<32x128xf32>
    %cst_37 = arith.constant 0.000000e+00 : f32
    %166 = vector.broadcast %cst_37 : f32 to vector<2x32xf32>
    %cst_38 = arith.constant 0.000000e+00 : f32
    %167 = vector.broadcast %cst_38 : f32 to vector<2x32xf32>
    %168 = vector.extract_strided_slice %163 {offsets = [0, 0], sizes = [2, 128], strides = [1, 1]} : vector<16x128xf32> to vector<2x128xf32>
    %cst_39 = arith.constant dense<0.000000e+00> : vector<2x128xf32>
    %169 = tpu.matmul %166, %165, %cst_39 {dimension_numbers = #tpu.dot_dimension_numbers<[1], [0], [0], [1], [0, 0, 1, 1], [], []>} : vector<2x32xf32>, vector<32x128xf32>, vector<2x128xf32> -> vector<2x128xf32>
    %170 = arith.addf %168, %169 : vector<2x128xf32>
    %171 = arith.negf %170 : vector<2x128xf32>
    %172 = math.exp %171 : vector<2x128xf32>
    %cst_40 = arith.constant 1.000000e+00 : f32
    %173 = vector.broadcast %cst_40 : f32 to vector<2x128xf32>
    %174 = arith.addf %173, %172 : vector<2x128xf32>
    %175 = arith.divf %173, %174 : vector<2x128xf32>
    %176 = math.tanh %170 : vector<2x128xf32>
    %177 = vector.extract_strided_slice %175 {offsets = [0, 0], sizes = [2, 32], strides = [1, 1]} : vector<2x128xf32> to vector<2x32xf32>
    %178 = vector.extract_strided_slice %175 {offsets = [0, 32], sizes = [2, 32], strides = [1, 1]} : vector<2x128xf32> to vector<2x32xf32>
    %179 = vector.extract_strided_slice %175 {offsets = [0, 96], sizes = [2, 32], strides = [1, 1]} : vector<2x128xf32> to vector<2x32xf32>
    %180 = vector.extract_strided_slice %176 {offsets = [0, 64], sizes = [2, 32], strides = [1, 1]} : vector<2x128xf32> to vector<2x32xf32>
    %181 = arith.mulf %178, %167 : vector<2x32xf32>
    %182 = arith.mulf %177, %180 : vector<2x32xf32>
    %183 = arith.addf %181, %182 : vector<2x32xf32>
    %184 = math.tanh %183 : vector<2x32xf32>
    %185 = arith.mulf %179, %184 : vector<2x32xf32>
    %186 = vector.extract_strided_slice %163 {offsets = [2, 0], sizes = [2, 128], strides = [1, 1]} : vector<16x128xf32> to vector<2x128xf32>
    %cst_41 = arith.constant dense<0.000000e+00> : vector<2x128xf32>
    %187 = tpu.matmul %185, %165, %cst_41 {dimension_numbers = #tpu.dot_dimension_numbers<[1], [0], [0], [1], [0, 0, 1, 1], [], []>} : vector<2x32xf32>, vector<32x128xf32>, vector<2x128xf32> -> vector<2x128xf32>
    %188 = arith.addf %186, %187 : vector<2x128xf32>
    %189 = arith.negf %188 : vector<2x128xf32>
    %190 = math.exp %189 : vector<2x128xf32>
    %cst_42 = arith.constant 1.000000e+00 : f32
    %191 = vector.broadcast %cst_42 : f32 to vector<2x128xf32>
    %192 = arith.addf %191, %190 : vector<2x128xf32>
    %193 = arith.divf %191, %192 : vector<2x128xf32>
    %194 = math.tanh %188 : vector<2x128xf32>
    %195 = vector.extract_strided_slice %193 {offsets = [0, 0], sizes = [2, 32], strides = [1, 1]} : vector<2x128xf32> to vector<2x32xf32>
    %196 = vector.extract_strided_slice %193 {offsets = [0, 32], sizes = [2, 32], strides = [1, 1]} : vector<2x128xf32> to vector<2x32xf32>
    %197 = vector.extract_strided_slice %193 {offsets = [0, 96], sizes = [2, 32], strides = [1, 1]} : vector<2x128xf32> to vector<2x32xf32>
    %198 = vector.extract_strided_slice %194 {offsets = [0, 64], sizes = [2, 32], strides = [1, 1]} : vector<2x128xf32> to vector<2x32xf32>
    %199 = arith.mulf %196, %183 : vector<2x32xf32>
    %200 = arith.mulf %195, %198 : vector<2x32xf32>
    %201 = arith.addf %199, %200 : vector<2x32xf32>
    %202 = math.tanh %201 : vector<2x32xf32>
    %203 = arith.mulf %197, %202 : vector<2x32xf32>
    %204 = vector.extract_strided_slice %163 {offsets = [4, 0], sizes = [2, 128], strides = [1, 1]} : vector<16x128xf32> to vector<2x128xf32>
    %cst_43 = arith.constant dense<0.000000e+00> : vector<2x128xf32>
    %205 = tpu.matmul %203, %165, %cst_43 {dimension_numbers = #tpu.dot_dimension_numbers<[1], [0], [0], [1], [0, 0, 1, 1], [], []>} : vector<2x32xf32>, vector<32x128xf32>, vector<2x128xf32> -> vector<2x128xf32>
    %206 = arith.addf %204, %205 : vector<2x128xf32>
    %207 = arith.negf %206 : vector<2x128xf32>
    %208 = math.exp %207 : vector<2x128xf32>
    %cst_44 = arith.constant 1.000000e+00 : f32
    %209 = vector.broadcast %cst_44 : f32 to vector<2x128xf32>
    %210 = arith.addf %209, %208 : vector<2x128xf32>
    %211 = arith.divf %209, %210 : vector<2x128xf32>
    %212 = math.tanh %206 : vector<2x128xf32>
    %213 = vector.extract_strided_slice %211 {offsets = [0, 0], sizes = [2, 32], strides = [1, 1]} : vector<2x128xf32> to vector<2x32xf32>
    %214 = vector.extract_strided_slice %211 {offsets = [0, 32], sizes = [2, 32], strides = [1, 1]} : vector<2x128xf32> to vector<2x32xf32>
    %215 = vector.extract_strided_slice %211 {offsets = [0, 96], sizes = [2, 32], strides = [1, 1]} : vector<2x128xf32> to vector<2x32xf32>
    %216 = vector.extract_strided_slice %212 {offsets = [0, 64], sizes = [2, 32], strides = [1, 1]} : vector<2x128xf32> to vector<2x32xf32>
    %217 = arith.mulf %214, %201 : vector<2x32xf32>
    %218 = arith.mulf %213, %216 : vector<2x32xf32>
    %219 = arith.addf %217, %218 : vector<2x32xf32>
    %220 = math.tanh %219 : vector<2x32xf32>
    %221 = arith.mulf %215, %220 : vector<2x32xf32>
    %222 = vector.extract_strided_slice %163 {offsets = [6, 0], sizes = [2, 128], strides = [1, 1]} : vector<16x128xf32> to vector<2x128xf32>
    %cst_45 = arith.constant dense<0.000000e+00> : vector<2x128xf32>
    %223 = tpu.matmul %221, %165, %cst_45 {dimension_numbers = #tpu.dot_dimension_numbers<[1], [0], [0], [1], [0, 0, 1, 1], [], []>} : vector<2x32xf32>, vector<32x128xf32>, vector<2x128xf32> -> vector<2x128xf32>
    %224 = arith.addf %222, %223 : vector<2x128xf32>
    %225 = arith.negf %224 : vector<2x128xf32>
    %226 = math.exp %225 : vector<2x128xf32>
    %cst_46 = arith.constant 1.000000e+00 : f32
    %227 = vector.broadcast %cst_46 : f32 to vector<2x128xf32>
    %228 = arith.addf %227, %226 : vector<2x128xf32>
    %229 = arith.divf %227, %228 : vector<2x128xf32>
    %230 = math.tanh %224 : vector<2x128xf32>
    %231 = vector.extract_strided_slice %229 {offsets = [0, 0], sizes = [2, 32], strides = [1, 1]} : vector<2x128xf32> to vector<2x32xf32>
    %232 = vector.extract_strided_slice %229 {offsets = [0, 32], sizes = [2, 32], strides = [1, 1]} : vector<2x128xf32> to vector<2x32xf32>
    %233 = vector.extract_strided_slice %229 {offsets = [0, 96], sizes = [2, 32], strides = [1, 1]} : vector<2x128xf32> to vector<2x32xf32>
    %234 = vector.extract_strided_slice %230 {offsets = [0, 64], sizes = [2, 32], strides = [1, 1]} : vector<2x128xf32> to vector<2x32xf32>
    %235 = arith.mulf %232, %219 : vector<2x32xf32>
    %236 = arith.mulf %231, %234 : vector<2x32xf32>
    %237 = arith.addf %235, %236 : vector<2x32xf32>
    %238 = math.tanh %237 : vector<2x32xf32>
    %239 = arith.mulf %233, %238 : vector<2x32xf32>
    %240 = vector.extract_strided_slice %163 {offsets = [8, 0], sizes = [2, 128], strides = [1, 1]} : vector<16x128xf32> to vector<2x128xf32>
    %cst_47 = arith.constant dense<0.000000e+00> : vector<2x128xf32>
    %241 = tpu.matmul %239, %165, %cst_47 {dimension_numbers = #tpu.dot_dimension_numbers<[1], [0], [0], [1], [0, 0, 1, 1], [], []>} : vector<2x32xf32>, vector<32x128xf32>, vector<2x128xf32> -> vector<2x128xf32>
    %242 = arith.addf %240, %241 : vector<2x128xf32>
    %243 = arith.negf %242 : vector<2x128xf32>
    %244 = math.exp %243 : vector<2x128xf32>
    %cst_48 = arith.constant 1.000000e+00 : f32
    %245 = vector.broadcast %cst_48 : f32 to vector<2x128xf32>
    %246 = arith.addf %245, %244 : vector<2x128xf32>
    %247 = arith.divf %245, %246 : vector<2x128xf32>
    %248 = math.tanh %242 : vector<2x128xf32>
    %249 = vector.extract_strided_slice %247 {offsets = [0, 0], sizes = [2, 32], strides = [1, 1]} : vector<2x128xf32> to vector<2x32xf32>
    %250 = vector.extract_strided_slice %247 {offsets = [0, 32], sizes = [2, 32], strides = [1, 1]} : vector<2x128xf32> to vector<2x32xf32>
    %251 = vector.extract_strided_slice %247 {offsets = [0, 96], sizes = [2, 32], strides = [1, 1]} : vector<2x128xf32> to vector<2x32xf32>
    %252 = vector.extract_strided_slice %248 {offsets = [0, 64], sizes = [2, 32], strides = [1, 1]} : vector<2x128xf32> to vector<2x32xf32>
    %253 = arith.mulf %250, %237 : vector<2x32xf32>
    %254 = arith.mulf %249, %252 : vector<2x32xf32>
    %255 = arith.addf %253, %254 : vector<2x32xf32>
    %256 = math.tanh %255 : vector<2x32xf32>
    %257 = arith.mulf %251, %256 : vector<2x32xf32>
    %258 = vector.extract_strided_slice %163 {offsets = [10, 0], sizes = [2, 128], strides = [1, 1]} : vector<16x128xf32> to vector<2x128xf32>
    %cst_49 = arith.constant dense<0.000000e+00> : vector<2x128xf32>
    %259 = tpu.matmul %257, %165, %cst_49 {dimension_numbers = #tpu.dot_dimension_numbers<[1], [0], [0], [1], [0, 0, 1, 1], [], []>} : vector<2x32xf32>, vector<32x128xf32>, vector<2x128xf32> -> vector<2x128xf32>
    %260 = arith.addf %258, %259 : vector<2x128xf32>
    %261 = arith.negf %260 : vector<2x128xf32>
    %262 = math.exp %261 : vector<2x128xf32>
    %cst_50 = arith.constant 1.000000e+00 : f32
    %263 = vector.broadcast %cst_50 : f32 to vector<2x128xf32>
    %264 = arith.addf %263, %262 : vector<2x128xf32>
    %265 = arith.divf %263, %264 : vector<2x128xf32>
    %266 = math.tanh %260 : vector<2x128xf32>
    %267 = vector.extract_strided_slice %265 {offsets = [0, 0], sizes = [2, 32], strides = [1, 1]} : vector<2x128xf32> to vector<2x32xf32>
    %268 = vector.extract_strided_slice %265 {offsets = [0, 32], sizes = [2, 32], strides = [1, 1]} : vector<2x128xf32> to vector<2x32xf32>
    %269 = vector.extract_strided_slice %265 {offsets = [0, 96], sizes = [2, 32], strides = [1, 1]} : vector<2x128xf32> to vector<2x32xf32>
    %270 = vector.extract_strided_slice %266 {offsets = [0, 64], sizes = [2, 32], strides = [1, 1]} : vector<2x128xf32> to vector<2x32xf32>
    %271 = arith.mulf %268, %255 : vector<2x32xf32>
    %272 = arith.mulf %267, %270 : vector<2x32xf32>
    %273 = arith.addf %271, %272 : vector<2x32xf32>
    %274 = math.tanh %273 : vector<2x32xf32>
    %275 = arith.mulf %269, %274 : vector<2x32xf32>
    %276 = vector.extract_strided_slice %163 {offsets = [12, 0], sizes = [2, 128], strides = [1, 1]} : vector<16x128xf32> to vector<2x128xf32>
    %cst_51 = arith.constant dense<0.000000e+00> : vector<2x128xf32>
    %277 = tpu.matmul %275, %165, %cst_51 {dimension_numbers = #tpu.dot_dimension_numbers<[1], [0], [0], [1], [0, 0, 1, 1], [], []>} : vector<2x32xf32>, vector<32x128xf32>, vector<2x128xf32> -> vector<2x128xf32>
    %278 = arith.addf %276, %277 : vector<2x128xf32>
    %279 = arith.negf %278 : vector<2x128xf32>
    %280 = math.exp %279 : vector<2x128xf32>
    %cst_52 = arith.constant 1.000000e+00 : f32
    %281 = vector.broadcast %cst_52 : f32 to vector<2x128xf32>
    %282 = arith.addf %281, %280 : vector<2x128xf32>
    %283 = arith.divf %281, %282 : vector<2x128xf32>
    %284 = math.tanh %278 : vector<2x128xf32>
    %285 = vector.extract_strided_slice %283 {offsets = [0, 0], sizes = [2, 32], strides = [1, 1]} : vector<2x128xf32> to vector<2x32xf32>
    %286 = vector.extract_strided_slice %283 {offsets = [0, 32], sizes = [2, 32], strides = [1, 1]} : vector<2x128xf32> to vector<2x32xf32>
    %287 = vector.extract_strided_slice %283 {offsets = [0, 96], sizes = [2, 32], strides = [1, 1]} : vector<2x128xf32> to vector<2x32xf32>
    %288 = vector.extract_strided_slice %284 {offsets = [0, 64], sizes = [2, 32], strides = [1, 1]} : vector<2x128xf32> to vector<2x32xf32>
    %289 = arith.mulf %286, %273 : vector<2x32xf32>
    %290 = arith.mulf %285, %288 : vector<2x32xf32>
    %291 = arith.addf %289, %290 : vector<2x32xf32>
    %292 = math.tanh %291 : vector<2x32xf32>
    %293 = arith.mulf %287, %292 : vector<2x32xf32>
    %294 = vector.extract_strided_slice %163 {offsets = [14, 0], sizes = [2, 128], strides = [1, 1]} : vector<16x128xf32> to vector<2x128xf32>
    %cst_53 = arith.constant dense<0.000000e+00> : vector<2x128xf32>
    %295 = tpu.matmul %293, %165, %cst_53 {dimension_numbers = #tpu.dot_dimension_numbers<[1], [0], [0], [1], [0, 0, 1, 1], [], []>} : vector<2x32xf32>, vector<32x128xf32>, vector<2x128xf32> -> vector<2x128xf32>
    %296 = arith.addf %294, %295 : vector<2x128xf32>
    %297 = arith.negf %296 : vector<2x128xf32>
    %298 = math.exp %297 : vector<2x128xf32>
    %cst_54 = arith.constant 1.000000e+00 : f32
    %299 = vector.broadcast %cst_54 : f32 to vector<2x128xf32>
    %300 = arith.addf %299, %298 : vector<2x128xf32>
    %301 = arith.divf %299, %300 : vector<2x128xf32>
    %302 = math.tanh %296 : vector<2x128xf32>
    %303 = vector.extract_strided_slice %301 {offsets = [0, 0], sizes = [2, 32], strides = [1, 1]} : vector<2x128xf32> to vector<2x32xf32>
    %304 = vector.extract_strided_slice %301 {offsets = [0, 32], sizes = [2, 32], strides = [1, 1]} : vector<2x128xf32> to vector<2x32xf32>
    %305 = vector.extract_strided_slice %301 {offsets = [0, 96], sizes = [2, 32], strides = [1, 1]} : vector<2x128xf32> to vector<2x32xf32>
    %306 = vector.extract_strided_slice %302 {offsets = [0, 64], sizes = [2, 32], strides = [1, 1]} : vector<2x128xf32> to vector<2x32xf32>
    %307 = arith.mulf %304, %291 : vector<2x32xf32>
    %308 = arith.mulf %303, %306 : vector<2x32xf32>
    %309 = arith.addf %307, %308 : vector<2x32xf32>
    %310 = math.tanh %309 : vector<2x32xf32>
    %311 = arith.mulf %305, %310 : vector<2x32xf32>
    %312 = tpu.concatenate %185, %203, %221, %239, %257, %275, %293, %311 in 0 : vector<2x32xf32>, vector<2x32xf32>, vector<2x32xf32>, vector<2x32xf32>, vector<2x32xf32>, vector<2x32xf32>, vector<2x32xf32>, vector<2x32xf32> -> vector<16x32xf32>
    %c2 = arith.constant 2 : index
    %c0_55 = arith.constant 0 : index
    %c0_56 = arith.constant 0 : index
    %313 = vector.load %arg1[%c2, %c0_55, %c0_56] : memref<4x32x128xf32, #tpu.memory_space<vmem>>, vector<1x32x128xf32>
    %314 = vector.shape_cast %313 : vector<1x32x128xf32> to vector<32x128xf32>
    %cst_57 = arith.constant dense<0.000000e+00> : vector<16x128xf32>
    %315 = tpu.matmul %312, %314, %cst_57 {dimension_numbers = #tpu.dot_dimension_numbers<[1], [0], [0], [1], [0, 0, 1, 1], [], []>} : vector<16x32xf32>, vector<32x128xf32>, vector<16x128xf32> -> vector<16x128xf32>
    %c2_58 = arith.constant 2 : index
    %c0_59 = arith.constant 0 : index
    %c0_60 = arith.constant 0 : index
    %316 = vector.load %arg3[%c2_58, %c0_59, %c0_60] : memref<4x1x128xf32, #tpu.memory_space<vmem>>, vector<1x1x128xf32>
    %317 = vector.shape_cast %316 : vector<1x1x128xf32> to vector<1x128xf32>
    %318 = vector.broadcast %317 : vector<1x128xf32> to vector<16x128xf32>
    %319 = arith.addf %315, %318 : vector<16x128xf32>
    %c2_61 = arith.constant 2 : index
    %c0_62 = arith.constant 0 : index
    %c0_63 = arith.constant 0 : index
    %320 = vector.load %arg2[%c2_61, %c0_62, %c0_63] : memref<4x32x128xf32, #tpu.memory_space<vmem>>, vector<1x32x128xf32>
    %321 = vector.shape_cast %320 : vector<1x32x128xf32> to vector<32x128xf32>
    %cst_64 = arith.constant 0.000000e+00 : f32
    %322 = vector.broadcast %cst_64 : f32 to vector<2x32xf32>
    %cst_65 = arith.constant 0.000000e+00 : f32
    %323 = vector.broadcast %cst_65 : f32 to vector<2x32xf32>
    %324 = vector.extract_strided_slice %319 {offsets = [0, 0], sizes = [2, 128], strides = [1, 1]} : vector<16x128xf32> to vector<2x128xf32>
    %cst_66 = arith.constant dense<0.000000e+00> : vector<2x128xf32>
    %325 = tpu.matmul %322, %321, %cst_66 {dimension_numbers = #tpu.dot_dimension_numbers<[1], [0], [0], [1], [0, 0, 1, 1], [], []>} : vector<2x32xf32>, vector<32x128xf32>, vector<2x128xf32> -> vector<2x128xf32>
    %326 = arith.addf %324, %325 : vector<2x128xf32>
    %327 = arith.negf %326 : vector<2x128xf32>
    %328 = math.exp %327 : vector<2x128xf32>
    %cst_67 = arith.constant 1.000000e+00 : f32
    %329 = vector.broadcast %cst_67 : f32 to vector<2x128xf32>
    %330 = arith.addf %329, %328 : vector<2x128xf32>
    %331 = arith.divf %329, %330 : vector<2x128xf32>
    %332 = math.tanh %326 : vector<2x128xf32>
    %333 = vector.extract_strided_slice %331 {offsets = [0, 0], sizes = [2, 32], strides = [1, 1]} : vector<2x128xf32> to vector<2x32xf32>
    %334 = vector.extract_strided_slice %331 {offsets = [0, 32], sizes = [2, 32], strides = [1, 1]} : vector<2x128xf32> to vector<2x32xf32>
    %335 = vector.extract_strided_slice %331 {offsets = [0, 96], sizes = [2, 32], strides = [1, 1]} : vector<2x128xf32> to vector<2x32xf32>
    %336 = vector.extract_strided_slice %332 {offsets = [0, 64], sizes = [2, 32], strides = [1, 1]} : vector<2x128xf32> to vector<2x32xf32>
    %337 = arith.mulf %334, %323 : vector<2x32xf32>
    %338 = arith.mulf %333, %336 : vector<2x32xf32>
    %339 = arith.addf %337, %338 : vector<2x32xf32>
    %340 = math.tanh %339 : vector<2x32xf32>
    %341 = arith.mulf %335, %340 : vector<2x32xf32>
    %342 = vector.extract_strided_slice %319 {offsets = [2, 0], sizes = [2, 128], strides = [1, 1]} : vector<16x128xf32> to vector<2x128xf32>
    %cst_68 = arith.constant dense<0.000000e+00> : vector<2x128xf32>
    %343 = tpu.matmul %341, %321, %cst_68 {dimension_numbers = #tpu.dot_dimension_numbers<[1], [0], [0], [1], [0, 0, 1, 1], [], []>} : vector<2x32xf32>, vector<32x128xf32>, vector<2x128xf32> -> vector<2x128xf32>
    %344 = arith.addf %342, %343 : vector<2x128xf32>
    %345 = arith.negf %344 : vector<2x128xf32>
    %346 = math.exp %345 : vector<2x128xf32>
    %cst_69 = arith.constant 1.000000e+00 : f32
    %347 = vector.broadcast %cst_69 : f32 to vector<2x128xf32>
    %348 = arith.addf %347, %346 : vector<2x128xf32>
    %349 = arith.divf %347, %348 : vector<2x128xf32>
    %350 = math.tanh %344 : vector<2x128xf32>
    %351 = vector.extract_strided_slice %349 {offsets = [0, 0], sizes = [2, 32], strides = [1, 1]} : vector<2x128xf32> to vector<2x32xf32>
    %352 = vector.extract_strided_slice %349 {offsets = [0, 32], sizes = [2, 32], strides = [1, 1]} : vector<2x128xf32> to vector<2x32xf32>
    %353 = vector.extract_strided_slice %349 {offsets = [0, 96], sizes = [2, 32], strides = [1, 1]} : vector<2x128xf32> to vector<2x32xf32>
    %354 = vector.extract_strided_slice %350 {offsets = [0, 64], sizes = [2, 32], strides = [1, 1]} : vector<2x128xf32> to vector<2x32xf32>
    %355 = arith.mulf %352, %339 : vector<2x32xf32>
    %356 = arith.mulf %351, %354 : vector<2x32xf32>
    %357 = arith.addf %355, %356 : vector<2x32xf32>
    %358 = math.tanh %357 : vector<2x32xf32>
    %359 = arith.mulf %353, %358 : vector<2x32xf32>
    %360 = vector.extract_strided_slice %319 {offsets = [4, 0], sizes = [2, 128], strides = [1, 1]} : vector<16x128xf32> to vector<2x128xf32>
    %cst_70 = arith.constant dense<0.000000e+00> : vector<2x128xf32>
    %361 = tpu.matmul %359, %321, %cst_70 {dimension_numbers = #tpu.dot_dimension_numbers<[1], [0], [0], [1], [0, 0, 1, 1], [], []>} : vector<2x32xf32>, vector<32x128xf32>, vector<2x128xf32> -> vector<2x128xf32>
    %362 = arith.addf %360, %361 : vector<2x128xf32>
    %363 = arith.negf %362 : vector<2x128xf32>
    %364 = math.exp %363 : vector<2x128xf32>
    %cst_71 = arith.constant 1.000000e+00 : f32
    %365 = vector.broadcast %cst_71 : f32 to vector<2x128xf32>
    %366 = arith.addf %365, %364 : vector<2x128xf32>
    %367 = arith.divf %365, %366 : vector<2x128xf32>
    %368 = math.tanh %362 : vector<2x128xf32>
    %369 = vector.extract_strided_slice %367 {offsets = [0, 0], sizes = [2, 32], strides = [1, 1]} : vector<2x128xf32> to vector<2x32xf32>
    %370 = vector.extract_strided_slice %367 {offsets = [0, 32], sizes = [2, 32], strides = [1, 1]} : vector<2x128xf32> to vector<2x32xf32>
    %371 = vector.extract_strided_slice %367 {offsets = [0, 96], sizes = [2, 32], strides = [1, 1]} : vector<2x128xf32> to vector<2x32xf32>
    %372 = vector.extract_strided_slice %368 {offsets = [0, 64], sizes = [2, 32], strides = [1, 1]} : vector<2x128xf32> to vector<2x32xf32>
    %373 = arith.mulf %370, %357 : vector<2x32xf32>
    %374 = arith.mulf %369, %372 : vector<2x32xf32>
    %375 = arith.addf %373, %374 : vector<2x32xf32>
    %376 = math.tanh %375 : vector<2x32xf32>
    %377 = arith.mulf %371, %376 : vector<2x32xf32>
    %378 = vector.extract_strided_slice %319 {offsets = [6, 0], sizes = [2, 128], strides = [1, 1]} : vector<16x128xf32> to vector<2x128xf32>
    %cst_72 = arith.constant dense<0.000000e+00> : vector<2x128xf32>
    %379 = tpu.matmul %377, %321, %cst_72 {dimension_numbers = #tpu.dot_dimension_numbers<[1], [0], [0], [1], [0, 0, 1, 1], [], []>} : vector<2x32xf32>, vector<32x128xf32>, vector<2x128xf32> -> vector<2x128xf32>
    %380 = arith.addf %378, %379 : vector<2x128xf32>
    %381 = arith.negf %380 : vector<2x128xf32>
    %382 = math.exp %381 : vector<2x128xf32>
    %cst_73 = arith.constant 1.000000e+00 : f32
    %383 = vector.broadcast %cst_73 : f32 to vector<2x128xf32>
    %384 = arith.addf %383, %382 : vector<2x128xf32>
    %385 = arith.divf %383, %384 : vector<2x128xf32>
    %386 = math.tanh %380 : vector<2x128xf32>
    %387 = vector.extract_strided_slice %385 {offsets = [0, 0], sizes = [2, 32], strides = [1, 1]} : vector<2x128xf32> to vector<2x32xf32>
    %388 = vector.extract_strided_slice %385 {offsets = [0, 32], sizes = [2, 32], strides = [1, 1]} : vector<2x128xf32> to vector<2x32xf32>
    %389 = vector.extract_strided_slice %385 {offsets = [0, 96], sizes = [2, 32], strides = [1, 1]} : vector<2x128xf32> to vector<2x32xf32>
    %390 = vector.extract_strided_slice %386 {offsets = [0, 64], sizes = [2, 32], strides = [1, 1]} : vector<2x128xf32> to vector<2x32xf32>
    %391 = arith.mulf %388, %375 : vector<2x32xf32>
    %392 = arith.mulf %387, %390 : vector<2x32xf32>
    %393 = arith.addf %391, %392 : vector<2x32xf32>
    %394 = math.tanh %393 : vector<2x32xf32>
    %395 = arith.mulf %389, %394 : vector<2x32xf32>
    %396 = vector.extract_strided_slice %319 {offsets = [8, 0], sizes = [2, 128], strides = [1, 1]} : vector<16x128xf32> to vector<2x128xf32>
    %cst_74 = arith.constant dense<0.000000e+00> : vector<2x128xf32>
    %397 = tpu.matmul %395, %321, %cst_74 {dimension_numbers = #tpu.dot_dimension_numbers<[1], [0], [0], [1], [0, 0, 1, 1], [], []>} : vector<2x32xf32>, vector<32x128xf32>, vector<2x128xf32> -> vector<2x128xf32>
    %398 = arith.addf %396, %397 : vector<2x128xf32>
    %399 = arith.negf %398 : vector<2x128xf32>
    %400 = math.exp %399 : vector<2x128xf32>
    %cst_75 = arith.constant 1.000000e+00 : f32
    %401 = vector.broadcast %cst_75 : f32 to vector<2x128xf32>
    %402 = arith.addf %401, %400 : vector<2x128xf32>
    %403 = arith.divf %401, %402 : vector<2x128xf32>
    %404 = math.tanh %398 : vector<2x128xf32>
    %405 = vector.extract_strided_slice %403 {offsets = [0, 0], sizes = [2, 32], strides = [1, 1]} : vector<2x128xf32> to vector<2x32xf32>
    %406 = vector.extract_strided_slice %403 {offsets = [0, 32], sizes = [2, 32], strides = [1, 1]} : vector<2x128xf32> to vector<2x32xf32>
    %407 = vector.extract_strided_slice %403 {offsets = [0, 96], sizes = [2, 32], strides = [1, 1]} : vector<2x128xf32> to vector<2x32xf32>
    %408 = vector.extract_strided_slice %404 {offsets = [0, 64], sizes = [2, 32], strides = [1, 1]} : vector<2x128xf32> to vector<2x32xf32>
    %409 = arith.mulf %406, %393 : vector<2x32xf32>
    %410 = arith.mulf %405, %408 : vector<2x32xf32>
    %411 = arith.addf %409, %410 : vector<2x32xf32>
    %412 = math.tanh %411 : vector<2x32xf32>
    %413 = arith.mulf %407, %412 : vector<2x32xf32>
    %414 = vector.extract_strided_slice %319 {offsets = [10, 0], sizes = [2, 128], strides = [1, 1]} : vector<16x128xf32> to vector<2x128xf32>
    %cst_76 = arith.constant dense<0.000000e+00> : vector<2x128xf32>
    %415 = tpu.matmul %413, %321, %cst_76 {dimension_numbers = #tpu.dot_dimension_numbers<[1], [0], [0], [1], [0, 0, 1, 1], [], []>} : vector<2x32xf32>, vector<32x128xf32>, vector<2x128xf32> -> vector<2x128xf32>
    %416 = arith.addf %414, %415 : vector<2x128xf32>
    %417 = arith.negf %416 : vector<2x128xf32>
    %418 = math.exp %417 : vector<2x128xf32>
    %cst_77 = arith.constant 1.000000e+00 : f32
    %419 = vector.broadcast %cst_77 : f32 to vector<2x128xf32>
    %420 = arith.addf %419, %418 : vector<2x128xf32>
    %421 = arith.divf %419, %420 : vector<2x128xf32>
    %422 = math.tanh %416 : vector<2x128xf32>
    %423 = vector.extract_strided_slice %421 {offsets = [0, 0], sizes = [2, 32], strides = [1, 1]} : vector<2x128xf32> to vector<2x32xf32>
    %424 = vector.extract_strided_slice %421 {offsets = [0, 32], sizes = [2, 32], strides = [1, 1]} : vector<2x128xf32> to vector<2x32xf32>
    %425 = vector.extract_strided_slice %421 {offsets = [0, 96], sizes = [2, 32], strides = [1, 1]} : vector<2x128xf32> to vector<2x32xf32>
    %426 = vector.extract_strided_slice %422 {offsets = [0, 64], sizes = [2, 32], strides = [1, 1]} : vector<2x128xf32> to vector<2x32xf32>
    %427 = arith.mulf %424, %411 : vector<2x32xf32>
    %428 = arith.mulf %423, %426 : vector<2x32xf32>
    %429 = arith.addf %427, %428 : vector<2x32xf32>
    %430 = math.tanh %429 : vector<2x32xf32>
    %431 = arith.mulf %425, %430 : vector<2x32xf32>
    %432 = vector.extract_strided_slice %319 {offsets = [12, 0], sizes = [2, 128], strides = [1, 1]} : vector<16x128xf32> to vector<2x128xf32>
    %cst_78 = arith.constant dense<0.000000e+00> : vector<2x128xf32>
    %433 = tpu.matmul %431, %321, %cst_78 {dimension_numbers = #tpu.dot_dimension_numbers<[1], [0], [0], [1], [0, 0, 1, 1], [], []>} : vector<2x32xf32>, vector<32x128xf32>, vector<2x128xf32> -> vector<2x128xf32>
    %434 = arith.addf %432, %433 : vector<2x128xf32>
    %435 = arith.negf %434 : vector<2x128xf32>
    %436 = math.exp %435 : vector<2x128xf32>
    %cst_79 = arith.constant 1.000000e+00 : f32
    %437 = vector.broadcast %cst_79 : f32 to vector<2x128xf32>
    %438 = arith.addf %437, %436 : vector<2x128xf32>
    %439 = arith.divf %437, %438 : vector<2x128xf32>
    %440 = math.tanh %434 : vector<2x128xf32>
    %441 = vector.extract_strided_slice %439 {offsets = [0, 0], sizes = [2, 32], strides = [1, 1]} : vector<2x128xf32> to vector<2x32xf32>
    %442 = vector.extract_strided_slice %439 {offsets = [0, 32], sizes = [2, 32], strides = [1, 1]} : vector<2x128xf32> to vector<2x32xf32>
    %443 = vector.extract_strided_slice %439 {offsets = [0, 96], sizes = [2, 32], strides = [1, 1]} : vector<2x128xf32> to vector<2x32xf32>
    %444 = vector.extract_strided_slice %440 {offsets = [0, 64], sizes = [2, 32], strides = [1, 1]} : vector<2x128xf32> to vector<2x32xf32>
    %445 = arith.mulf %442, %429 : vector<2x32xf32>
    %446 = arith.mulf %441, %444 : vector<2x32xf32>
    %447 = arith.addf %445, %446 : vector<2x32xf32>
    %448 = math.tanh %447 : vector<2x32xf32>
    %449 = arith.mulf %443, %448 : vector<2x32xf32>
    %450 = vector.extract_strided_slice %319 {offsets = [14, 0], sizes = [2, 128], strides = [1, 1]} : vector<16x128xf32> to vector<2x128xf32>
    %cst_80 = arith.constant dense<0.000000e+00> : vector<2x128xf32>
    %451 = tpu.matmul %449, %321, %cst_80 {dimension_numbers = #tpu.dot_dimension_numbers<[1], [0], [0], [1], [0, 0, 1, 1], [], []>} : vector<2x32xf32>, vector<32x128xf32>, vector<2x128xf32> -> vector<2x128xf32>
    %452 = arith.addf %450, %451 : vector<2x128xf32>
    %453 = arith.negf %452 : vector<2x128xf32>
    %454 = math.exp %453 : vector<2x128xf32>
    %cst_81 = arith.constant 1.000000e+00 : f32
    %455 = vector.broadcast %cst_81 : f32 to vector<2x128xf32>
    %456 = arith.addf %455, %454 : vector<2x128xf32>
    %457 = arith.divf %455, %456 : vector<2x128xf32>
    %458 = math.tanh %452 : vector<2x128xf32>
    %459 = vector.extract_strided_slice %457 {offsets = [0, 0], sizes = [2, 32], strides = [1, 1]} : vector<2x128xf32> to vector<2x32xf32>
    %460 = vector.extract_strided_slice %457 {offsets = [0, 32], sizes = [2, 32], strides = [1, 1]} : vector<2x128xf32> to vector<2x32xf32>
    %461 = vector.extract_strided_slice %457 {offsets = [0, 96], sizes = [2, 32], strides = [1, 1]} : vector<2x128xf32> to vector<2x32xf32>
    %462 = vector.extract_strided_slice %458 {offsets = [0, 64], sizes = [2, 32], strides = [1, 1]} : vector<2x128xf32> to vector<2x32xf32>
    %463 = arith.mulf %460, %447 : vector<2x32xf32>
    %464 = arith.mulf %459, %462 : vector<2x32xf32>
    %465 = arith.addf %463, %464 : vector<2x32xf32>
    %466 = math.tanh %465 : vector<2x32xf32>
    %467 = arith.mulf %461, %466 : vector<2x32xf32>
    %468 = tpu.concatenate %341, %359, %377, %395, %413, %431, %449, %467 in 0 : vector<2x32xf32>, vector<2x32xf32>, vector<2x32xf32>, vector<2x32xf32>, vector<2x32xf32>, vector<2x32xf32>, vector<2x32xf32>, vector<2x32xf32> -> vector<16x32xf32>
    %c3 = arith.constant 3 : index
    %c0_82 = arith.constant 0 : index
    %c0_83 = arith.constant 0 : index
    %469 = vector.load %arg1[%c3, %c0_82, %c0_83] : memref<4x32x128xf32, #tpu.memory_space<vmem>>, vector<1x32x128xf32>
    %470 = vector.shape_cast %469 : vector<1x32x128xf32> to vector<32x128xf32>
    %cst_84 = arith.constant dense<0.000000e+00> : vector<16x128xf32>
    %471 = tpu.matmul %468, %470, %cst_84 {dimension_numbers = #tpu.dot_dimension_numbers<[1], [0], [0], [1], [0, 0, 1, 1], [], []>} : vector<16x32xf32>, vector<32x128xf32>, vector<16x128xf32> -> vector<16x128xf32>
    %c3_85 = arith.constant 3 : index
    %c0_86 = arith.constant 0 : index
    %c0_87 = arith.constant 0 : index
    %472 = vector.load %arg3[%c3_85, %c0_86, %c0_87] : memref<4x1x128xf32, #tpu.memory_space<vmem>>, vector<1x1x128xf32>
    %473 = vector.shape_cast %472 : vector<1x1x128xf32> to vector<1x128xf32>
    %474 = vector.broadcast %473 : vector<1x128xf32> to vector<16x128xf32>
    %475 = arith.addf %471, %474 : vector<16x128xf32>
    %c3_88 = arith.constant 3 : index
    %c0_89 = arith.constant 0 : index
    %c0_90 = arith.constant 0 : index
    %476 = vector.load %arg2[%c3_88, %c0_89, %c0_90] : memref<4x32x128xf32, #tpu.memory_space<vmem>>, vector<1x32x128xf32>
    %477 = vector.shape_cast %476 : vector<1x32x128xf32> to vector<32x128xf32>
    %cst_91 = arith.constant 0.000000e+00 : f32
    %478 = vector.broadcast %cst_91 : f32 to vector<2x32xf32>
    %cst_92 = arith.constant 0.000000e+00 : f32
    %479 = vector.broadcast %cst_92 : f32 to vector<2x32xf32>
    %480 = vector.extract_strided_slice %475 {offsets = [0, 0], sizes = [2, 128], strides = [1, 1]} : vector<16x128xf32> to vector<2x128xf32>
    %cst_93 = arith.constant dense<0.000000e+00> : vector<2x128xf32>
    %481 = tpu.matmul %478, %477, %cst_93 {dimension_numbers = #tpu.dot_dimension_numbers<[1], [0], [0], [1], [0, 0, 1, 1], [], []>} : vector<2x32xf32>, vector<32x128xf32>, vector<2x128xf32> -> vector<2x128xf32>
    %482 = arith.addf %480, %481 : vector<2x128xf32>
    %483 = arith.negf %482 : vector<2x128xf32>
    %484 = math.exp %483 : vector<2x128xf32>
    %cst_94 = arith.constant 1.000000e+00 : f32
    %485 = vector.broadcast %cst_94 : f32 to vector<2x128xf32>
    %486 = arith.addf %485, %484 : vector<2x128xf32>
    %487 = arith.divf %485, %486 : vector<2x128xf32>
    %488 = math.tanh %482 : vector<2x128xf32>
    %489 = vector.extract_strided_slice %487 {offsets = [0, 0], sizes = [2, 32], strides = [1, 1]} : vector<2x128xf32> to vector<2x32xf32>
    %490 = vector.extract_strided_slice %487 {offsets = [0, 32], sizes = [2, 32], strides = [1, 1]} : vector<2x128xf32> to vector<2x32xf32>
    %491 = vector.extract_strided_slice %487 {offsets = [0, 96], sizes = [2, 32], strides = [1, 1]} : vector<2x128xf32> to vector<2x32xf32>
    %492 = vector.extract_strided_slice %488 {offsets = [0, 64], sizes = [2, 32], strides = [1, 1]} : vector<2x128xf32> to vector<2x32xf32>
    %493 = arith.mulf %490, %479 : vector<2x32xf32>
    %494 = arith.mulf %489, %492 : vector<2x32xf32>
    %495 = arith.addf %493, %494 : vector<2x32xf32>
    %496 = math.tanh %495 : vector<2x32xf32>
    %497 = arith.mulf %491, %496 : vector<2x32xf32>
    %498 = vector.extract_strided_slice %475 {offsets = [2, 0], sizes = [2, 128], strides = [1, 1]} : vector<16x128xf32> to vector<2x128xf32>
    %cst_95 = arith.constant dense<0.000000e+00> : vector<2x128xf32>
    %499 = tpu.matmul %497, %477, %cst_95 {dimension_numbers = #tpu.dot_dimension_numbers<[1], [0], [0], [1], [0, 0, 1, 1], [], []>} : vector<2x32xf32>, vector<32x128xf32>, vector<2x128xf32> -> vector<2x128xf32>
    %500 = arith.addf %498, %499 : vector<2x128xf32>
    %501 = arith.negf %500 : vector<2x128xf32>
    %502 = math.exp %501 : vector<2x128xf32>
    %cst_96 = arith.constant 1.000000e+00 : f32
    %503 = vector.broadcast %cst_96 : f32 to vector<2x128xf32>
    %504 = arith.addf %503, %502 : vector<2x128xf32>
    %505 = arith.divf %503, %504 : vector<2x128xf32>
    %506 = math.tanh %500 : vector<2x128xf32>
    %507 = vector.extract_strided_slice %505 {offsets = [0, 0], sizes = [2, 32], strides = [1, 1]} : vector<2x128xf32> to vector<2x32xf32>
    %508 = vector.extract_strided_slice %505 {offsets = [0, 32], sizes = [2, 32], strides = [1, 1]} : vector<2x128xf32> to vector<2x32xf32>
    %509 = vector.extract_strided_slice %505 {offsets = [0, 96], sizes = [2, 32], strides = [1, 1]} : vector<2x128xf32> to vector<2x32xf32>
    %510 = vector.extract_strided_slice %506 {offsets = [0, 64], sizes = [2, 32], strides = [1, 1]} : vector<2x128xf32> to vector<2x32xf32>
    %511 = arith.mulf %508, %495 : vector<2x32xf32>
    %512 = arith.mulf %507, %510 : vector<2x32xf32>
    %513 = arith.addf %511, %512 : vector<2x32xf32>
    %514 = math.tanh %513 : vector<2x32xf32>
    %515 = arith.mulf %509, %514 : vector<2x32xf32>
    %516 = vector.extract_strided_slice %475 {offsets = [4, 0], sizes = [2, 128], strides = [1, 1]} : vector<16x128xf32> to vector<2x128xf32>
    %cst_97 = arith.constant dense<0.000000e+00> : vector<2x128xf32>
    %517 = tpu.matmul %515, %477, %cst_97 {dimension_numbers = #tpu.dot_dimension_numbers<[1], [0], [0], [1], [0, 0, 1, 1], [], []>} : vector<2x32xf32>, vector<32x128xf32>, vector<2x128xf32> -> vector<2x128xf32>
    %518 = arith.addf %516, %517 : vector<2x128xf32>
    %519 = arith.negf %518 : vector<2x128xf32>
    %520 = math.exp %519 : vector<2x128xf32>
    %cst_98 = arith.constant 1.000000e+00 : f32
    %521 = vector.broadcast %cst_98 : f32 to vector<2x128xf32>
    %522 = arith.addf %521, %520 : vector<2x128xf32>
    %523 = arith.divf %521, %522 : vector<2x128xf32>
    %524 = math.tanh %518 : vector<2x128xf32>
    %525 = vector.extract_strided_slice %523 {offsets = [0, 0], sizes = [2, 32], strides = [1, 1]} : vector<2x128xf32> to vector<2x32xf32>
    %526 = vector.extract_strided_slice %523 {offsets = [0, 32], sizes = [2, 32], strides = [1, 1]} : vector<2x128xf32> to vector<2x32xf32>
    %527 = vector.extract_strided_slice %523 {offsets = [0, 96], sizes = [2, 32], strides = [1, 1]} : vector<2x128xf32> to vector<2x32xf32>
    %528 = vector.extract_strided_slice %524 {offsets = [0, 64], sizes = [2, 32], strides = [1, 1]} : vector<2x128xf32> to vector<2x32xf32>
    %529 = arith.mulf %526, %513 : vector<2x32xf32>
    %530 = arith.mulf %525, %528 : vector<2x32xf32>
    %531 = arith.addf %529, %530 : vector<2x32xf32>
    %532 = math.tanh %531 : vector<2x32xf32>
    %533 = arith.mulf %527, %532 : vector<2x32xf32>
    %534 = vector.extract_strided_slice %475 {offsets = [6, 0], sizes = [2, 128], strides = [1, 1]} : vector<16x128xf32> to vector<2x128xf32>
    %cst_99 = arith.constant dense<0.000000e+00> : vector<2x128xf32>
    %535 = tpu.matmul %533, %477, %cst_99 {dimension_numbers = #tpu.dot_dimension_numbers<[1], [0], [0], [1], [0, 0, 1, 1], [], []>} : vector<2x32xf32>, vector<32x128xf32>, vector<2x128xf32> -> vector<2x128xf32>
    %536 = arith.addf %534, %535 : vector<2x128xf32>
    %537 = arith.negf %536 : vector<2x128xf32>
    %538 = math.exp %537 : vector<2x128xf32>
    %cst_100 = arith.constant 1.000000e+00 : f32
    %539 = vector.broadcast %cst_100 : f32 to vector<2x128xf32>
    %540 = arith.addf %539, %538 : vector<2x128xf32>
    %541 = arith.divf %539, %540 : vector<2x128xf32>
    %542 = math.tanh %536 : vector<2x128xf32>
    %543 = vector.extract_strided_slice %541 {offsets = [0, 0], sizes = [2, 32], strides = [1, 1]} : vector<2x128xf32> to vector<2x32xf32>
    %544 = vector.extract_strided_slice %541 {offsets = [0, 32], sizes = [2, 32], strides = [1, 1]} : vector<2x128xf32> to vector<2x32xf32>
    %545 = vector.extract_strided_slice %541 {offsets = [0, 96], sizes = [2, 32], strides = [1, 1]} : vector<2x128xf32> to vector<2x32xf32>
    %546 = vector.extract_strided_slice %542 {offsets = [0, 64], sizes = [2, 32], strides = [1, 1]} : vector<2x128xf32> to vector<2x32xf32>
    %547 = arith.mulf %544, %531 : vector<2x32xf32>
    %548 = arith.mulf %543, %546 : vector<2x32xf32>
    %549 = arith.addf %547, %548 : vector<2x32xf32>
    %550 = math.tanh %549 : vector<2x32xf32>
    %551 = arith.mulf %545, %550 : vector<2x32xf32>
    %552 = vector.extract_strided_slice %475 {offsets = [8, 0], sizes = [2, 128], strides = [1, 1]} : vector<16x128xf32> to vector<2x128xf32>
    %cst_101 = arith.constant dense<0.000000e+00> : vector<2x128xf32>
    %553 = tpu.matmul %551, %477, %cst_101 {dimension_numbers = #tpu.dot_dimension_numbers<[1], [0], [0], [1], [0, 0, 1, 1], [], []>} : vector<2x32xf32>, vector<32x128xf32>, vector<2x128xf32> -> vector<2x128xf32>
    %554 = arith.addf %552, %553 : vector<2x128xf32>
    %555 = arith.negf %554 : vector<2x128xf32>
    %556 = math.exp %555 : vector<2x128xf32>
    %cst_102 = arith.constant 1.000000e+00 : f32
    %557 = vector.broadcast %cst_102 : f32 to vector<2x128xf32>
    %558 = arith.addf %557, %556 : vector<2x128xf32>
    %559 = arith.divf %557, %558 : vector<2x128xf32>
    %560 = math.tanh %554 : vector<2x128xf32>
    %561 = vector.extract_strided_slice %559 {offsets = [0, 0], sizes = [2, 32], strides = [1, 1]} : vector<2x128xf32> to vector<2x32xf32>
    %562 = vector.extract_strided_slice %559 {offsets = [0, 32], sizes = [2, 32], strides = [1, 1]} : vector<2x128xf32> to vector<2x32xf32>
    %563 = vector.extract_strided_slice %559 {offsets = [0, 96], sizes = [2, 32], strides = [1, 1]} : vector<2x128xf32> to vector<2x32xf32>
    %564 = vector.extract_strided_slice %560 {offsets = [0, 64], sizes = [2, 32], strides = [1, 1]} : vector<2x128xf32> to vector<2x32xf32>
    %565 = arith.mulf %562, %549 : vector<2x32xf32>
    %566 = arith.mulf %561, %564 : vector<2x32xf32>
    %567 = arith.addf %565, %566 : vector<2x32xf32>
    %568 = math.tanh %567 : vector<2x32xf32>
    %569 = arith.mulf %563, %568 : vector<2x32xf32>
    %570 = vector.extract_strided_slice %475 {offsets = [10, 0], sizes = [2, 128], strides = [1, 1]} : vector<16x128xf32> to vector<2x128xf32>
    %cst_103 = arith.constant dense<0.000000e+00> : vector<2x128xf32>
    %571 = tpu.matmul %569, %477, %cst_103 {dimension_numbers = #tpu.dot_dimension_numbers<[1], [0], [0], [1], [0, 0, 1, 1], [], []>} : vector<2x32xf32>, vector<32x128xf32>, vector<2x128xf32> -> vector<2x128xf32>
    %572 = arith.addf %570, %571 : vector<2x128xf32>
    %573 = arith.negf %572 : vector<2x128xf32>
    %574 = math.exp %573 : vector<2x128xf32>
    %cst_104 = arith.constant 1.000000e+00 : f32
    %575 = vector.broadcast %cst_104 : f32 to vector<2x128xf32>
    %576 = arith.addf %575, %574 : vector<2x128xf32>
    %577 = arith.divf %575, %576 : vector<2x128xf32>
    %578 = math.tanh %572 : vector<2x128xf32>
    %579 = vector.extract_strided_slice %577 {offsets = [0, 0], sizes = [2, 32], strides = [1, 1]} : vector<2x128xf32> to vector<2x32xf32>
    %580 = vector.extract_strided_slice %577 {offsets = [0, 32], sizes = [2, 32], strides = [1, 1]} : vector<2x128xf32> to vector<2x32xf32>
    %581 = vector.extract_strided_slice %577 {offsets = [0, 96], sizes = [2, 32], strides = [1, 1]} : vector<2x128xf32> to vector<2x32xf32>
    %582 = vector.extract_strided_slice %578 {offsets = [0, 64], sizes = [2, 32], strides = [1, 1]} : vector<2x128xf32> to vector<2x32xf32>
    %583 = arith.mulf %580, %567 : vector<2x32xf32>
    %584 = arith.mulf %579, %582 : vector<2x32xf32>
    %585 = arith.addf %583, %584 : vector<2x32xf32>
    %586 = math.tanh %585 : vector<2x32xf32>
    %587 = arith.mulf %581, %586 : vector<2x32xf32>
    %588 = vector.extract_strided_slice %475 {offsets = [12, 0], sizes = [2, 128], strides = [1, 1]} : vector<16x128xf32> to vector<2x128xf32>
    %cst_105 = arith.constant dense<0.000000e+00> : vector<2x128xf32>
    %589 = tpu.matmul %587, %477, %cst_105 {dimension_numbers = #tpu.dot_dimension_numbers<[1], [0], [0], [1], [0, 0, 1, 1], [], []>} : vector<2x32xf32>, vector<32x128xf32>, vector<2x128xf32> -> vector<2x128xf32>
    %590 = arith.addf %588, %589 : vector<2x128xf32>
    %591 = arith.negf %590 : vector<2x128xf32>
    %592 = math.exp %591 : vector<2x128xf32>
    %cst_106 = arith.constant 1.000000e+00 : f32
    %593 = vector.broadcast %cst_106 : f32 to vector<2x128xf32>
    %594 = arith.addf %593, %592 : vector<2x128xf32>
    %595 = arith.divf %593, %594 : vector<2x128xf32>
    %596 = math.tanh %590 : vector<2x128xf32>
    %597 = vector.extract_strided_slice %595 {offsets = [0, 0], sizes = [2, 32], strides = [1, 1]} : vector<2x128xf32> to vector<2x32xf32>
    %598 = vector.extract_strided_slice %595 {offsets = [0, 32], sizes = [2, 32], strides = [1, 1]} : vector<2x128xf32> to vector<2x32xf32>
    %599 = vector.extract_strided_slice %595 {offsets = [0, 96], sizes = [2, 32], strides = [1, 1]} : vector<2x128xf32> to vector<2x32xf32>
    %600 = vector.extract_strided_slice %596 {offsets = [0, 64], sizes = [2, 32], strides = [1, 1]} : vector<2x128xf32> to vector<2x32xf32>
    %601 = arith.mulf %598, %585 : vector<2x32xf32>
    %602 = arith.mulf %597, %600 : vector<2x32xf32>
    %603 = arith.addf %601, %602 : vector<2x32xf32>
    %604 = math.tanh %603 : vector<2x32xf32>
    %605 = arith.mulf %599, %604 : vector<2x32xf32>
    %606 = vector.extract_strided_slice %475 {offsets = [14, 0], sizes = [2, 128], strides = [1, 1]} : vector<16x128xf32> to vector<2x128xf32>
    %cst_107 = arith.constant dense<0.000000e+00> : vector<2x128xf32>
    %607 = tpu.matmul %605, %477, %cst_107 {dimension_numbers = #tpu.dot_dimension_numbers<[1], [0], [0], [1], [0, 0, 1, 1], [], []>} : vector<2x32xf32>, vector<32x128xf32>, vector<2x128xf32> -> vector<2x128xf32>
    %608 = arith.addf %606, %607 : vector<2x128xf32>
    %609 = arith.negf %608 : vector<2x128xf32>
    %610 = math.exp %609 : vector<2x128xf32>
    %cst_108 = arith.constant 1.000000e+00 : f32
    %611 = vector.broadcast %cst_108 : f32 to vector<2x128xf32>
    %612 = arith.addf %611, %610 : vector<2x128xf32>
    %613 = arith.divf %611, %612 : vector<2x128xf32>
    %614 = math.tanh %608 : vector<2x128xf32>
    %615 = vector.extract_strided_slice %613 {offsets = [0, 0], sizes = [2, 32], strides = [1, 1]} : vector<2x128xf32> to vector<2x32xf32>
    %616 = vector.extract_strided_slice %613 {offsets = [0, 32], sizes = [2, 32], strides = [1, 1]} : vector<2x128xf32> to vector<2x32xf32>
    %617 = vector.extract_strided_slice %613 {offsets = [0, 96], sizes = [2, 32], strides = [1, 1]} : vector<2x128xf32> to vector<2x32xf32>
    %618 = vector.extract_strided_slice %614 {offsets = [0, 64], sizes = [2, 32], strides = [1, 1]} : vector<2x128xf32> to vector<2x32xf32>
    %619 = arith.mulf %616, %603 : vector<2x32xf32>
    %620 = arith.mulf %615, %618 : vector<2x32xf32>
    %621 = arith.addf %619, %620 : vector<2x32xf32>
    %622 = math.tanh %621 : vector<2x32xf32>
    %623 = arith.mulf %617, %622 : vector<2x32xf32>
    %624 = tpu.concatenate %497, %515, %533, %551, %569, %587, %605, %623 in 0 : vector<2x32xf32>, vector<2x32xf32>, vector<2x32xf32>, vector<2x32xf32>, vector<2x32xf32>, vector<2x32xf32>, vector<2x32xf32>, vector<2x32xf32> -> vector<16x32xf32>
    %c0_109 = arith.constant 0 : index
    %c0_110 = arith.constant 0 : index
    %625 = vector.load %arg4[%c0_109, %c0_110] : memref<32x128xf32, #tpu.memory_space<vmem>>, vector<32x128xf32>
    %cst_111 = arith.constant dense<0.000000e+00> : vector<16x128xf32>
    %626 = tpu.matmul %624, %625, %cst_111 {dimension_numbers = #tpu.dot_dimension_numbers<[1], [0], [0], [1], [0, 0, 1, 1], [], []>} : vector<16x32xf32>, vector<32x128xf32>, vector<16x128xf32> -> vector<16x128xf32>
    %c0_112 = arith.constant 0 : index
    %c0_113 = arith.constant 0 : index
    %627 = vector.load %arg5[%c0_112, %c0_113] : memref<1x128xf32, #tpu.memory_space<vmem>>, vector<1x128xf32>
    %628 = vector.broadcast %627 : vector<1x128xf32> to vector<16x128xf32>
    %629 = arith.addf %626, %628 : vector<16x128xf32>
    %c0_114 = arith.constant 0 : index
    %c0_115 = arith.constant 0 : index
    %630 = vector.load %arg6[%c0_114, %c0_115] : memref<16x128xf32, #tpu.memory_space<vmem>>, vector<16x128xf32>
    tpu.vector_store %arg6[%c0_114, %c0_115], %629 {strides = array<i32>} : memref<16x128xf32, #tpu.memory_space<vmem>>, vector<16x128xf32>,
    return
  }
}

</mosaic_0001>

<bundles_post_ra>
// kernel: model_lm_forward.1
= control target key start
LH: loop header
LB: loop body
LE: loop exit
PB: predicated region body
PF: predicated region fallthrough
CT: control target
= control target key end

     0   :  { %v5111_v2 = vmov 0.0|0.0   ;;  %vm36_vm0 = vcmask 261120   ;;  %vm5112_vm1 = vmmov 0   ;;  %v5113_v4 = vmov 0.0   ;;  %s5114_s18 = smov 64   ;;  %s5115_s19 = smov 32   ;;  %s5784_s1 = inlined_call_operand.vmem [shape: f32[4,32,128], index: 1, kind: input, shape index: {}]   ;;  %s5785_s2 = inlined_call_operand.vmem [shape: f32[4,32,128], index: 2, kind: input, shape index: {}]   ;;  %s5786_s0 = inlined_call_operand.vmem [shape: f32[16,32], index: 0, kind: input, shape index: {}]   ;;  %s5787_s3 = inlined_call_operand.vmem [shape: f32[4,1,128], index: 3, kind: input, shape index: {}]   ;;  %s5788_s4 = inlined_call_operand.vmem [shape: f32[32,128], index: 4, kind: input, shape index: {}]   ;;  %s5789_s5 = inlined_call_operand.vmem [shape: f32[1,128], index: 5, kind: input, shape index: {}]   ;;  %s5790_s6 = inlined_call_operand.vmem [shape: f32[16,128], index: 6, kind: output, shape index: {}]  }
   0x1   :  { %v25_v0 = vld [vmem:[%s5784_s1] sm:$0xff]  ;;  %v26_v1 = vld [vmem:[%s5784_s1 + $0x8] sm:$0xff]  ;;  %4626 = vmatprep.subr.bf16.mxu1 %v5111_v2  ;;  %4230 = vmatprep.mubr.msk.f32.mxu1 %vm5112_vm1, %v5113_v4  ;;  %v27_v7 = vld [vmem:[%s5784_s1 + $0x10] sm:$0xff]  ;;  %vm964_vm2 = vcmask 1041408   ;;  %vm966_vm3 = vcmask 1043456   ;;  %vm968_vm4 = vcmask 1045504  }
   0x2   :  { %v118_v3 = vld [vmem:[%s5785_s2] sm:$0xff]  ;;  %v4618_v5 = vpack.c.bf16 %v26_v1, %v25_v0  ;;  %v119_v6 = vld [vmem:[%s5785_s2 + $0x8] sm:$0xff]  ;;  %v28_v8 = vld [vmem:[%s5784_s1 + $0x18] sm:$0xff] }
   0x3   :  { %v5172_v9 = vpack.c.bf16 %v119_v6, %v118_v3  ;;  %v4622_v10 = vpack.c.bf16 %v28_v8, %v27_v7  ;;  %v23_v11 = vld [vmem:[%s5786_s0] sm:$0xff]  ;;  %v120_v12 = vld [vmem:[%s5785_s2 + $0x10] sm:$0xff]  ;;  %v121_v13 = vld [vmem:[%s5785_s2 + $0x18] sm:$0xff] }
   0x4   :  { %4619 = vmatprep.subr.bf16.mxu0 %v4618_v5  ;;  %4219 = vmatprep.mubr.msk.f32.mxu0 %vm36_vm0, %v23_v11  ;;  %v5185_v14 = vpack.c.bf16 %v121_v13, %v120_v12  ;;  %v24_v15 = vld [vmem:[%s5786_s0 + $0x8] sm:$0xff]  ;;  %v3919_v16 = vld [vmem:[%s5787_s3] ss:$0 sm:$0xff] }
   0x5   :  { %4621 = vmatpush3.bf16.msra.mxu0 %v4618_v5  ;;  %4628 = vmatpush3.bf16.msra.mxu1 %v5172_v9 }
   0x6   :  { %4623 = vmatprep.subr.bf16.mxu0 %v4622_v10  ;;  %4629 = vmatprep.subr.bf16.mxu1 %v5111_v2 }
   0x9   :  { %4625 = vmatpush3.bf16.msra.mxu0 %v4622_v10  ;;  %4631 = vmatpush3.bf16.msra.mxu1 %v5185_v14 }
   0xa   :  { %4632 = vmatprep.subr.bf16.mxu0 %v5111_v2  ;;  %4638 = vmatprep.subr.bf16.mxu1 %v5111_v2 }
   0xc   :  { %4220 = vmatmul.mubr.msk.f32.vlgmr.msra.gmra.mrb[0].mxu0 %vm36_vm0, %v24_v15  ;;  %4231 = vmatmul.mubr.f32.vlgmr.msra.gmra.mrb[0].mxu1 %v5113_v4 }
   0xd   :  { %4634 = vmatpush3.bf16.msra.mxu0 %v5172_v9  ;;  %4241 = vmatprep.mubr.msk.f32.mxu0 %vm5112_vm1, %v5113_v4 }
   0xe   :  { %4635 = vmatprep.subr.bf16.mxu0 %v5111_v2  ;;  %4640 = vmatpush3.bf16.msra.mxu1 %v5172_v9 }
   0xf   :  { %4641 = vmatprep.subr.bf16.mxu1 %v5111_v2  ;;  %4252 = vmatprep.mubr.msk.f32.mxu1 %vm5112_vm1, %v5113_v4 }
  0x11   :  { %4637 = vmatpush3.bf16.msra.mxu0 %v5185_v14 }
  0x12   :  { %4643 = vmatpush3.bf16.msra.mxu1 %v5185_v14  ;;  %4644 = vmatprep.subr.bf16.mxu0 %v5111_v2 }
  0x13   :  { %4650 = vmatprep.subr.bf16.mxu1 %v5111_v2 }
  0xdf   :  { %v4221_v17 = vpop.f32.mrb[0].mxu0  ;;  %v191_v18 = vpop.f32.mrb[0].mxu1 }
  0xe0   :  { %v5211_v19 = vadd.f32 %v4221_v17, %v3919_v16  ;;  %v109_v20 = vpop.f32.mrb[1].mxu0  ;;  %v4232_v21 = vpop.f32.mrb[1].mxu1 }
  0xe1   :  { %v5213_v22 = vadd.f32 %v3919_v16, %v109_v20 }
  0xe3   :  { %v195_v23 = vadd.f32 %v191_v18, %v5213_v22 }
  0xe5   :  { %4855 = vtanh.f32 %v195_v23  ;;  %v3922_v25 = vmul.f32 -1.442695, %v195_v23 }
  0xe7   :  { %4857 = vpow2.f32 %v3922_v25 }
  0xef   :  { %v4856_v24 = vpop.eup %4855 }
  0xf0   :  { %205 = vrot.lane.b32.xlu0 %v4856_v24, %s5114_s18 }
  0xf1   :  { %v4858_v26 = vpop.eup %4857 }
  0xf2   :  { %v199_v27 = vadd.f32 1.0, %v4858_v26 }
  0xf4   :  { %4859 = vrcp.f32 %v199_v27 }
  0xfe   :  { %v4860_v28 = vpop.eup %4859 }
  0xff   :  { %v203_v31 = vmul.f32 0.0, %v4860_v28 }
 0x162   :  { %v206_v29 = vpop.permute.xlu0 %205 }
 0x163   :  { %v208_v30 = vmul.f32 %v4860_v28, %v206_v29 }
 0x165   :  { %210 = vrot.lane.b32.xlu0 %v208_v30, %s5115_s19 }
 0x1d7   :  { %v211_v32 = vpop.permute.xlu0 %210 }
 0x1d8   :  { %v213_v33 = vadd.f32 %v211_v32, %v203_v31 }
 0x1da   :  { %4861 = vtanh.f32 %v213_v33  ;;  %v307_v49 = vrot.slane %v213_v33, 6 }
 0x1e4   :  { %v4862_v34 = vpop.eup %4861 }
 0x1e5   :  { %216 = vrot.lane.b32.xlu1 %v4862_v34, %s5114_s18 }
 0x257   :  { %v217_v35 = vpop.permute.xlu1 %216 }
 0x258   :  { %v5219_v36 = vmul.f32 %v4860_v28, %v217_v35 }
 0x25a   :  { %221 = vrot.lane.b32.xlu1 %v5219_v36, %s5115_s19 }
 0x2cc   :  { %v222_v37 = vpop.permute.xlu1 %221 }
 0x2cd   :  { %4242 = vmatmul.mubr.msk.f32.vlgmr.msra.gmra.mrb[2].mxu0 %vm36_vm0, %v222_v37 }
 0x2ce   :  { %4646 = vmatpush3.bf16.msra.mxu0 %v5172_v9  ;;  %4263 = vmatprep.mubr.msk.f32.mxu0 %vm5112_vm1, %v5113_v4 }
 0x2cf   :  { %4647 = vmatprep.subr.bf16.mxu0 %v5111_v2 }
 0x2d2   :  { %4649 = vmatpush3.bf16.msra.mxu0 %v5185_v14 }
 0x2d3   :  { %4656 = vmatprep.subr.bf16.mxu0 %v5111_v2 }
 0x3a0   :  { %v291_v38 = vpop.f32.mrb[2].mxu0 }
 0x3a1   :  { %v296_v39 = vrot.slane %v291_v38, 6  ;;  %v4243_v40 = vpop.f32.mrb[3].mxu0 }
 0x3a3   :  { %v298_v41 = vadd.f32 %v296_v39, %v5213_v22 }
 0x3a5   :  { %4863 = vtanh.f32 %v298_v41  ;;  %v3924_v43 = vmul.f32 -1.442695, %v298_v41 }
 0x3a7   :  { %4865 = vpow2.f32 %v3924_v43 }
 0x3af   :  { %v4864_v42 = vpop.eup %4863 }
 0x3b0   :  { %311 = vrot.lane.b32.xlu0 %v4864_v42, %s5114_s18 }
 0x3b1   :  { %v4866_v44 = vpop.eup %4865 }
 0x3b2   :  { %v302_v45 = vadd.f32 1.0, %v4866_v44 }
 0x3b4   :  { %4867 = vrcp.f32 %v302_v45 }
 0x3be   :  { %v4868_v46 = vpop.eup %4867 }
 0x3bf   :  { %v309_v50 = vmul.f32 %v4868_v46, %v307_v49 }
 0x422   :  { %v312_v47 = vpop.permute.xlu0 %311 }
 0x423   :  { %v314_v48 = vmul.f32 %v4868_v46, %v312_v47 }
 0x425   :  { %316 = vrot.lane.b32.xlu1 %v314_v48, %s5115_s19 }
 0x497   :  { %v317_v51 = vpop.permute.xlu1 %316 }
 0x498   :  { %v319_v52 = vadd.f32 %v317_v51, %v309_v50 }
 0x49a   :  { %4869 = vtanh.f32 %v319_v52  ;;  %v414_v7 = vrot.slane %v319_v52, 6 }
 0x4a4   :  { %v4870_v53 = vpop.eup %4869 }
 0x4a5   :  { %322 = vrot.lane.b32.xlu0 %v4870_v53, %s5114_s18 }
 0x517   :  { %v323_v54 = vpop.permute.xlu0 %322 }
 0x518   :  { %v325_v55 = vmul.f32 %v4868_v46, %v323_v54 }
 0x51a   :  { %v327_v56 = vrot.slane %v325_v55, 2  ;;  %v965_v16 = vsel %vm964_vm2, %v5219_v36, %v325_v55 }
 0x51c   :  { %328 = vrot.lane.b32.xlu1 %v327_v56, %s5115_s19 }
 0x58e   :  { %v329_v57 = vpop.permute.xlu1 %328 }
 0x58f   :  { %4253 = vmatmul.mubr.msk.f32.vlgmr.msra.gmra.mrb[2].mxu1 %vm36_vm0, %v329_v57 }
 0x590   :  { %4652 = vmatpush3.bf16.msra.mxu1 %v5172_v9  ;;  %4274 = vmatprep.mubr.msk.f32.mxu1 %vm5112_vm1, %v5113_v4 }
 0x591   :  { %4653 = vmatprep.subr.bf16.mxu1 %v5111_v2 }
 0x594   :  { %4655 = vmatpush3.bf16.msra.mxu1 %v5185_v14 }
 0x595   :  { %4662 = vmatprep.subr.bf16.mxu1 %v5111_v2 }
 0x662   :  { %v398_v58 = vpop.f32.mrb[2].mxu1 }
 0x663   :  { %v403_v59 = vrot.slane %v398_v58, 4  ;;  %v4254_v60 = vpop.f32.mrb[3].mxu1 }
 0x665   :  { %v405_v61 = vadd.f32 %v403_v59, %v5213_v22 }
 0x667   :  { %4871 = vtanh.f32 %v405_v61  ;;  %v3926_v63 = vmul.f32 -1.442695, %v405_v61 }
 0x669   :  { %4873 = vpow2.f32 %v3926_v63 }
 0x671   :  { %v4872_v62 = vpop.eup %4871 }
 0x672   :  { %418 = vrot.lane.b32.xlu0 %v4872_v62, %s5114_s18 }
 0x673   :  { %v4874_v0 = vpop.eup %4873 }
 0x674   :  { %v409_v1 = vadd.f32 1.0, %v4874_v0 }
 0x676   :  { %4875 = vrcp.f32 %v409_v1 }
 0x680   :  { %v4876_v3 = vpop.eup %4875 }
 0x681   :  { %v416_v8 = vmul.f32 %v4876_v3, %v414_v7 }
 0x6e4   :  { %v419_v5 = vpop.permute.xlu0 %418 }
 0x6e5   :  { %v421_v6 = vmul.f32 %v4876_v3, %v419_v5 }
 0x6e7   :  { %423 = vrot.lane.b32.xlu1 %v421_v6, %s5115_s19 }
 0x759   :  { %v424_v10 = vpop.permute.xlu1 %423 }
 0x75a   :  { %v426_v11 = vadd.f32 %v424_v10, %v416_v8 }
 0x75c   :  { %4877 = vtanh.f32 %v426_v11  ;;  %v521_v33 = vrot.slane %v426_v11, 6 }
 0x766   :  { %v4878_v12 = vpop.eup %4877 }
 0x767   :  { %429 = vrot.lane.b32.xlu0 %v4878_v12, %s5114_s18 }
 0x7d9   :  { %v430_v13 = vpop.permute.xlu0 %429 }
 0x7da   :  { %v432_v15 = vmul.f32 %v4876_v3, %v430_v13 }
 0x7dc   :  { %v434_v17 = vrot.slane %v432_v15, 4  ;;  %v967_v18 = vsel %vm966_vm3, %v965_v16, %v432_v15 }
 0x7de   :  { %435 = vrot.lane.b32.xlu1 %v434_v17, %s5115_s19 }
 0x850   :  { %v436_v20 = vpop.permute.xlu1 %435 }
 0x851   :  { %4264 = vmatmul.mubr.msk.f32.vlgmr.msra.gmra.mrb[4].mxu0 %vm36_vm0, %v436_v20 }
 0x852   :  { %4658 = vmatpush3.bf16.msra.mxu0 %v5172_v9  ;;  %4285 = vmatprep.mubr.msk.f32.mxu0 %vm5112_vm1, %v5113_v4 }
 0x853   :  { %4659 = vmatprep.subr.bf16.mxu0 %v5111_v2 }
 0x856   :  { %4661 = vmatpush3.bf16.msra.mxu0 %v5185_v14 }
 0x857   :  { %4668 = vmatprep.subr.bf16.mxu0 %v5111_v2 }
 0x924   :  { %v505_v21 = vpop.f32.mrb[4].mxu0 }
 0x925   :  { %v510_v23 = vrot.slane %v505_v21, 2  ;;  %v4265_v24 = vpop.f32.mrb[5].mxu0 }
 0x927   :  { %v512_v25 = vadd.f32 %v510_v23, %v5213_v22 }
 0x929   :  { %4879 = vtanh.f32 %v512_v25  ;;  %v3928_v27 = vmul.f32 -1.442695, %v512_v25 }
 0x92b   :  { %4881 = vpow2.f32 %v3928_v27 }
 0x933   :  { %v4880_v26 = vpop.eup %4879 }
 0x934   :  { %525 = vrot.lane.b32.xlu0 %v4880_v26, %s5114_s18 }
 0x935   :  { %v4882_v28 = vpop.eup %4881 }
 0x936   :  { %v516_v29 = vadd.f32 1.0, %v4882_v28 }
 0x938   :  { %4883 = vrcp.f32 %v516_v29 }
 0x942   :  { %v4884_v30 = vpop.eup %4883 }
 0x943   :  { %v523_v34 = vmul.f32 %v4884_v30, %v521_v33 }
 0x9a6   :  { %v526_v31 = vpop.permute.xlu0 %525 }
 0x9a7   :  { %v528_v32 = vmul.f32 %v4884_v30, %v526_v31 }
 0x9a9   :  { %530 = vrot.lane.b32.xlu1 %v528_v32, %s5115_s19 }
 0xa1b   :  { %v531_v35 = vpop.permute.xlu1 %530 }
 0xa1c   :  { %v533_v36 = vadd.f32 %v531_v35, %v523_v34 }
 0xa1e   :  { %4885 = vtanh.f32 %v533_v36  ;;  %v625_v52 = vrot.slane %v533_v36, 6 }
 0xa28   :  { %v4886_v22 = vpop.eup %4885 }
 0xa29   :  { %536 = vrot.lane.b32.xlu0 %v4886_v22, %s5114_s18 }
 0xa9b   :  { %v537_v37 = vpop.permute.xlu0 %536 }
 0xa9c   :  { %v539_v38 = vmul.f32 %v4884_v30, %v537_v37 }
 0xa9e   :  { %v541_v39 = vrot.slane %v539_v38, 6  ;;  %v5262_v40 = vsel %vm968_vm4, %v967_v18, %v539_v38 }
 0xaa0   :  { %542 = vrot.lane.b32.xlu1 %v541_v39, %s5115_s19 }
 0xb12   :  { %v543_v41 = vpop.permute.xlu1 %542 }
 0xb13   :  { %4275 = vmatmul.mubr.msk.f32.vlgmr.msra.gmra.mrb[4].mxu1 %vm36_vm0, %v543_v41 }
 0xb14   :  { %4664 = vmatpush3.bf16.msra.mxu1 %v5172_v9  ;;  %4296 = vmatprep.mubr.msk.f32.mxu1 %vm5112_vm1, %v5113_v4 }
 0xb15   :  { %4665 = vmatprep.subr.bf16.mxu1 %v5111_v2 }
 0xb18   :  { %4667 = vmatpush3.bf16.msra.mxu1 %v5185_v14 }
 0xbe6   :  { %v612_v42 = vpop.f32.mrb[4].mxu1 }
 0xbe7   :  { %v616_v43 = vadd.f32 %v612_v42, %v5211_v19  ;;  %v4276_v44 = vpop.f32.mrb[5].mxu1 }
 0xbe9   :  { %4887 = vtanh.f32 %v616_v43  ;;  %v3930_v46 = vmul.f32 -1.442695, %v616_v43 }
 0xbeb   :  { %4889 = vpow2.f32 %v3930_v46 }
 0xbf3   :  { %v4888_v45 = vpop.eup %4887 }
 0xbf4   :  { %629 = vrot.lane.b32.xlu0 %v4888_v45, %s5114_s18 }
 0xbf5   :  { %v4890_v47 = vpop.eup %4889 }
 0xbf6   :  { %v620_v48 = vadd.f32 1.0, %v4890_v47 }
 0xbf8   :  { %4891 = vrcp.f32 %v620_v48 }
 0xc02   :  { %v4892_v49 = vpop.eup %4891 }
 0xc03   :  { %v627_v53 = vmul.f32 %v4892_v49, %v625_v52 }
 0xc66   :  { %v630_v50 = vpop.permute.xlu0 %629 }
 0xc67   :  { %v632_v51 = vmul.f32 %v4892_v49, %v630_v50 }
 0xc69   :  { %634 = vrot.lane.b32.xlu1 %v632_v51, %s5115_s19 }
 0xcdb   :  { %v635_v54 = vpop.permute.xlu1 %634 }
 0xcdc   :  { %v637_v55 = vadd.f32 %v635_v54, %v627_v53 }
 0xcde   :  { %4893 = vtanh.f32 %v637_v55 }
 0xce8   :  { %v4894_v56 = vpop.eup %4893 }
 0xce9   :  { %640 = vrot.lane.b32.xlu0 %v4894_v56, %s5114_s18 }
 0xd5b   :  { %v641_v57 = vpop.permute.xlu0 %640 }
 0xd5c   :  { %v5275_v58 = vmul.f32 %v4892_v49, %v641_v57  ;;  %v3937_v57 = vld [vmem:[%s5784_s1 + $0x20] sm:$0xff] }
 0xd5e   :  { %645 = vrot.lane.b32.xlu1 %v5275_v58, %s5115_s19 }
 0xdd0   :  { %v646_v59 = vpop.permute.xlu1 %645 }
 0xdd1   :  { %4286 = vmatmul.mubr.msk.f32.vlgmr.msra.gmra.mrb[6].mxu0 %vm36_vm0, %v646_v59  ;;  %v3945_v59 = vld [vmem:[%s5785_s2 + $0x20] sm:$0xff] }
 0xdd2   :  { %4670 = vmatpush3.bf16.msra.mxu0 %v5172_v9  ;;  %4307 = vmatprep.mubr.msk.f32.mxu0 %vm5112_vm1, %v5113_v4 }
 0xdd3   :  { %4671 = vmatprep.subr.bf16.mxu0 %v5111_v2 }
 0xdd6   :  { %4673 = vmatpush3.bf16.msra.mxu0 %v5185_v14  ;;  %v731_v14 = vrot.slane %v637_v55, 6 }
 0xdd7   :  { %4682 = vmatprep.subr.bf16.mxu0 %v5111_v2 }
 0xea4   :  { %v715_v60 = vpop.f32.mrb[6].mxu0 }
 0xea5   :  { %v720_v61 = vrot.slane %v715_v60, 6  ;;  %v4287_v62 = vpop.f32.mrb[7].mxu0  ;;  %v3946_v60 = vld [vmem:[%s5785_s2 + $0x28] sm:$0xff] }
 0xea6   :  { %v3940_v62 = vld [vmem:[%s5784_s1 + $0x38] sm:$0xff] }
 0xea7   :  { %v722_v63 = vadd.f32 %v720_v61, %v5211_v19  ;;  %v3939_v61 = vld [vmem:[%s5784_s1 + $0x30] sm:$0xff] }
 0xea9   :  { %4895 = vtanh.f32 %v722_v63  ;;  %v3932_v1 = vmul.f32 -1.442695, %v722_v63  ;;  %v5327_v63 = vpack.c.bf16 %v3946_v60, %v3945_v59 }
 0xeab   :  { %4897 = vpow2.f32 %v3932_v1  ;;  %v3947_v1 = vld [vmem:[%s5785_s2 + $0x30] sm:$0xff] }
 0xeb3   :  { %v4896_v0 = vpop.eup %4895 }
 0xeb4   :  { %735 = vrot.lane.b32.xlu0 %v4896_v0, %s5114_s18  ;;  %v4678_v0 = vpack.c.bf16 %v3940_v62, %v3939_v61 }
 0xeb5   :  { %v4898_v9 = vpop.eup %4897 }
 0xeb6   :  { %v726_v3 = vadd.f32 1.0, %v4898_v9  ;;  %v3948_v9 = vld [vmem:[%s5785_s2 + $0x38] sm:$0xff] }
 0xeb8   :  { %4899 = vrcp.f32 %v726_v3  ;;  %v5336_v3 = vpack.c.bf16 %v3948_v9, %v3947_v1 }
 0xec2   :  { %v4900_v5 = vpop.eup %4899 }
 0xec3   :  { %v733_v8 = vmul.f32 %v4900_v5, %v731_v14 }
 0xf26   :  { %v736_v6 = vpop.permute.xlu0 %735 }
 0xf27   :  { %v738_v7 = vmul.f32 %v4900_v5, %v736_v6 }
 0xf29   :  { %740 = vrot.lane.b32.xlu1 %v738_v7, %s5115_s19 }
 0xf9b   :  { %v741_v10 = vpop.permute.xlu1 %740 }
 0xf9c   :  { %v743_v11 = vadd.f32 %v741_v10, %v733_v8 }
 0xf9e   :  { %4901 = vtanh.f32 %v743_v11  ;;  %v838_v31 = vrot.slane %v743_v11, 6 }
 0xfa8   :  { %v4902_v12 = vpop.eup %4901 }
 0xfa9   :  { %746 = vrot.lane.b32.xlu0 %v4902_v12, %s5114_s18  ;;  %v3942_v12 = vld [vmem:[%s5787_s3 + $0x1] ss:$0 sm:$0xff] }
0x101b   :  { %v747_v13 = vpop.permute.xlu0 %746 }
0x101c   :  { %v749_v15 = vmul.f32 %v4900_v5, %v747_v13 }
0x101e   :  { %v751_v16 = vrot.slane %v749_v15, 2  ;;  %v970_v37 = vsel %vm964_vm2, %v5275_v58, %v749_v15  ;;  %v3938_v58 = vld [vmem:[%s5784_s1 + $0x28] sm:$0xff] }
0x1020   :  { %752 = vrot.lane.b32.xlu1 %v751_v16, %s5115_s19 }
0x1092   :  { %v753_v17 = vpop.permute.xlu1 %752 }
0x1093   :  { %4297 = vmatmul.mubr.msk.f32.vlgmr.msra.gmra.mrb[6].mxu1 %vm36_vm0, %v753_v17 }
0x1166   :  { %v822_v18 = vpop.f32.mrb[6].mxu1 }
0x1167   :  { %v827_v20 = vrot.slane %v822_v18, 4  ;;  %v4298_v21 = vpop.f32.mrb[7].mxu1 }
0x1169   :  { %v829_v23 = vadd.f32 %v827_v20, %v5211_v19 }
0x116b   :  { %4903 = vtanh.f32 %v829_v23  ;;  %v3934_v25 = vmul.f32 -1.442695, %v829_v23 }
0x116d   :  { %4905 = vpow2.f32 %v3934_v25 }
0x1175   :  { %v4904_v24 = vpop.eup %4903 }
0x1176   :  { %842 = vrot.lane.b32.xlu0 %v4904_v24, %s5114_s18 }
0x1177   :  { %v4906_v26 = vpop.eup %4905 }
0x1178   :  { %v833_v27 = vadd.f32 1.0, %v4906_v26 }
0x117a   :  { %4907 = vrcp.f32 %v833_v27 }
0x1184   :  { %v4908_v28 = vpop.eup %4907 }
0x1185   :  { %v840_v32 = vmul.f32 %v4908_v28, %v838_v31 }
0x11e8   :  { %v843_v29 = vpop.permute.xlu0 %842 }
0x11e9   :  { %v845_v30 = vmul.f32 %v4908_v28, %v843_v29 }
0x11eb   :  { %847 = vrot.lane.b32.xlu1 %v845_v30, %s5115_s19 }
0x125d   :  { %v848_v33 = vpop.permute.xlu1 %847 }
0x125e   :  { %v850_v34 = vadd.f32 %v848_v33, %v840_v32 }
0x1260   :  { %4909 = vtanh.f32 %v850_v34  ;;  %v945_v53 = vrot.slane %v850_v34, 6 }
0x126a   :  { %v4910_v35 = vpop.eup %4909 }
0x126b   :  { %853 = vrot.lane.b32.xlu0 %v4910_v35, %s5114_s18 }
0x12dd   :  { %v854_v36 = vpop.permute.xlu0 %853 }
0x12de   :  { %v856_v22 = vmul.f32 %v4908_v28, %v854_v36 }
0x12e0   :  { %v858_v38 = vrot.slane %v856_v22, 4  ;;  %v971_v39 = vsel %vm966_vm3, %v970_v37, %v856_v22 }
0x12e2   :  { %859 = vrot.lane.b32.xlu1 %v858_v38, %s5115_s19 }
0x1354   :  { %v860_v41 = vpop.permute.xlu1 %859 }
0x1355   :  { %4308 = vmatmul.mubr.msk.f32.vlgmr.msra.gmra.mrb[8].mxu0 %vm36_vm0, %v860_v41 }
0x1356   :  { %4329 = vmatprep.mubr.msk.f32.mxu0 %vm5112_vm1, %v5113_v4  ;;  %4684 = vmatpush3.bf16.msra.mxu0 %v5327_v63 }
0x1357   :  { %4685 = vmatprep.subr.bf16.mxu0 %v5111_v2 }
0x135a   :  { %4687 = vmatpush3.bf16.msra.mxu0 %v5336_v3 }
0x135b   :  { %4694 = vmatprep.subr.bf16.mxu0 %v5111_v2 }
0x135d   :  { %4330 = vmatmul.mubr.f32.vlgmr.msra.gmra.mrb[10].mxu0 %v5113_v4 }
0x135e   :  { %4696 = vmatpush3.bf16.msra.mxu0 %v5327_v63  ;;  %4351 = vmatprep.mubr.msk.f32.mxu0 %vm5112_vm1, %v5113_v4 }
0x135f   :  { %4697 = vmatprep.subr.bf16.mxu0 %v5111_v2 }
0x1362   :  { %4699 = vmatpush3.bf16.msra.mxu0 %v5336_v3 }
0x1363   :  { %4706 = vmatprep.subr.bf16.mxu0 %v5111_v2 }
0x1428   :  { %v929_v42 = vpop.f32.mrb[8].mxu0 }
0x1429   :  { %v934_v43 = vrot.slane %v929_v42, 2  ;;  %v4309_v44 = vpop.f32.mrb[9].mxu0 }
0x142b   :  { %v936_v45 = vadd.f32 %v934_v43, %v5211_v19 }
0x142d   :  { %4911 = vtanh.f32 %v936_v45  ;;  %v3936_v47 = vmul.f32 -1.442695, %v936_v45 }
0x142f   :  { %4913 = vpow2.f32 %v3936_v47 }
0x1430   :  { %v1142_v10 = vpop.f32.mrb[10].mxu0 }
0x1431   :  { %v4331_v11 = vpop.f32.mrb[11].mxu0 }
0x1437   :  { %v4912_v46 = vpop.eup %4911 }
0x1438   :  { %949 = vrot.lane.b32.xlu0 %v4912_v46, %s5114_s18 }
0x1439   :  { %v4914_v48 = vpop.eup %4913 }
0x143a   :  { %v940_v49 = vadd.f32 1.0, %v4914_v48 }
0x143c   :  { %4915 = vrcp.f32 %v940_v49 }
0x1446   :  { %v4916_v50 = vpop.eup %4915 }
0x1447   :  { %v947_v54 = vmul.f32 %v4916_v50, %v945_v53 }
0x14aa   :  { %v950_v51 = vpop.permute.xlu0 %949 }
0x14ab   :  { %v952_v52 = vmul.f32 %v4916_v50, %v950_v51 }
0x14ad   :  { %954 = vrot.lane.b32.xlu1 %v952_v52, %s5115_s19 }
0x14b1   :  { %988 = vrot.lane.b32.xlu1 %v5262_v40, %s5115_s19  ;;  %v4674_v40 = vpack.c.bf16 %v3938_v58, %v3937_v57 }
0x14b3   :  { %4675 = vmatprep.subr.bf16.mxu1 %v4674_v40 }
0x14b4   :  { %4677 = vmatpush3.bf16.msra.mxu1 %v4674_v40 }
0x14b5   :  { %4679 = vmatprep.subr.bf16.mxu1 %v4678_v0 }
0x14b8   :  { %4681 = vmatpush3.bf16.msra.mxu1 %v4678_v0 }
0x14b9   :  { %4688 = vmatprep.subr.bf16.mxu1 %v5111_v2 }
0x151f   :  { %v955_v19 = vpop.permute.xlu1 %954 }
0x1520   :  { %v957_v55 = vadd.f32 %v955_v19, %v947_v54 }
0x1522   :  { %4917 = vtanh.f32 %v957_v55 }
0x1523   :  { %v989_v56 = vpop.permute.xlu1 %988 }
0x1524   :  { %4318 = vmatprep.mubr.msk.f32.mxu1 %vm36_vm0, %v989_v56 }
0x152c   :  { %v4918_v5 = vpop.eup %4917 }
0x152d   :  { %960 = vrot.lane.b32.xlu0 %v4918_v5, %s5114_s18 }
0x159f   :  { %v961_v6 = vpop.permute.xlu0 %960 }
0x15a0   :  { %v963_v7 = vmul.f32 %v4916_v50, %v961_v6 }
0x15a2   :  { %v972_v14 = vsel %vm968_vm4, %v971_v39, %v963_v7 }
0x15a3   :  { %990 = vrot.lane.b32.xlu0 %v972_v14, %s5115_s19 }
0x1615   :  { %v991_v8 = vpop.permute.xlu0 %990 }
0x1616   :  { %4319 = vmatmul.mubr.msk.f32.vlgmr.msra.gmra.mrb[8].mxu1 %vm36_vm0, %v991_v8 }
0x1617   :  { %4690 = vmatpush3.bf16.msra.mxu1 %v5327_v63  ;;  %4340 = vmatprep.mubr.msk.f32.mxu1 %vm5112_vm1, %v5113_v4 }
0x1618   :  { %4691 = vmatprep.subr.bf16.mxu1 %v5111_v2 }
0x161b   :  { %4693 = vmatpush3.bf16.msra.mxu1 %v5336_v3 }
0x161c   :  { %4700 = vmatprep.subr.bf16.mxu1 %v5111_v2 }
0x16e9   :  { %v4320_v13 = vpop.f32.mrb[8].mxu1 }
0x16ea   :  { %v5362_v15 = vadd.f32 %v4320_v13, %v3942_v12  ;;  %v1062_v16 = vpop.f32.mrb[9].mxu1 }
0x16eb   :  { %v5364_v17 = vadd.f32 %v3942_v12, %v1062_v16 }
0x16ed   :  { %v1146_v18 = vadd.f32 %v1142_v10, %v5364_v17 }
0x16ef   :  { %4919 = vtanh.f32 %v1146_v18  ;;  %v3949_v21 = vmul.f32 -1.442695, %v1146_v18 }
0x16f1   :  { %4921 = vpow2.f32 %v3949_v21 }
0x16f9   :  { %v4920_v20 = vpop.eup %4919 }
0x16fa   :  { %1156 = vrot.lane.b32.xlu1 %v4920_v20, %s5114_s18 }
0x16fb   :  { %v4922_v23 = vpop.eup %4921 }
0x16fc   :  { %v1150_v24 = vadd.f32 1.0, %v4922_v23 }
0x16fe   :  { %4923 = vrcp.f32 %v1150_v24 }
0x1708   :  { %v4924_v25 = vpop.eup %4923 }
0x1709   :  { %v1154_v28 = vmul.f32 0.0, %v4924_v25 }
0x176c   :  { %v1157_v26 = vpop.permute.xlu1 %1156 }
0x176d   :  { %v1159_v27 = vmul.f32 %v4924_v25, %v1157_v26 }
0x176f   :  { %1161 = vrot.lane.b32.xlu0 %v1159_v27, %s5115_s19 }
0x17e1   :  { %v1162_v29 = vpop.permute.xlu0 %1161 }
0x17e2   :  { %v1164_v30 = vadd.f32 %v1162_v29, %v1154_v28 }
0x17e4   :  { %4925 = vtanh.f32 %v1164_v30  ;;  %v1258_v46 = vrot.slane %v1164_v30, 6 }
0x17ee   :  { %v4926_v31 = vpop.eup %4925 }
0x17ef   :  { %1167 = vrot.lane.b32.xlu1 %v4926_v31, %s5114_s18 }
0x1861   :  { %v1168_v32 = vpop.permute.xlu1 %1167 }
0x1862   :  { %v5370_v33 = vmul.f32 %v4924_v25, %v1168_v32 }
0x1864   :  { %1172 = vrot.lane.b32.xlu0 %v5370_v33, %s5115_s19 }
0x18d6   :  { %v1173_v34 = vpop.permute.xlu0 %1172 }
0x18d7   :  { %4341 = vmatmul.mubr.msk.f32.vlgmr.msra.gmra.mrb[10].mxu1 %vm36_vm0, %v1173_v34 }
0x18d8   :  { %4702 = vmatpush3.bf16.msra.mxu1 %v5327_v63  ;;  %4362 = vmatprep.mubr.msk.f32.mxu1 %vm5112_vm1, %v5113_v4 }
0x18d9   :  { %4703 = vmatprep.subr.bf16.mxu1 %v5111_v2 }
0x18dc   :  { %4705 = vmatpush3.bf16.msra.mxu1 %v5336_v3 }
0x18dd   :  { %4712 = vmatprep.subr.bf16.mxu1 %v5111_v2 }
0x19aa   :  { %v1242_v35 = vpop.f32.mrb[10].mxu1 }
0x19ab   :  { %v1247_v36 = vrot.slane %v1242_v35, 6  ;;  %v4342_v22 = vpop.f32.mrb[11].mxu1 }
0x19ad   :  { %v1249_v37 = vadd.f32 %v1247_v36, %v5364_v17 }
0x19af   :  { %4927 = vtanh.f32 %v1249_v37  ;;  %v3951_v39 = vmul.f32 -1.442695, %v1249_v37 }
0x19b1   :  { %4929 = vpow2.f32 %v3951_v39 }
0x19b9   :  { %v4928_v38 = vpop.eup %4927 }
0x19ba   :  { %1262 = vrot.lane.b32.xlu1 %v4928_v38, %s5114_s18 }
0x19bb   :  { %v4930_v41 = vpop.eup %4929 }
0x19bc   :  { %v1253_v42 = vadd.f32 1.0, %v4930_v41 }
0x19be   :  { %4931 = vrcp.f32 %v1253_v42 }
0x19c8   :  { %v4932_v43 = vpop.eup %4931 }
0x19c9   :  { %v1260_v47 = vmul.f32 %v4932_v43, %v1258_v46 }
0x1a2c   :  { %v1263_v44 = vpop.permute.xlu1 %1262 }
0x1a2d   :  { %v1265_v45 = vmul.f32 %v4932_v43, %v1263_v44 }
0x1a2f   :  { %1267 = vrot.lane.b32.xlu0 %v1265_v45, %s5115_s19 }
0x1aa1   :  { %v1268_v48 = vpop.permute.xlu0 %1267 }
0x1aa2   :  { %v1270_v49 = vadd.f32 %v1268_v48, %v1260_v47 }
0x1aa4   :  { %4933 = vtanh.f32 %v1270_v49  ;;  %v1365_v1 = vrot.slane %v1270_v49, 6 }
0x1aae   :  { %v4934_v50 = vpop.eup %4933 }
0x1aaf   :  { %1273 = vrot.lane.b32.xlu1 %v4934_v50, %s5114_s18 }
0x1b21   :  { %v1274_v51 = vpop.permute.xlu1 %1273 }
0x1b22   :  { %v1276_v52 = vmul.f32 %v4932_v43, %v1274_v51 }
0x1b24   :  { %v1278_v53 = vrot.slane %v1276_v52, 2  ;;  %v1915_v10 = vsel %vm964_vm2, %v5370_v33, %v1276_v52 }
0x1b26   :  { %1279 = vrot.lane.b32.xlu0 %v1278_v53, %s5115_s19 }
0x1b98   :  { %v1280_v54 = vpop.permute.xlu0 %1279 }
0x1b99   :  { %4352 = vmatmul.mubr.msk.f32.vlgmr.msra.gmra.mrb[12].mxu0 %vm36_vm0, %v1280_v54 }
0x1b9a   :  { %4708 = vmatpush3.bf16.msra.mxu0 %v5327_v63  ;;  %4373 = vmatprep.mubr.msk.f32.mxu0 %vm5112_vm1, %v5113_v4 }
0x1b9b   :  { %4709 = vmatprep.subr.bf16.mxu0 %v5111_v2 }
0x1b9e   :  { %4711 = vmatpush3.bf16.msra.mxu0 %v5336_v3 }
0x1b9f   :  { %4718 = vmatprep.subr.bf16.mxu0 %v5111_v2 }
0x1c6c   :  { %v1349_v19 = vpop.f32.mrb[12].mxu0 }
0x1c6d   :  { %v1354_v55 = vrot.slane %v1349_v19, 4  ;;  %v4353_v56 = vpop.f32.mrb[13].mxu0 }
0x1c6f   :  { %v1356_v57 = vadd.f32 %v1354_v55, %v5364_v17 }
0x1c71   :  { %4935 = vtanh.f32 %v1356_v57  ;;  %v3953_v59 = vmul.f32 -1.442695, %v1356_v57 }
0x1c73   :  { %4937 = vpow2.f32 %v3953_v59 }
0x1c7b   :  { %v4936_v58 = vpop.eup %4935 }
0x1c7c   :  { %1369 = vrot.lane.b32.xlu1 %v4936_v58, %s5114_s18 }
0x1c7d   :  { %v4938_v40 = vpop.eup %4937 }
0x1c7e   :  { %v1360_v60 = vadd.f32 1.0, %v4938_v40 }
0x1c80   :  { %4939 = vrcp.f32 %v1360_v60 }
0x1c8a   :  { %v4940_v61 = vpop.eup %4939 }
0x1c8b   :  { %v1367_v9 = vmul.f32 %v4940_v61, %v1365_v1 }
0x1cee   :  { %v1370_v62 = vpop.permute.xlu1 %1369 }
0x1cef   :  { %v1372_v0 = vmul.f32 %v4940_v61, %v1370_v62 }
0x1cf1   :  { %1374 = vrot.lane.b32.xlu0 %v1372_v0, %s5115_s19 }
0x1d63   :  { %v1375_v5 = vpop.permute.xlu0 %1374 }
0x1d64   :  { %v1377_v6 = vadd.f32 %v1375_v5, %v1367_v9 }
0x1d66   :  { %4941 = vtanh.f32 %v1377_v6  ;;  %v1472_v30 = vrot.slane %v1377_v6, 6 }
0x1d70   :  { %v4942_v7 = vpop.eup %4941 }
0x1d71   :  { %1380 = vrot.lane.b32.xlu1 %v4942_v7, %s5114_s18 }
0x1de3   :  { %v1381_v14 = vpop.permute.xlu1 %1380 }
0x1de4   :  { %v1383_v8 = vmul.f32 %v4940_v61, %v1381_v14 }
0x1de6   :  { %v1385_v11 = vrot.slane %v1383_v8, 4  ;;  %v1916_v12 = vsel %vm966_vm3, %v1915_v10, %v1383_v8 }
0x1de8   :  { %1386 = vrot.lane.b32.xlu0 %v1385_v11, %s5115_s19 }
0x1e5a   :  { %v1387_v13 = vpop.permute.xlu0 %1386 }
0x1e5b   :  { %4363 = vmatmul.mubr.msk.f32.vlgmr.msra.gmra.mrb[12].mxu1 %vm36_vm0, %v1387_v13 }
0x1e5c   :  { %4714 = vmatpush3.bf16.msra.mxu1 %v5327_v63  ;;  %4384 = vmatprep.mubr.msk.f32.mxu1 %vm5112_vm1, %v5113_v4 }
0x1e5d   :  { %4715 = vmatprep.subr.bf16.mxu1 %v5111_v2 }
0x1e60   :  { %4717 = vmatpush3.bf16.msra.mxu1 %v5336_v3 }
0x1e61   :  { %4724 = vmatprep.subr.bf16.mxu1 %v5111_v2 }
0x1f2e   :  { %v1456_v16 = vpop.f32.mrb[12].mxu1 }
0x1f2f   :  { %v1461_v18 = vrot.slane %v1456_v16, 2  ;;  %v4364_v20 = vpop.f32.mrb[13].mxu1 }
0x1f31   :  { %v1463_v21 = vadd.f32 %v1461_v18, %v5364_v17 }
0x1f33   :  { %4943 = vtanh.f32 %v1463_v21  ;;  %v3955_v24 = vmul.f32 -1.442695, %v1463_v21 }
0x1f35   :  { %4945 = vpow2.f32 %v3955_v24 }
0x1f3d   :  { %v4944_v23 = vpop.eup %4943 }
0x1f3e   :  { %1476 = vrot.lane.b32.xlu1 %v4944_v23, %s5114_s18 }
0x1f3f   :  { %v4946_v25 = vpop.eup %4945 }
0x1f40   :  { %v1467_v26 = vadd.f32 1.0, %v4946_v25 }
0x1f42   :  { %4947 = vrcp.f32 %v1467_v26 }
0x1f4c   :  { %v4948_v27 = vpop.eup %4947 }
0x1f4d   :  { %v1474_v31 = vmul.f32 %v4948_v27, %v1472_v30 }
0x1fb0   :  { %v1477_v28 = vpop.permute.xlu1 %1476 }
0x1fb1   :  { %v1479_v29 = vmul.f32 %v4948_v27, %v1477_v28 }
0x1fb3   :  { %1481 = vrot.lane.b32.xlu0 %v1479_v29, %s5115_s19 }
0x2025   :  { %v1482_v32 = vpop.permute.xlu0 %1481 }
0x2026   :  { %v1484_v33 = vadd.f32 %v1482_v32, %v1474_v31 }
0x2028   :  { %4949 = vtanh.f32 %v1484_v33  ;;  %v1576_v49 = vrot.slane %v1484_v33, 6 }
0x2032   :  { %v4950_v17 = vpop.eup %4949 }
0x2033   :  { %1487 = vrot.lane.b32.xlu1 %v4950_v17, %s5114_s18 }
0x20a5   :  { %v1488_v34 = vpop.permute.xlu1 %1487 }
0x20a6   :  { %v1490_v35 = vmul.f32 %v4948_v27, %v1488_v34 }
0x20a8   :  { %v1492_v36 = vrot.slane %v1490_v35, 6  ;;  %v5413_v22 = vsel %vm968_vm4, %v1916_v12, %v1490_v35 }
0x20aa   :  { %1493 = vrot.lane.b32.xlu0 %v1492_v36, %s5115_s19 }
0x211c   :  { %v1494_v37 = vpop.permute.xlu0 %1493 }
0x211d   :  { %4374 = vmatmul.mubr.msk.f32.vlgmr.msra.gmra.mrb[14].mxu0 %vm36_vm0, %v1494_v37 }
0x211e   :  { %4720 = vmatpush3.bf16.msra.mxu0 %v5327_v63  ;;  %4395 = vmatprep.mubr.msk.f32.mxu0 %vm5112_vm1, %v5113_v4 }
0x211f   :  { %4721 = vmatprep.subr.bf16.mxu0 %v5111_v2 }
0x2122   :  { %4723 = vmatpush3.bf16.msra.mxu0 %v5336_v3 }
0x21f0   :  { %v1563_v38 = vpop.f32.mrb[14].mxu0 }
0x21f1   :  { %v1567_v39 = vadd.f32 %v1563_v38, %v5362_v15  ;;  %v4375_v41 = vpop.f32.mrb[15].mxu0 }
0x21f3   :  { %4951 = vtanh.f32 %v1567_v39  ;;  %v3957_v43 = vmul.f32 -1.442695, %v1567_v39 }
0x21f5   :  { %4953 = vpow2.f32 %v3957_v43 }
0x21fd   :  { %v4952_v42 = vpop.eup %4951 }
0x21fe   :  { %1580 = vrot.lane.b32.xlu1 %v4952_v42, %s5114_s18 }
0x21ff   :  { %v4954_v44 = vpop.eup %4953 }
0x2200   :  { %v1571_v45 = vadd.f32 1.0, %v4954_v44 }
0x2202   :  { %4955 = vrcp.f32 %v1571_v45 }
0x220c   :  { %v4956_v46 = vpop.eup %4955 }
0x220d   :  { %v1578_v50 = vmul.f32 %v4956_v46, %v1576_v49 }
0x2270   :  { %v1581_v47 = vpop.permute.xlu1 %1580 }
0x2271   :  { %v1583_v48 = vmul.f32 %v4956_v46, %v1581_v47 }
0x2273   :  { %1585 = vrot.lane.b32.xlu0 %v1583_v48, %s5115_s19 }
0x22e5   :  { %v1586_v51 = vpop.permute.xlu0 %1585 }
0x22e6   :  { %v1588_v52 = vadd.f32 %v1586_v51, %v1578_v50 }
0x22e8   :  { %4957 = vtanh.f32 %v1588_v52 }
0x22f2   :  { %v4958_v53 = vpop.eup %4957 }
0x22f3   :  { %1591 = vrot.lane.b32.xlu1 %v4958_v53, %s5114_s18 }
0x2365   :  { %v1592_v54 = vpop.permute.xlu1 %1591 }
0x2366   :  { %v5426_v19 = vmul.f32 %v4956_v46, %v1592_v54  ;;  %v3964_v54 = vld [vmem:[%s5784_s1 + $0x40] sm:$0xff] }
0x2368   :  { %1596 = vrot.lane.b32.xlu0 %v5426_v19, %s5115_s19 }
0x23da   :  { %v1597_v55 = vpop.permute.xlu0 %1596 }
0x23db   :  { %4385 = vmatmul.mubr.msk.f32.vlgmr.msra.gmra.mrb[14].mxu1 %vm36_vm0, %v1597_v55  ;;  %v3972_v55 = vld [vmem:[%s5785_s2 + $0x40] sm:$0xff] }
0x23dc   :  { %4726 = vmatpush3.bf16.msra.mxu1 %v5327_v63  ;;  %4406 = vmatprep.mubr.msk.f32.mxu1 %vm5112_vm1, %v5113_v4 }
0x23dd   :  { %4727 = vmatprep.subr.bf16.mxu1 %v5111_v2 }
0x23e0   :  { %4729 = vmatpush3.bf16.msra.mxu1 %v5336_v3  ;;  %v1682_v3 = vrot.slane %v1588_v52, 6 }
0x23e1   :  { %4738 = vmatprep.subr.bf16.mxu1 %v5111_v2 }
0x24ae   :  { %v1666_v56 = vpop.f32.mrb[14].mxu1 }
0x24af   :  { %v1671_v57 = vrot.slane %v1666_v56, 6  ;;  %v4386_v58 = vpop.f32.mrb[15].mxu1  ;;  %v3973_v56 = vld [vmem:[%s5785_s2 + $0x48] sm:$0xff] }
0x24b0   :  { %v3967_v58 = vld [vmem:[%s5784_s1 + $0x58] sm:$0xff] }
0x24b1   :  { %v1673_v59 = vadd.f32 %v1671_v57, %v5362_v15  ;;  %v3966_v57 = vld [vmem:[%s5784_s1 + $0x50] sm:$0xff] }
0x24b3   :  { %4959 = vtanh.f32 %v1673_v59  ;;  %v3959_v60 = vmul.f32 -1.442695, %v1673_v59  ;;  %v5478_v59 = vpack.c.bf16 %v3973_v56, %v3972_v55 }
0x24b5   :  { %4961 = vpow2.f32 %v3959_v60  ;;  %v3974_v60 = vld [vmem:[%s5785_s2 + $0x50] sm:$0xff] }
0x24bd   :  { %v4960_v40 = vpop.eup %4959 }
0x24be   :  { %1686 = vrot.lane.b32.xlu1 %v4960_v40, %s5114_s18  ;;  %v4734_v40 = vpack.c.bf16 %v3967_v58, %v3966_v57 }
0x24bf   :  { %v4962_v63 = vpop.eup %4961 }
0x24c0   :  { %v1677_v61 = vadd.f32 1.0, %v4962_v63  ;;  %v3975_v63 = vld [vmem:[%s5785_s2 + $0x58] sm:$0xff] }
0x24c2   :  { %4963 = vrcp.f32 %v1677_v61  ;;  %v5487_v61 = vpack.c.bf16 %v3975_v63, %v3974_v60 }
0x24cc   :  { %v4964_v62 = vpop.eup %4963 }
0x24cd   :  { %v1684_v9 = vmul.f32 %v4964_v62, %v1682_v3 }
0x2530   :  { %v1687_v0 = vpop.permute.xlu1 %1686 }
0x2531   :  { %v1689_v1 = vmul.f32 %v4964_v62, %v1687_v0 }
0x2533   :  { %1691 = vrot.lane.b32.xlu0 %v1689_v1, %s5115_s19 }
0x25a5   :  { %v1692_v5 = vpop.permute.xlu0 %1691 }
0x25a6   :  { %v1694_v6 = vadd.f32 %v1692_v5, %v1684_v9 }
0x25a8   :  { %4965 = vtanh.f32 %v1694_v6  ;;  %v1789_v28 = vrot.slane %v1694_v6, 6 }
0x25b2   :  { %v4966_v7 = vpop.eup %4965 }
0x25b3   :  { %1697 = vrot.lane.b32.xlu1 %v4966_v7, %s5114_s18  ;;  %v3969_v7 = vld [vmem:[%s5787_s3 + $0x2] ss:$0 sm:$0xff] }
0x2625   :  { %v1698_v14 = vpop.permute.xlu1 %1697 }
0x2626   :  { %v1700_v8 = vmul.f32 %v4964_v62, %v1698_v14 }
0x2628   :  { %v1702_v10 = vrot.slane %v1700_v8, 2  ;;  %v1918_v34 = vsel %vm964_vm2, %v5426_v19, %v1700_v8  ;;  %v3965_v19 = vld [vmem:[%s5784_s1 + $0x48] sm:$0xff] }
0x262a   :  { %1703 = vrot.lane.b32.xlu0 %v1702_v10, %s5115_s19 }
0x269c   :  { %v1704_v11 = vpop.permute.xlu0 %1703 }
0x269d   :  { %4396 = vmatmul.mubr.msk.f32.vlgmr.msra.gmra.mrb[16].mxu0 %vm36_vm0, %v1704_v11 }
0x2770   :  { %v1773_v12 = vpop.f32.mrb[16].mxu0 }
0x2771   :  { %v1778_v13 = vrot.slane %v1773_v12, 4  ;;  %v4397_v16 = vpop.f32.mrb[17].mxu0 }
0x2773   :  { %v1780_v18 = vadd.f32 %v1778_v13, %v5362_v15 }
0x2775   :  { %4967 = vtanh.f32 %v1780_v18  ;;  %v3961_v21 = vmul.f32 -1.442695, %v1780_v18 }
0x2777   :  { %4969 = vpow2.f32 %v3961_v21 }
0x277f   :  { %v4968_v20 = vpop.eup %4967 }
0x2780   :  { %1793 = vrot.lane.b32.xlu1 %v4968_v20, %s5114_s18 }
0x2781   :  { %v4970_v23 = vpop.eup %4969 }
0x2782   :  { %v1784_v24 = vadd.f32 1.0, %v4970_v23 }
0x2784   :  { %4971 = vrcp.f32 %v1784_v24 }
0x278e   :  { %v4972_v25 = vpop.eup %4971 }
0x278f   :  { %v1791_v29 = vmul.f32 %v4972_v25, %v1789_v28 }
0x27f2   :  { %v1794_v26 = vpop.permute.xlu1 %1793 }
0x27f3   :  { %v1796_v27 = vmul.f32 %v4972_v25, %v1794_v26 }
0x27f5   :  { %1798 = vrot.lane.b32.xlu0 %v1796_v27, %s5115_s19 }
0x2867   :  { %v1799_v30 = vpop.permute.xlu0 %1798 }
0x2868   :  { %v1801_v31 = vadd.f32 %v1799_v30, %v1791_v29 }
0x286a   :  { %4973 = vtanh.f32 %v1801_v31  ;;  %v1896_v50 = vrot.slane %v1801_v31, 6 }
0x2874   :  { %v4974_v32 = vpop.eup %4973 }
0x2875   :  { %1804 = vrot.lane.b32.xlu1 %v4974_v32, %s5114_s18 }
0x28e7   :  { %v1805_v33 = vpop.permute.xlu1 %1804 }
0x28e8   :  { %v1807_v17 = vmul.f32 %v4972_v25, %v1805_v33 }
0x28ea   :  { %v1809_v35 = vrot.slane %v1807_v17, 4  ;;  %v1919_v36 = vsel %vm966_vm3, %v1918_v34, %v1807_v17 }
0x28ec   :  { %1810 = vrot.lane.b32.xlu0 %v1809_v35, %s5115_s19 }
0x295e   :  { %v1811_v37 = vpop.permute.xlu0 %1810 }
0x295f   :  { %4407 = vmatmul.mubr.msk.f32.vlgmr.msra.gmra.mrb[16].mxu1 %vm36_vm0, %v1811_v37 }
0x2960   :  { %4428 = vmatprep.mubr.msk.f32.mxu1 %vm5112_vm1, %v5113_v4  ;;  %4740 = vmatpush3.bf16.msra.mxu1 %v5478_v59 }
0x2961   :  { %4741 = vmatprep.subr.bf16.mxu1 %v5111_v2 }
0x2964   :  { %4743 = vmatpush3.bf16.msra.mxu1 %v5487_v61 }
0x2965   :  { %4750 = vmatprep.subr.bf16.mxu1 %v5111_v2 }
0x2967   :  { %4429 = vmatmul.mubr.f32.vlgmr.msra.gmra.mrb[18].mxu1 %v5113_v4 }
0x2968   :  { %4752 = vmatpush3.bf16.msra.mxu1 %v5478_v59  ;;  %4450 = vmatprep.mubr.msk.f32.mxu1 %vm5112_vm1, %v5113_v4 }
0x2969   :  { %4753 = vmatprep.subr.bf16.mxu1 %v5111_v2 }
0x296c   :  { %4755 = vmatpush3.bf16.msra.mxu1 %v5487_v61 }
0x296d   :  { %4762 = vmatprep.subr.bf16.mxu1 %v5111_v2 }
0x2a32   :  { %v1880_v38 = vpop.f32.mrb[16].mxu1 }
0x2a33   :  { %v1885_v39 = vrot.slane %v1880_v38, 2  ;;  %v4408_v41 = vpop.f32.mrb[17].mxu1 }
0x2a35   :  { %v1887_v42 = vadd.f32 %v1885_v39, %v5362_v15 }
0x2a37   :  { %4975 = vtanh.f32 %v1887_v42  ;;  %v3963_v44 = vmul.f32 -1.442695, %v1887_v42 }
0x2a39   :  { %4977 = vpow2.f32 %v3963_v44 }
0x2a3a   :  { %v2090_v5 = vpop.f32.mrb[18].mxu1 }
0x2a3b   :  { %v4430_v6 = vpop.f32.mrb[19].mxu1 }
0x2a41   :  { %v4976_v43 = vpop.eup %4975 }
0x2a42   :  { %1900 = vrot.lane.b32.xlu1 %v4976_v43, %s5114_s18 }
0x2a43   :  { %v4978_v45 = vpop.eup %4977 }
0x2a44   :  { %v1891_v46 = vadd.f32 1.0, %v4978_v45 }
0x2a46   :  { %4979 = vrcp.f32 %v1891_v46 }
0x2a50   :  { %v4980_v47 = vpop.eup %4979 }
0x2a51   :  { %v1898_v51 = vmul.f32 %v4980_v47, %v1896_v50 }
0x2ab4   :  { %v1901_v48 = vpop.permute.xlu1 %1900 }
0x2ab5   :  { %v1903_v49 = vmul.f32 %v4980_v47, %v1901_v48 }
0x2ab7   :  { %1905 = vrot.lane.b32.xlu0 %v1903_v49, %s5115_s19 }
0x2abb   :  { %1936 = vrot.lane.b32.xlu0 %v5413_v22, %s5115_s19  ;;  %v4730_v22 = vpack.c.bf16 %v3965_v19, %v3964_v54 }
0x2abd   :  { %4731 = vmatprep.subr.bf16.mxu0 %v4730_v22 }
0x2abe   :  { %4733 = vmatpush3.bf16.msra.mxu0 %v4730_v22 }
0x2abf   :  { %4735 = vmatprep.subr.bf16.mxu0 %v4734_v40 }
0x2ac2   :  { %4737 = vmatpush3.bf16.msra.mxu0 %v4734_v40 }
0x2ac3   :  { %4744 = vmatprep.subr.bf16.mxu0 %v5111_v2 }
0x2b29   :  { %v1906_v15 = vpop.permute.xlu0 %1905 }
0x2b2a   :  { %v1908_v52 = vadd.f32 %v1906_v15, %v1898_v51 }
0x2b2c   :  { %4981 = vtanh.f32 %v1908_v52 }
0x2b2d   :  { %v1937_v53 = vpop.permute.xlu0 %1936 }
0x2b2e   :  { %4417 = vmatprep.mubr.msk.f32.mxu0 %vm36_vm0, %v1937_v53 }
0x2b36   :  { %v4982_v62 = vpop.eup %4981 }
0x2b37   :  { %1911 = vrot.lane.b32.xlu1 %v4982_v62, %s5114_s18 }
0x2ba9   :  { %v1912_v0 = vpop.permute.xlu1 %1911 }
0x2baa   :  { %v1914_v1 = vmul.f32 %v4980_v47, %v1912_v0 }
0x2bac   :  { %v1920_v3 = vsel %vm968_vm4, %v1919_v36, %v1914_v1 }
0x2bad   :  { %1938 = vrot.lane.b32.xlu1 %v1920_v3, %s5115_s19 }
0x2c1f   :  { %v1939_v9 = vpop.permute.xlu1 %1938 }
0x2c20   :  { %4418 = vmatmul.mubr.msk.f32.vlgmr.msra.gmra.mrb[18].mxu0 %vm36_vm0, %v1939_v9 }
0x2c21   :  { %4746 = vmatpush3.bf16.msra.mxu0 %v5478_v59  ;;  %4439 = vmatprep.mubr.msk.f32.mxu0 %vm5112_vm1, %v5113_v4 }
0x2c22   :  { %4747 = vmatprep.subr.bf16.mxu0 %v5111_v2 }
0x2c25   :  { %4749 = vmatpush3.bf16.msra.mxu0 %v5487_v61 }
0x2c26   :  { %4756 = vmatprep.subr.bf16.mxu0 %v5111_v2 }
0x2cf3   :  { %v4419_v14 = vpop.f32.mrb[18].mxu0 }
0x2cf4   :  { %v5513_v8 = vadd.f32 %v4419_v14, %v3969_v7  ;;  %v2010_v10 = vpop.f32.mrb[19].mxu0 }
0x2cf5   :  { %v5515_v11 = vadd.f32 %v3969_v7, %v2010_v10 }
0x2cf7   :  { %v2094_v12 = vadd.f32 %v2090_v5, %v5515_v11 }
0x2cf9   :  { %4983 = vtanh.f32 %v2094_v12  ;;  %v3976_v16 = vmul.f32 -1.442695, %v2094_v12 }
0x2cfb   :  { %4985 = vpow2.f32 %v3976_v16 }
0x2d03   :  { %v4984_v13 = vpop.eup %4983 }
0x2d04   :  { %2104 = vrot.lane.b32.xlu0 %v4984_v13, %s5114_s18 }
0x2d05   :  { %v4986_v18 = vpop.eup %4985 }
0x2d06   :  { %v2098_v20 = vadd.f32 1.0, %v4986_v18 }
0x2d08   :  { %4987 = vrcp.f32 %v2098_v20 }
0x2d12   :  { %v4988_v21 = vpop.eup %4987 }
0x2d13   :  { %v2102_v25 = vmul.f32 0.0, %v4988_v21 }
0x2d76   :  { %v2105_v23 = vpop.permute.xlu0 %2104 }
0x2d77   :  { %v2107_v24 = vmul.f32 %v4988_v21, %v2105_v23 }
0x2d79   :  { %2109 = vrot.lane.b32.xlu1 %v2107_v24, %s5115_s19 }
0x2deb   :  { %v2110_v26 = vpop.permute.xlu1 %2109 }
0x2dec   :  { %v2112_v27 = vadd.f32 %v2110_v26, %v2102_v25 }
0x2dee   :  { %4989 = vtanh.f32 %v2112_v27  ;;  %v2206_v43 = vrot.slane %v2112_v27, 6 }
0x2df8   :  { %v4990_v28 = vpop.eup %4989 }
0x2df9   :  { %2115 = vrot.lane.b32.xlu0 %v4990_v28, %s5114_s18 }
0x2e6b   :  { %v2116_v29 = vpop.permute.xlu0 %2115 }
0x2e6c   :  { %v5521_v30 = vmul.f32 %v4988_v21, %v2116_v29 }
0x2e6e   :  { %2120 = vrot.lane.b32.xlu1 %v5521_v30, %s5115_s19 }
0x2ee0   :  { %v2121_v31 = vpop.permute.xlu1 %2120 }
0x2ee1   :  { %4440 = vmatmul.mubr.msk.f32.vlgmr.msra.gmra.mrb[20].mxu0 %vm36_vm0, %v2121_v31 }
0x2ee2   :  { %4758 = vmatpush3.bf16.msra.mxu0 %v5478_v59  ;;  %4461 = vmatprep.mubr.msk.f32.mxu0 %vm5112_vm1, %v5113_v4 }
0x2ee3   :  { %4759 = vmatprep.subr.bf16.mxu0 %v5111_v2 }
0x2ee6   :  { %4761 = vmatpush3.bf16.msra.mxu0 %v5487_v61 }
0x2ee7   :  { %4768 = vmatprep.subr.bf16.mxu0 %v5111_v2 }
0x2fb4   :  { %v2190_v32 = vpop.f32.mrb[20].mxu0 }
0x2fb5   :  { %v2195_v33 = vrot.slane %v2190_v32, 6  ;;  %v4441_v17 = vpop.f32.mrb[21].mxu0 }
0x2fb7   :  { %v2197_v34 = vadd.f32 %v2195_v33, %v5515_v11 }
0x2fb9   :  { %4991 = vtanh.f32 %v2197_v34  ;;  %v3978_v36 = vmul.f32 -1.442695, %v2197_v34 }
0x2fbb   :  { %4993 = vpow2.f32 %v3978_v36 }
0x2fc3   :  { %v4992_v35 = vpop.eup %4991 }
0x2fc4   :  { %2210 = vrot.lane.b32.xlu0 %v4992_v35, %s5114_s18 }
0x2fc5   :  { %v4994_v37 = vpop.eup %4993 }
0x2fc6   :  { %v2201_v38 = vadd.f32 1.0, %v4994_v37 }
0x2fc8   :  { %4995 = vrcp.f32 %v2201_v38 }
0x2fd2   :  { %v4996_v39 = vpop.eup %4995 }
0x2fd3   :  { %v2208_v44 = vmul.f32 %v4996_v39, %v2206_v43 }
0x3036   :  { %v2211_v41 = vpop.permute.xlu0 %2210 }
0x3037   :  { %v2213_v42 = vmul.f32 %v4996_v39, %v2211_v41 }
0x3039   :  { %2215 = vrot.lane.b32.xlu1 %v2213_v42, %s5115_s19 }
0x30ab   :  { %v2216_v45 = vpop.permute.xlu1 %2215 }
0x30ac   :  { %v2218_v46 = vadd.f32 %v2216_v45, %v2208_v44 }
0x30ae   :  { %4997 = vtanh.f32 %v2218_v46  ;;  %v2313_v60 = vrot.slane %v2218_v46, 6 }
0x30b8   :  { %v4998_v47 = vpop.eup %4997 }
0x30b9   :  { %2221 = vrot.lane.b32.xlu0 %v4998_v47, %s5114_s18 }
0x312b   :  { %v2222_v48 = vpop.permute.xlu0 %2221 }
0x312c   :  { %v2224_v49 = vmul.f32 %v4996_v39, %v2222_v48 }
0x312e   :  { %v2226_v50 = vrot.slane %v2224_v49, 2  ;;  %v2863_v5 = vsel %vm964_vm2, %v5521_v30, %v2224_v49 }
0x3130   :  { %2227 = vrot.lane.b32.xlu1 %v2226_v50, %s5115_s19 }
0x31a2   :  { %v2228_v51 = vpop.permute.xlu1 %2227 }
0x31a3   :  { %4451 = vmatmul.mubr.msk.f32.vlgmr.msra.gmra.mrb[20].mxu1 %vm36_vm0, %v2228_v51 }
0x31a4   :  { %4764 = vmatpush3.bf16.msra.mxu1 %v5478_v59  ;;  %4472 = vmatprep.mubr.msk.f32.mxu1 %vm5112_vm1, %v5113_v4 }
0x31a5   :  { %4765 = vmatprep.subr.bf16.mxu1 %v5111_v2 }
0x31a8   :  { %4767 = vmatpush3.bf16.msra.mxu1 %v5487_v61 }
0x31a9   :  { %4774 = vmatprep.subr.bf16.mxu1 %v5111_v2 }
0x3276   :  { %v2297_v15 = vpop.f32.mrb[20].mxu1 }
0x3277   :  { %v2302_v52 = vrot.slane %v2297_v15, 4  ;;  %v4452_v53 = vpop.f32.mrb[21].mxu1 }
0x3279   :  { %v2304_v54 = vadd.f32 %v2302_v52, %v5515_v11 }
0x327b   :  { %4999 = vtanh.f32 %v2304_v54  ;;  %v3980_v55 = vmul.f32 -1.442695, %v2304_v54 }
0x327d   :  { %5001 = vpow2.f32 %v3980_v55 }
0x3285   :  { %v5000_v19 = vpop.eup %4999 }
0x3286   :  { %2317 = vrot.lane.b32.xlu0 %v5000_v19, %s5114_s18 }
0x3287   :  { %v5002_v22 = vpop.eup %5001 }
0x3288   :  { %v2308_v56 = vadd.f32 1.0, %v5002_v22 }
0x328a   :  { %5003 = vrcp.f32 %v2308_v56 }
0x3294   :  { %v5004_v57 = vpop.eup %5003 }
0x3295   :  { %v2315_v63 = vmul.f32 %v5004_v57, %v2313_v60 }
0x32f8   :  { %v2318_v58 = vpop.permute.xlu0 %2317 }
0x32f9   :  { %v2320_v40 = vmul.f32 %v5004_v57, %v2318_v58 }
0x32fb   :  { %2322 = vrot.lane.b32.xlu1 %v2320_v40, %s5115_s19 }
0x336d   :  { %v2323_v62 = vpop.permute.xlu1 %2322 }
0x336e   :  { %v2325_v0 = vadd.f32 %v2323_v62, %v2315_v63 }
0x3370   :  { %5005 = vtanh.f32 %v2325_v0  ;;  %v2420_v27 = vrot.slane %v2325_v0, 6 }
0x337a   :  { %v5006_v1 = vpop.eup %5005 }
0x337b   :  { %2328 = vrot.lane.b32.xlu0 %v5006_v1, %s5114_s18 }
0x33ed   :  { %v2329_v3 = vpop.permute.xlu0 %2328 }
0x33ee   :  { %v2331_v9 = vmul.f32 %v5004_v57, %v2329_v3 }
0x33f0   :  { %v2333_v6 = vrot.slane %v2331_v9, 4  ;;  %v2864_v7 = vsel %vm966_vm3, %v2863_v5, %v2331_v9 }
0x33f2   :  { %2334 = vrot.lane.b32.xlu1 %v2333_v6, %s5115_s19 }
0x3464   :  { %v2335_v14 = vpop.permute.xlu1 %2334 }
0x3465   :  { %4462 = vmatmul.mubr.msk.f32.vlgmr.msra.gmra.mrb[22].mxu0 %vm36_vm0, %v2335_v14 }
0x3466   :  { %4770 = vmatpush3.bf16.msra.mxu0 %v5478_v59  ;;  %4483 = vmatprep.mubr.msk.f32.mxu0 %vm5112_vm1, %v5113_v4 }
0x3467   :  { %4771 = vmatprep.subr.bf16.mxu0 %v5111_v2 }
0x346a   :  { %4773 = vmatpush3.bf16.msra.mxu0 %v5487_v61 }
0x346b   :  { %4780 = vmatprep.subr.bf16.mxu0 %v5111_v2 }
0x3538   :  { %v2404_v10 = vpop.f32.mrb[22].mxu0 }
0x3539   :  { %v2409_v12 = vrot.slane %v2404_v10, 2  ;;  %v4463_v13 = vpop.f32.mrb[23].mxu0 }
0x353b   :  { %v2411_v16 = vadd.f32 %v2409_v12, %v5515_v11 }
0x353d   :  { %5007 = vtanh.f32 %v2411_v16  ;;  %v3982_v20 = vmul.f32 -1.442695, %v2411_v16 }
0x353f   :  { %5009 = vpow2.f32 %v3982_v20 }
0x3547   :  { %v5008_v18 = vpop.eup %5007 }
0x3548   :  { %2424 = vrot.lane.b32.xlu0 %v5008_v18, %s5114_s18 }
0x3549   :  { %v5010_v21 = vpop.eup %5009 }
0x354a   :  { %v2415_v23 = vadd.f32 1.0, %v5010_v21 }
0x354c   :  { %5011 = vrcp.f32 %v2415_v23 }
0x3556   :  { %v5012_v24 = vpop.eup %5011 }
0x3557   :  { %v2422_v28 = vmul.f32 %v5012_v24, %v2420_v27 }
0x35ba   :  { %v2425_v25 = vpop.permute.xlu0 %2424 }
0x35bb   :  { %v2427_v26 = vmul.f32 %v5012_v24, %v2425_v25 }
0x35bd   :  { %2429 = vrot.lane.b32.xlu1 %v2427_v26, %s5115_s19 }
0x362f   :  { %v2430_v29 = vpop.permute.xlu1 %2429 }
0x3630   :  { %v2432_v30 = vadd.f32 %v2430_v29, %v2422_v28 }
0x3632   :  { %5013 = vtanh.f32 %v2432_v30  ;;  %v2524_v46 = vrot.slane %v2432_v30, 6 }
0x363c   :  { %v5014_v11 = vpop.eup %5013 }
0x363d   :  { %2435 = vrot.lane.b32.xlu0 %v5014_v11, %s5114_s18 }
0x36af   :  { %v2436_v31 = vpop.permute.xlu0 %2435 }
0x36b0   :  { %v2438_v32 = vmul.f32 %v5012_v24, %v2436_v31 }
0x36b2   :  { %v2440_v33 = vrot.slane %v2438_v32, 6  ;;  %v5564_v17 = vsel %vm968_vm4, %v2864_v7, %v2438_v32 }
0x36b4   :  { %2441 = vrot.lane.b32.xlu1 %v2440_v33, %s5115_s19 }
0x3726   :  { %v2442_v34 = vpop.permute.xlu1 %2441 }
0x3727   :  { %4473 = vmatmul.mubr.msk.f32.vlgmr.msra.gmra.mrb[22].mxu1 %vm36_vm0, %v2442_v34 }
0x3728   :  { %4776 = vmatpush3.bf16.msra.mxu1 %v5478_v59  ;;  %4494 = vmatprep.mubr.msk.f32.mxu1 %vm5112_vm1, %v5113_v4 }
0x3729   :  { %4777 = vmatprep.subr.bf16.mxu1 %v5111_v2 }
0x372c   :  { %4779 = vmatpush3.bf16.msra.mxu1 %v5487_v61 }
0x37fa   :  { %v2511_v35 = vpop.f32.mrb[22].mxu1 }
0x37fb   :  { %v2515_v36 = vadd.f32 %v2511_v35, %v5513_v8  ;;  %v4474_v37 = vpop.f32.mrb[23].mxu1 }
0x37fd   :  { %5015 = vtanh.f32 %v2515_v36  ;;  %v3984_v39 = vmul.f32 -1.442695, %v2515_v36 }
0x37ff   :  { %5017 = vpow2.f32 %v3984_v39 }
0x3807   :  { %v5016_v38 = vpop.eup %5015 }
0x3808   :  { %2528 = vrot.lane.b32.xlu0 %v5016_v38, %s5114_s18 }
0x3809   :  { %v5018_v41 = vpop.eup %5017 }
0x380a   :  { %v2519_v42 = vadd.f32 1.0, %v5018_v41 }
0x380c   :  { %5019 = vrcp.f32 %v2519_v42 }
0x3816   :  { %v5020_v43 = vpop.eup %5019 }
0x3817   :  { %v2526_v47 = vmul.f32 %v5020_v43, %v2524_v46 }
0x387a   :  { %v2529_v44 = vpop.permute.xlu0 %2528 }
0x387b   :  { %v2531_v45 = vmul.f32 %v5020_v43, %v2529_v44 }
0x387d   :  { %2533 = vrot.lane.b32.xlu1 %v2531_v45, %s5115_s19 }
0x38ef   :  { %v2534_v48 = vpop.permute.xlu1 %2533 }
0x38f0   :  { %v2536_v49 = vadd.f32 %v2534_v48, %v2526_v47 }
0x38f2   :  { %5021 = vtanh.f32 %v2536_v49 }
0x38fc   :  { %v5022_v50 = vpop.eup %5021 }
0x38fd   :  { %2539 = vrot.lane.b32.xlu0 %v5022_v50, %s5114_s18 }
0x396f   :  { %v2540_v51 = vpop.permute.xlu0 %2539 }
0x3970   :  { %v5577_v15 = vmul.f32 %v5020_v43, %v2540_v51  ;;  %v3991_v51 = vld [vmem:[%s5784_s1 + $0x60] sm:$0xff] }
0x3972   :  { %2544 = vrot.lane.b32.xlu1 %v5577_v15, %s5115_s19 }
0x39e4   :  { %v2545_v52 = vpop.permute.xlu1 %2544 }
0x39e5   :  { %4484 = vmatmul.mubr.msk.f32.vlgmr.msra.gmra.mrb[24].mxu0 %vm36_vm0, %v2545_v52  ;;  %v3999_v52 = vld [vmem:[%s5785_s2 + $0x60] sm:$0xff] }
0x39e6   :  { %4782 = vmatpush3.bf16.msra.mxu0 %v5478_v59  ;;  %4505 = vmatprep.mubr.msk.f32.mxu0 %vm5112_vm1, %v5113_v4 }
0x39e7   :  { %4783 = vmatprep.subr.bf16.mxu0 %v5111_v2 }
0x39ea   :  { %4785 = vmatpush3.bf16.msra.mxu0 %v5487_v61  ;;  %v2630_v61 = vrot.slane %v2536_v49, 6 }
0x39eb   :  { %4794 = vmatprep.subr.bf16.mxu0 %v5111_v2 }
0x3ab8   :  { %v2614_v53 = vpop.f32.mrb[24].mxu0 }
0x3ab9   :  { %v2619_v54 = vrot.slane %v2614_v53, 6  ;;  %v4485_v19 = vpop.f32.mrb[25].mxu0  ;;  %v4000_v53 = vld [vmem:[%s5785_s2 + $0x68] sm:$0xff] }
0x3aba   :  { %v3994_v19 = vld [vmem:[%s5784_s1 + $0x78] sm:$0xff] }
0x3abb   :  { %v2621_v55 = vadd.f32 %v2619_v54, %v5513_v8  ;;  %v3993_v54 = vld [vmem:[%s5784_s1 + $0x70] sm:$0xff] }
0x3abd   :  { %5023 = vtanh.f32 %v2621_v55  ;;  %v3986_v56 = vmul.f32 -1.442695, %v2621_v55  ;;  %v5629_v55 = vpack.c.bf16 %v4000_v53, %v3999_v52 }
0x3abf   :  { %5025 = vpow2.f32 %v3986_v56  ;;  %v4001_v56 = vld [vmem:[%s5785_s2 + $0x70] sm:$0xff] }
0x3ac7   :  { %v5024_v22 = vpop.eup %5023 }
0x3ac8   :  { %2634 = vrot.lane.b32.xlu0 %v5024_v22, %s5114_s18  ;;  %v4790_v22 = vpack.c.bf16 %v3994_v19, %v3993_v54 }
0x3ac9   :  { %v5026_v59 = vpop.eup %5025 }
0x3aca   :  { %v2625_v57 = vadd.f32 1.0, %v5026_v59  ;;  %v4002_v59 = vld [vmem:[%s5785_s2 + $0x78] sm:$0xff] }
0x3acc   :  { %5027 = vrcp.f32 %v2625_v57  ;;  %v5638_v57 = vpack.c.bf16 %v4002_v59, %v4001_v56 }
0x3ad6   :  { %v5028_v58 = vpop.eup %5027 }
0x3ad7   :  { %v2632_v63 = vmul.f32 %v5028_v58, %v2630_v61 }
0x3b3a   :  { %v2635_v40 = vpop.permute.xlu0 %2634 }
0x3b3b   :  { %v2637_v60 = vmul.f32 %v5028_v58, %v2635_v40 }
0x3b3d   :  { %2639 = vrot.lane.b32.xlu1 %v2637_v60, %s5115_s19 }
0x3baf   :  { %v2640_v62 = vpop.permute.xlu1 %2639 }
0x3bb0   :  { %v2642_v0 = vadd.f32 %v2640_v62, %v2632_v63 }
0x3bb2   :  { %5029 = vtanh.f32 %v2642_v0  ;;  %v2737_v25 = vrot.slane %v2642_v0, 6 }
0x3bbc   :  { %v5030_v1 = vpop.eup %5029 }
0x3bbd   :  { %2645 = vrot.lane.b32.xlu0 %v5030_v1, %s5114_s18  ;;  %v3996_v1 = vld [vmem:[%s5787_s3 + $0x3] ss:$0 sm:$0xff] }
0x3c2f   :  { %v2646_v3 = vpop.permute.xlu0 %2645 }
0x3c30   :  { %v2648_v9 = vmul.f32 %v5028_v58, %v2646_v3 }
0x3c32   :  { %v2650_v5 = vrot.slane %v2648_v9, 2  ;;  %v2866_v31 = vsel %vm964_vm2, %v5577_v15, %v2648_v9  ;;  %v3992_v15 = vld [vmem:[%s5784_s1 + $0x68] sm:$0xff] }
0x3c34   :  { %2651 = vrot.lane.b32.xlu1 %v2650_v5, %s5115_s19 }
0x3ca6   :  { %v2652_v6 = vpop.permute.xlu1 %2651 }
0x3ca7   :  { %4495 = vmatmul.mubr.msk.f32.vlgmr.msra.gmra.mrb[24].mxu1 %vm36_vm0, %v2652_v6 }
0x3d7a   :  { %v2721_v7 = vpop.f32.mrb[24].mxu1 }
0x3d7b   :  { %v2726_v14 = vrot.slane %v2721_v7, 4  ;;  %v4496_v10 = vpop.f32.mrb[25].mxu1 }
0x3d7d   :  { %v2728_v12 = vadd.f32 %v2726_v14, %v5513_v8 }
0x3d7f   :  { %5031 = vtanh.f32 %v2728_v12  ;;  %v3988_v16 = vmul.f32 -1.442695, %v2728_v12 }
0x3d81   :  { %5033 = vpow2.f32 %v3988_v16 }
0x3d89   :  { %v5032_v13 = vpop.eup %5031 }
0x3d8a   :  { %2741 = vrot.lane.b32.xlu0 %v5032_v13, %s5114_s18 }
0x3d8b   :  { %v5034_v18 = vpop.eup %5033 }
0x3d8c   :  { %v2732_v20 = vadd.f32 1.0, %v5034_v18 }
0x3d8e   :  { %5035 = vrcp.f32 %v2732_v20 }
0x3d98   :  { %v5036_v21 = vpop.eup %5035 }
0x3d99   :  { %v2739_v26 = vmul.f32 %v5036_v21, %v2737_v25 }
0x3dfc   :  { %v2742_v23 = vpop.permute.xlu0 %2741 }
0x3dfd   :  { %v2744_v24 = vmul.f32 %v5036_v21, %v2742_v23 }
0x3dff   :  { %2746 = vrot.lane.b32.xlu1 %v2744_v24, %s5115_s19 }
0x3e71   :  { %v2747_v27 = vpop.permute.xlu1 %2746 }
0x3e72   :  { %v2749_v28 = vadd.f32 %v2747_v27, %v2739_v26 }
0x3e74   :  { %5037 = vtanh.f32 %v2749_v28  ;;  %v2844_v47 = vrot.slane %v2749_v28, 6 }
0x3e7e   :  { %v5038_v29 = vpop.eup %5037 }
0x3e7f   :  { %2752 = vrot.lane.b32.xlu0 %v5038_v29, %s5114_s18 }
0x3ef1   :  { %v2753_v30 = vpop.permute.xlu0 %2752 }
0x3ef2   :  { %v2755_v11 = vmul.f32 %v5036_v21, %v2753_v30 }
0x3ef4   :  { %v2757_v32 = vrot.slane %v2755_v11, 4  ;;  %v2867_v33 = vsel %vm966_vm3, %v2866_v31, %v2755_v11 }
0x3ef6   :  { %2758 = vrot.lane.b32.xlu1 %v2757_v32, %s5115_s19 }
0x3f68   :  { %v2759_v34 = vpop.permute.xlu1 %2758 }
0x3f69   :  { %4506 = vmatmul.mubr.msk.f32.vlgmr.msra.gmra.mrb[26].mxu0 %vm36_vm0, %v2759_v34 }
0x3f6a   :  { %4527 = vmatprep.mubr.msk.f32.mxu0 %vm5112_vm1, %v5113_v4  ;;  %4796 = vmatpush3.bf16.msra.mxu0 %v5629_v55 }
0x3f6b   :  { %4797 = vmatprep.subr.bf16.mxu0 %v5111_v2 }
0x3f6e   :  { %4799 = vmatpush3.bf16.msra.mxu0 %v5638_v57 }
0x3f6f   :  { %4806 = vmatprep.subr.bf16.mxu0 %v5111_v2 }
0x3f71   :  { %4528 = vmatmul.mubr.f32.vlgmr.msra.gmra.mrb[28].mxu0 %v5113_v4 }
0x3f72   :  { %4808 = vmatpush3.bf16.msra.mxu0 %v5629_v55  ;;  %4549 = vmatprep.mubr.msk.f32.mxu0 %vm5112_vm1, %v5113_v4 }
0x3f73   :  { %4809 = vmatprep.subr.bf16.mxu0 %v5111_v2 }
0x3f76   :  { %4811 = vmatpush3.bf16.msra.mxu0 %v5638_v57 }
0x3f77   :  { %4818 = vmatprep.subr.bf16.mxu0 %v5111_v2 }
0x403c   :  { %v2828_v35 = vpop.f32.mrb[26].mxu0 }
0x403d   :  { %v2833_v36 = vrot.slane %v2828_v35, 2  ;;  %v4507_v37 = vpop.f32.mrb[27].mxu0 }
0x403f   :  { %v2835_v38 = vadd.f32 %v2833_v36, %v5513_v8 }
0x4041   :  { %5039 = vtanh.f32 %v2835_v38  ;;  %v3990_v41 = vmul.f32 -1.442695, %v2835_v38 }
0x4043   :  { %5041 = vpow2.f32 %v3990_v41 }
0x4044   :  { %v3038_v62 = vpop.f32.mrb[28].mxu0 }
0x4045   :  { %v4529_v0 = vpop.f32.mrb[29].mxu0 }
0x404b   :  { %v5040_v39 = vpop.eup %5039 }
0x404c   :  { %2848 = vrot.lane.b32.xlu0 %v5040_v39, %s5114_s18 }
0x404d   :  { %v5042_v42 = vpop.eup %5041 }
0x404e   :  { %v2839_v43 = vadd.f32 1.0, %v5042_v42 }
0x4050   :  { %5043 = vrcp.f32 %v2839_v43 }
0x405a   :  { %v5044_v44 = vpop.eup %5043 }
0x405b   :  { %v2846_v48 = vmul.f32 %v5044_v44, %v2844_v47 }
0x40be   :  { %v2849_v45 = vpop.permute.xlu0 %2848 }
0x40bf   :  { %v2851_v46 = vmul.f32 %v5044_v44, %v2849_v45 }
0x40c1   :  { %2853 = vrot.lane.b32.xlu1 %v2851_v46, %s5115_s19 }
0x40c5   :  { %2884 = vrot.lane.b32.xlu1 %v5564_v17, %s5115_s19  ;;  %v4786_v17 = vpack.c.bf16 %v3992_v15, %v3991_v51 }
0x40c7   :  { %4787 = vmatprep.subr.bf16.mxu1 %v4786_v17 }
0x40c8   :  { %4789 = vmatpush3.bf16.msra.mxu1 %v4786_v17 }
0x40c9   :  { %4791 = vmatprep.subr.bf16.mxu1 %v4790_v22 }
0x40cc   :  { %4793 = vmatpush3.bf16.msra.mxu1 %v4790_v22 }
0x40cd   :  { %4800 = vmatprep.subr.bf16.mxu1 %v5111_v2 }
0x4133   :  { %v2854_v8 = vpop.permute.xlu1 %2853 }
0x4134   :  { %v2856_v49 = vadd.f32 %v2854_v8, %v2846_v48 }
0x4136   :  { %5045 = vtanh.f32 %v2856_v49 }
0x4137   :  { %v2885_v50 = vpop.permute.xlu1 %2884 }
0x4138   :  { %4516 = vmatprep.mubr.msk.f32.mxu1 %vm36_vm0, %v2885_v50 }
0x4140   :  { %v5046_v58 = vpop.eup %5045 }
0x4141   :  { %2859 = vrot.lane.b32.xlu0 %v5046_v58, %s5114_s18 }
0x41b3   :  { %v2860_v40 = vpop.permute.xlu0 %2859 }
0x41b4   :  { %v2862_v60 = vmul.f32 %v5044_v44, %v2860_v40 }
0x41b6   :  { %v2868_v61 = vsel %vm968_vm4, %v2867_v33, %v2862_v60 }
0x41b7   :  { %2886 = vrot.lane.b32.xlu0 %v2868_v61, %s5115_s19 }
0x4229   :  { %v2887_v63 = vpop.permute.xlu0 %2886 }
0x422a   :  { %4517 = vmatmul.mubr.msk.f32.vlgmr.msra.gmra.mrb[26].mxu1 %vm36_vm0, %v2887_v63 }
0x422b   :  { %4802 = vmatpush3.bf16.msra.mxu1 %v5629_v55  ;;  %4538 = vmatprep.mubr.msk.f32.mxu1 %vm5112_vm1, %v5113_v4 }
0x422c   :  { %4803 = vmatprep.subr.bf16.mxu1 %v5111_v2 }
0x422f   :  { %4805 = vmatpush3.bf16.msra.mxu1 %v5638_v57 }
0x4230   :  { %4812 = vmatprep.subr.bf16.mxu1 %v5111_v2 }
0x42fd   :  { %v4518_v3 = vpop.f32.mrb[26].mxu1 }
0x42fe   :  { %v5664_v9 = vadd.f32 %v4518_v3, %v3996_v1  ;;  %v2958_v5 = vpop.f32.mrb[27].mxu1 }
0x42ff   :  { %v5666_v6 = vadd.f32 %v3996_v1, %v2958_v5 }
0x4301   :  { %v3042_v7 = vadd.f32 %v3038_v62, %v5666_v6 }
0x4303   :  { %5047 = vtanh.f32 %v3042_v7  ;;  %v4003_v10 = vmul.f32 -1.442695, %v3042_v7 }
0x4305   :  { %5049 = vpow2.f32 %v4003_v10 }
0x430d   :  { %v5048_v14 = vpop.eup %5047 }
0x430e   :  { %3052 = vrot.lane.b32.xlu1 %v5048_v14, %s5114_s18 }
0x430f   :  { %v5050_v12 = vpop.eup %5049 }
0x4310   :  { %v3046_v13 = vadd.f32 1.0, %v5050_v12 }
0x4312   :  { %5051 = vrcp.f32 %v3046_v13 }
0x431c   :  { %v5052_v16 = vpop.eup %5051 }
0x431d   :  { %v3050_v21 = vmul.f32 0.0, %v5052_v16 }
0x4380   :  { %v3053_v18 = vpop.permute.xlu1 %3052 }
0x4381   :  { %v3055_v20 = vmul.f32 %v5052_v16, %v3053_v18 }
0x4383   :  { %3057 = vrot.lane.b32.xlu0 %v3055_v20, %s5115_s19 }
0x43f5   :  { %v3058_v23 = vpop.permute.xlu0 %3057 }
0x43f6   :  { %v3060_v24 = vadd.f32 %v3058_v23, %v3050_v21 }
0x43f8   :  { %5053 = vtanh.f32 %v3060_v24  ;;  %v3154_v39 = vrot.slane %v3060_v24, 6 }
0x4402   :  { %v5054_v25 = vpop.eup %5053 }
0x4403   :  { %3063 = vrot.lane.b32.xlu1 %v5054_v25, %s5114_s18 }
0x4475   :  { %v3064_v26 = vpop.permute.xlu1 %3063 }
0x4476   :  { %v5672_v27 = vmul.f32 %v5052_v16, %v3064_v26 }
0x4478   :  { %3068 = vrot.lane.b32.xlu0 %v5672_v27, %s5115_s19 }
0x44ea   :  { %v3069_v28 = vpop.permute.xlu0 %3068 }
0x44eb   :  { %4539 = vmatmul.mubr.msk.f32.vlgmr.msra.gmra.mrb[28].mxu1 %vm36_vm0, %v3069_v28 }
0x44ec   :  { %4814 = vmatpush3.bf16.msra.mxu1 %v5629_v55  ;;  %4560 = vmatprep.mubr.msk.f32.mxu1 %vm5112_vm1, %v5113_v4 }
0x44ed   :  { %4815 = vmatprep.subr.bf16.mxu1 %v5111_v2 }
0x44f0   :  { %4817 = vmatpush3.bf16.msra.mxu1 %v5638_v57 }
0x44f1   :  { %4824 = vmatprep.subr.bf16.mxu1 %v5111_v2 }
0x45be   :  { %v3138_v29 = vpop.f32.mrb[28].mxu1 }
0x45bf   :  { %v3143_v30 = vrot.slane %v3138_v29, 6  ;;  %v4540_v11 = vpop.f32.mrb[29].mxu1 }
0x45c1   :  { %v3145_v31 = vadd.f32 %v3143_v30, %v5666_v6 }
0x45c3   :  { %5055 = vtanh.f32 %v3145_v31  ;;  %v4005_v33 = vmul.f32 -1.442695, %v3145_v31 }
0x45c5   :  { %5057 = vpow2.f32 %v4005_v33 }
0x45cd   :  { %v5056_v32 = vpop.eup %5055 }
0x45ce   :  { %3158 = vrot.lane.b32.xlu1 %v5056_v32, %s5114_s18 }
0x45cf   :  { %v5058_v34 = vpop.eup %5057 }
0x45d0   :  { %v3149_v35 = vadd.f32 1.0, %v5058_v34 }
0x45d2   :  { %5059 = vrcp.f32 %v3149_v35 }
0x45dc   :  { %v5060_v36 = vpop.eup %5059 }
0x45dd   :  { %v3156_v41 = vmul.f32 %v5060_v36, %v3154_v39 }
0x4640   :  { %v3159_v37 = vpop.permute.xlu1 %3158 }
0x4641   :  { %v3161_v38 = vmul.f32 %v5060_v36, %v3159_v37 }
0x4643   :  { %3163 = vrot.lane.b32.xlu0 %v3161_v38, %s5115_s19 }
0x46b5   :  { %v3164_v42 = vpop.permute.xlu0 %3163 }
0x46b6   :  { %v3166_v43 = vadd.f32 %v3164_v42, %v3156_v41 }
0x46b8   :  { %5061 = vtanh.f32 %v3166_v43  ;;  %v3261_v56 = vrot.slane %v3166_v43, 6 }
0x46c2   :  { %v5062_v44 = vpop.eup %5061 }
0x46c3   :  { %3169 = vrot.lane.b32.xlu1 %v5062_v44, %s5114_s18 }
0x4735   :  { %v3170_v45 = vpop.permute.xlu1 %3169 }
0x4736   :  { %v3172_v46 = vmul.f32 %v5060_v36, %v3170_v45 }
0x4738   :  { %v3174_v47 = vrot.slane %v3172_v46, 2  ;;  %v3811_v62 = vsel %vm964_vm2, %v5672_v27, %v3172_v46 }
0x473a   :  { %3175 = vrot.lane.b32.xlu0 %v3174_v47, %s5115_s19 }
0x47ac   :  { %v3176_v48 = vpop.permute.xlu0 %3175 }
0x47ad   :  { %4550 = vmatmul.mubr.msk.f32.vlgmr.msra.gmra.mrb[30].mxu0 %vm36_vm0, %v3176_v48 }
0x47ae   :  { %4820 = vmatpush3.bf16.msra.mxu0 %v5629_v55  ;;  %4571 = vmatprep.mubr.msk.f32.mxu0 %vm5112_vm1, %v5113_v4 }
0x47af   :  { %4821 = vmatprep.subr.bf16.mxu0 %v5111_v2 }
0x47b2   :  { %4823 = vmatpush3.bf16.msra.mxu0 %v5638_v57 }
0x47b3   :  { %4830 = vmatprep.subr.bf16.mxu0 %v5111_v2 }
0x4880   :  { %v3245_v8 = vpop.f32.mrb[30].mxu0 }
0x4881   :  { %v3250_v49 = vrot.slane %v3245_v8, 4  ;;  %v4551_v50 = vpop.f32.mrb[31].mxu0 }
0x4883   :  { %v3252_v51 = vadd.f32 %v3250_v49, %v5666_v6 }
0x4885   :  { %5063 = vtanh.f32 %v3252_v51  ;;  %v4007_v52 = vmul.f32 -1.442695, %v3252_v51 }
0x4887   :  { %5065 = vpow2.f32 %v4007_v52 }
0x488f   :  { %v5064_v15 = vpop.eup %5063 }
0x4890   :  { %3265 = vrot.lane.b32.xlu1 %v5064_v15, %s5114_s18 }
0x4891   :  { %v5066_v17 = vpop.eup %5065 }
0x4892   :  { %v3256_v53 = vadd.f32 1.0, %v5066_v17 }
0x4894   :  { %5067 = vrcp.f32 %v3256_v53 }
0x489e   :  { %v5068_v54 = vpop.eup %5067 }
0x489f   :  { %v3263_v59 = vmul.f32 %v5068_v54, %v3261_v56 }
0x4902   :  { %v3266_v19 = vpop.permute.xlu1 %3265 }
0x4903   :  { %v3268_v22 = vmul.f32 %v5068_v54, %v3266_v19 }
0x4905   :  { %3270 = vrot.lane.b32.xlu0 %v3268_v22, %s5115_s19 }
0x4977   :  { %v3271_v58 = vpop.permute.xlu0 %3270 }
0x4978   :  { %v3273_v40 = vadd.f32 %v3271_v58, %v3263_v59 }
0x497a   :  { %5069 = vtanh.f32 %v3273_v40  ;;  %v3368_v24 = vrot.slane %v3273_v40, 6 }
0x4984   :  { %v5070_v60 = vpop.eup %5069 }
0x4985   :  { %3276 = vrot.lane.b32.xlu1 %v5070_v60, %s5114_s18 }
0x49f7   :  { %v3277_v61 = vpop.permute.xlu1 %3276 }
0x49f8   :  { %v3279_v63 = vmul.f32 %v5068_v54, %v3277_v61 }
0x49fa   :  { %v3281_v0 = vrot.slane %v3279_v63, 4  ;;  %v3812_v1 = vsel %vm966_vm3, %v3811_v62, %v3279_v63 }
0x49fc   :  { %3282 = vrot.lane.b32.xlu0 %v3281_v0, %s5115_s19 }
0x4a6e   :  { %v3283_v3 = vpop.permute.xlu0 %3282 }
0x4a6f   :  { %4561 = vmatmul.mubr.msk.f32.vlgmr.msra.gmra.mrb[30].mxu1 %vm36_vm0, %v3283_v3 }
0x4a70   :  { %4826 = vmatpush3.bf16.msra.mxu1 %v5629_v55  ;;  %4582 = vmatprep.mubr.msk.f32.mxu1 %vm5112_vm1, %v5113_v4 }
0x4a71   :  { %4827 = vmatprep.subr.bf16.mxu1 %v5111_v2 }
0x4a74   :  { %4829 = vmatpush3.bf16.msra.mxu1 %v5638_v57 }
0x4a75   :  { %4836 = vmatprep.subr.bf16.mxu1 %v5111_v2 }
0x4b42   :  { %v3352_v5 = vpop.f32.mrb[30].mxu1 }
0x4b43   :  { %v3357_v7 = vrot.slane %v3352_v5, 2  ;;  %v4562_v14 = vpop.f32.mrb[31].mxu1 }
0x4b45   :  { %v3359_v10 = vadd.f32 %v3357_v7, %v5666_v6 }
0x4b47   :  { %5071 = vtanh.f32 %v3359_v10  ;;  %v4009_v13 = vmul.f32 -1.442695, %v3359_v10 }
0x4b49   :  { %5073 = vpow2.f32 %v4009_v13 }
0x4b51   :  { %v5072_v12 = vpop.eup %5071 }
0x4b52   :  { %3372 = vrot.lane.b32.xlu1 %v5072_v12, %s5114_s18 }
0x4b53   :  { %v5074_v16 = vpop.eup %5073 }
0x4b54   :  { %v3363_v18 = vadd.f32 1.0, %v5074_v16 }
0x4b56   :  { %5075 = vrcp.f32 %v3363_v18 }
0x4b60   :  { %v5076_v20 = vpop.eup %5075 }
0x4b61   :  { %v3370_v25 = vmul.f32 %v5076_v20, %v3368_v24 }
0x4bc4   :  { %v3373_v21 = vpop.permute.xlu1 %3372 }
0x4bc5   :  { %v3375_v23 = vmul.f32 %v5076_v20, %v3373_v21 }
0x4bc7   :  { %3377 = vrot.lane.b32.xlu0 %v3375_v23, %s5115_s19 }
0x4c39   :  { %v3378_v26 = vpop.permute.xlu0 %3377 }
0x4c3a   :  { %v3380_v27 = vadd.f32 %v3378_v26, %v3370_v25 }
0x4c3c   :  { %5077 = vtanh.f32 %v3380_v27  ;;  %v3472_v43 = vrot.slane %v3380_v27, 6 }
0x4c46   :  { %v5078_v6 = vpop.eup %5077 }
0x4c47   :  { %3383 = vrot.lane.b32.xlu1 %v5078_v6, %s5114_s18 }
0x4cb9   :  { %v3384_v28 = vpop.permute.xlu1 %3383 }
0x4cba   :  { %v3386_v29 = vmul.f32 %v5076_v20, %v3384_v28 }
0x4cbc   :  { %v3388_v30 = vrot.slane %v3386_v29, 6  ;;  %v5715_v11 = vsel %vm968_vm4, %v3812_v1, %v3386_v29 }
0x4cbe   :  { %3389 = vrot.lane.b32.xlu0 %v3388_v30, %s5115_s19 }
0x4d30   :  { %v3390_v31 = vpop.permute.xlu0 %3389 }
0x4d31   :  { %4572 = vmatmul.mubr.msk.f32.vlgmr.msra.gmra.mrb[32].mxu0 %vm36_vm0, %v3390_v31 }
0x4d32   :  { %4832 = vmatpush3.bf16.msra.mxu0 %v5629_v55  ;;  %4593 = vmatprep.mubr.msk.f32.mxu0 %vm5112_vm1, %v5113_v4 }
0x4d33   :  { %4833 = vmatprep.subr.bf16.mxu0 %v5111_v2 }
0x4d36   :  { %4835 = vmatpush3.bf16.msra.mxu0 %v5638_v57 }
0x4e04   :  { %v3459_v32 = vpop.f32.mrb[32].mxu0 }
0x4e05   :  { %v3463_v33 = vadd.f32 %v3459_v32, %v5664_v9  ;;  %v4573_v34 = vpop.f32.mrb[33].mxu0 }
0x4e07   :  { %5079 = vtanh.f32 %v3463_v33  ;;  %v4011_v36 = vmul.f32 -1.442695, %v3463_v33 }
0x4e09   :  { %5081 = vpow2.f32 %v4011_v36 }
0x4e11   :  { %v5080_v35 = vpop.eup %5079 }
0x4e12   :  { %3476 = vrot.lane.b32.xlu1 %v5080_v35, %s5114_s18 }
0x4e13   :  { %v5082_v37 = vpop.eup %5081 }
0x4e14   :  { %v3467_v38 = vadd.f32 1.0, %v5082_v37 }
0x4e16   :  { %5083 = vrcp.f32 %v3467_v38 }
0x4e20   :  { %v5084_v39 = vpop.eup %5083 }
0x4e21   :  { %v3474_v44 = vmul.f32 %v5084_v39, %v3472_v43 }
0x4e84   :  { %v3477_v41 = vpop.permute.xlu1 %3476 }
0x4e85   :  { %v3479_v42 = vmul.f32 %v5084_v39, %v3477_v41 }
0x4e87   :  { %3481 = vrot.lane.b32.xlu0 %v3479_v42, %s5115_s19 }
0x4ef9   :  { %v3482_v45 = vpop.permute.xlu0 %3481 }
0x4efa   :  { %v3484_v46 = vadd.f32 %v3482_v45, %v3474_v44 }
0x4efc   :  { %5085 = vtanh.f32 %v3484_v46 }
0x4f06   :  { %v5086_v47 = vpop.eup %5085 }
0x4f07   :  { %3487 = vrot.lane.b32.xlu1 %v5086_v47, %s5114_s18  ;;  %v3818_v47 = vld [vmem:[%s5788_s4 + $0x8] sm:$0xff] }
0x4f79   :  { %v3488_v48 = vpop.permute.xlu1 %3487 }
0x4f7a   :  { %v5728_v8 = vmul.f32 %v5084_v39, %v3488_v48 }
0x4f7c   :  { %3492 = vrot.lane.b32.xlu0 %v5728_v8, %s5115_s19 }
0x4fee   :  { %v3493_v49 = vpop.permute.xlu0 %3492 }
0x4fef   :  { %4583 = vmatmul.mubr.msk.f32.vlgmr.msra.gmra.mrb[32].mxu1 %vm36_vm0, %v3493_v49 }
0x4ff0   :  { %4838 = vmatpush3.bf16.msra.mxu1 %v5629_v55  ;;  %4604 = vmatprep.mubr.msk.f32.mxu1 %vm5112_vm1, %v5113_v4 }
0x4ff1   :  { %4839 = vmatprep.subr.bf16.mxu1 %v5111_v2  ;;  %v3578_v2 = vrot.slane %v3484_v46, 6  ;;  %v3817_v46 = vld [vmem:[%s5788_s4] sm:$0xff] }
0x4ff2   :  { %v4842_v48 = vpack.c.bf16 %v3818_v47, %v3817_v46 }
0x4ff4   :  { %4841 = vmatpush3.bf16.msra.mxu1 %v5638_v57  ;;  %4843 = vmatprep.subr.bf16.mxu0 %v4842_v48 }
0x50c2   :  { %v3562_v50 = vpop.f32.mrb[32].mxu1 }
0x50c3   :  { %v3567_v51 = vrot.slane %v3562_v50, 6  ;;  %v4584_v15 = vpop.f32.mrb[33].mxu1 }
0x50c5   :  { %v3569_v52 = vadd.f32 %v3567_v51, %v5664_v9 }
0x50c7   :  { %5087 = vtanh.f32 %v3569_v52  ;;  %v4013_v53 = vmul.f32 -1.442695, %v3569_v52 }
0x50c9   :  { %5089 = vpow2.f32 %v4013_v53  ;;  %v4018_v53 = vld [vmem:[%s5789_s5] ss:$0 sm:$0xff] }
0x50d1   :  { %v5088_v17 = vpop.eup %5087 }
0x50d2   :  { %3582 = vrot.lane.b32.xlu1 %v5088_v17, %s5114_s18 }
0x50d3   :  { %v5090_v54 = vpop.eup %5089 }
0x50d4   :  { %v3573_v55 = vadd.f32 1.0, %v5090_v54 }
0x50d6   :  { %5091 = vrcp.f32 %v3573_v55 }
0x50e0   :  { %v5092_v19 = vpop.eup %5091 }
0x50e1   :  { %v3580_v57 = vmul.f32 %v5092_v19, %v3578_v2 }
0x5144   :  { %v3583_v4 = vpop.permute.xlu1 %3582 }
0x5145   :  { %v3585_v22 = vmul.f32 %v5092_v19, %v3583_v4 }
0x5147   :  { %3587 = vrot.lane.b32.xlu0 %v3585_v22, %s5115_s19 }
0x51b9   :  { %v3588_v56 = vpop.permute.xlu0 %3587 }
0x51ba   :  { %v3590_v59 = vadd.f32 %v3588_v56, %v3580_v57 }
0x51bc   :  { %5093 = vtanh.f32 %v3590_v59  ;;  %v3685_v18 = vrot.slane %v3590_v59, 6 }
0x51c6   :  { %v5094_v58 = vpop.eup %5093 }
0x51c7   :  { %3593 = vrot.lane.b32.xlu1 %v5094_v58, %s5114_s18 }
0x5239   :  { %v3594_v40 = vpop.permute.xlu1 %3593 }
0x523a   :  { %v3596_v60 = vmul.f32 %v5092_v19, %v3594_v40 }
0x523c   :  { %v3598_v61 = vrot.slane %v3596_v60, 2  ;;  %v3814_v27 = vsel %vm964_vm2, %v5728_v8, %v3596_v60  ;;  %v3820_v8 = vld [vmem:[%s5788_s4 + $0x18] sm:$0xff] }
0x523e   :  { %3599 = vrot.lane.b32.xlu0 %v3598_v61, %s5115_s19 }
0x52b0   :  { %v3600_v63 = vpop.permute.xlu0 %3599 }
0x52b1   :  { %4594 = vmatmul.mubr.msk.f32.vlgmr.msra.gmra.mrb[34].mxu0 %vm36_vm0, %v3600_v63 }
0x52b2   :  { %4845 = vmatpush3.bf16.msra.mxu0 %v4842_v48 }
0x5384   :  { %v3669_v62 = vpop.f32.mrb[34].mxu0 }
0x5385   :  { %v3674_v0 = vrot.slane %v3669_v62, 4  ;;  %v4595_v1 = vpop.f32.mrb[35].mxu0 }
0x5387   :  { %v3676_v3 = vadd.f32 %v3674_v0, %v5664_v9 }
0x5389   :  { %5095 = vtanh.f32 %v3676_v3  ;;  %v4015_v7 = vmul.f32 -1.442695, %v3676_v3 }
0x538b   :  { %5097 = vpow2.f32 %v4015_v7 }
0x5393   :  { %v5096_v5 = vpop.eup %5095 }
0x5394   :  { %3689 = vrot.lane.b32.xlu1 %v5096_v5, %s5114_s18 }
0x5395   :  { %v5098_v14 = vpop.eup %5097 }
0x5396   :  { %v3680_v10 = vadd.f32 1.0, %v5098_v14 }
0x5398   :  { %5099 = vrcp.f32 %v3680_v10 }
0x53a2   :  { %v5100_v12 = vpop.eup %5099 }
0x53a3   :  { %v3687_v20 = vmul.f32 %v5100_v12, %v3685_v18 }
0x5406   :  { %v3690_v13 = vpop.permute.xlu1 %3689 }
0x5407   :  { %v3692_v16 = vmul.f32 %v5100_v12, %v3690_v13 }
0x5409   :  { %3694 = vrot.lane.b32.xlu0 %v3692_v16, %s5115_s19 }
0x547b   :  { %v3695_v21 = vpop.permute.xlu0 %3694 }
0x547c   :  { %v3697_v23 = vadd.f32 %v3695_v21, %v3687_v20 }
0x547e   :  { %5101 = vtanh.f32 %v3697_v23  ;;  %v3792_v42 = vrot.slane %v3697_v23, 6 }
0x5488   :  { %v5102_v24 = vpop.eup %5101 }
0x5489   :  { %3700 = vrot.lane.b32.xlu1 %v5102_v24, %s5114_s18 }
0x54fb   :  { %v3701_v25 = vpop.permute.xlu1 %3700 }
0x54fc   :  { %v3703_v26 = vmul.f32 %v5100_v12, %v3701_v25 }
0x54fe   :  { %v3705_v6 = vrot.slane %v3703_v26, 4  ;;  %v3815_v28 = vsel %vm966_vm3, %v3814_v27, %v3703_v26 }
0x5500   :  { %3706 = vrot.lane.b32.xlu0 %v3705_v6, %s5115_s19 }
0x5572   :  { %v3707_v29 = vpop.permute.xlu0 %3706 }
0x5573   :  { %4605 = vmatmul.mubr.msk.f32.vlgmr.msra.gmra.mrb[34].mxu1 %vm36_vm0, %v3707_v29 }
0x5646   :  { %v3776_v30 = vpop.f32.mrb[34].mxu1 }
0x5647   :  { %v3781_v31 = vrot.slane %v3776_v30, 2  ;;  %v4606_v32 = vpop.f32.mrb[35].mxu1 }
0x5649   :  { %v3783_v33 = vadd.f32 %v3781_v31, %v5664_v9 }
0x564b   :  { %5103 = vtanh.f32 %v3783_v33  ;;  %v4017_v35 = vmul.f32 -1.442695, %v3783_v33 }
0x564d   :  { %5105 = vpow2.f32 %v4017_v35 }
0x5655   :  { %v5104_v34 = vpop.eup %5103 }
0x5656   :  { %3796 = vrot.lane.b32.xlu1 %v5104_v34, %s5114_s18 }
0x5657   :  { %v5106_v36 = vpop.eup %5105 }
0x5658   :  { %v3787_v37 = vadd.f32 1.0, %v5106_v36 }
0x565a   :  { %5107 = vrcp.f32 %v3787_v37 }
0x5664   :  { %v5108_v38 = vpop.eup %5107 }
0x5665   :  { %v3794_v43 = vmul.f32 %v5108_v38, %v3792_v42 }
0x56c8   :  { %v3797_v39 = vpop.permute.xlu1 %3796 }
0x56c9   :  { %v3799_v41 = vmul.f32 %v5108_v38, %v3797_v39 }
0x56cb   :  { %3801 = vrot.lane.b32.xlu0 %v3799_v41, %s5115_s19 }
0x56cf   :  { %3830 = vrot.lane.b32.xlu0 %v5715_v11, %s5115_s19  ;;  %v3819_v11 = vld [vmem:[%s5788_s4 + $0x10] sm:$0xff] }
0x56d0   :  { %v4846_v49 = vpack.c.bf16 %v3820_v8, %v3819_v11 }
0x56d2   :  { %4847 = vmatprep.subr.bf16.mxu0 %v4846_v49 }
0x56d3   :  { %4849 = vmatpush3.bf16.msra.mxu0 %v4846_v49 }
0x573d   :  { %v3802_v9 = vpop.permute.xlu0 %3801 }
0x573e   :  { %v3804_v44 = vadd.f32 %v3802_v9, %v3794_v43 }
0x5740   :  { %5109 = vtanh.f32 %v3804_v44 }
0x5741   :  { %v3831_v45 = vpop.permute.xlu0 %3830 }
0x5742   :  { %4615 = vmatprep.mubr.msk.f32.mxu0 %vm36_vm0, %v3831_v45 }
0x574a   :  { %v5110_v50 = vpop.eup %5109 }
0x574b   :  { %3807 = vrot.lane.b32.xlu1 %v5110_v50, %s5114_s18 }
0x57bd   :  { %v3808_v51 = vpop.permute.xlu1 %3807 }
0x57be   :  { %v3810_v15 = vmul.f32 %v5108_v38, %v3808_v51 }
0x57c0   :  { %v3816_v52 = vsel %vm968_vm4, %v3815_v28, %v3810_v15 }
0x57c1   :  { %3832 = vrot.lane.b32.xlu1 %v3816_v52, %s5115_s19 }
0x5833   :  { %v3833_v17 = vpop.permute.xlu1 %3832 }
0x5834   :  { %4616 = vmatmul.mubr.msk.f32.vlgmr.msra.gmra.mrb[36].mxu0 %vm36_vm0, %v3833_v17 }
0x5907   :  { %v4617_v54 = vpop.f32.mrb[36].mxu0 }
0x5908   :  { %v3910_v55 = vadd.f32 %v4617_v54, %v4018_v53  ;;  %v3904_v19 = vpop.f32.mrb[37].mxu0 }
0x5909   :  { %v3905_v4 = vadd.f32 %v4018_v53, %v3904_v19 }
0x590a   :  { %3914 = vst [vmem:[%s5790_s6 + $0x8] sm:$0xff] %v3910_v55 }
0x590b   :  { %3913 = vst [vmem:[%s5790_s6] sm:$0xff] %v3905_v4 }

</bundles_post_ra>
